<compile_context>
chip_gen: v6e
topology: v6e:2x2x1
jax: 0.10.0
libtpu: 0.0.40
codegen_flags: <defaults>
</compile_context>

<pallas_src>
import math
import numpy as np
import jax
import jax.numpy as jnp
from jax.experimental import pallas as pl
from jax.experimental.pallas import tpu as pltpu


# ---------------------------------------------------------------------------
# Pallas kernel (polyphase transposed conv + bias + optional LeakyReLU)
# ---------------------------------------------------------------------------
def _make_polyphase_kernel(s, Kp, Qd, Qh, Qw, c_by_r, pad_lo, neg_slope):
    """Build the per-batch kernel body.  All sizes/offsets are static."""
    Mp = Qd * Qh * Qw
    n_tap = Kp * Kp * Kp

    def kernel(x_ref, w_ref, b_ref, o_ref):
        # x_ref: (Dp, Hp, Wp, Cin)       zero-padded (NOT dilated), channels-last
        # w_ref: (s^3 * Kp^3, Cin, Cout) per-(phase, tap) weight matrices
        # b_ref: (1, Cout)
        # o_ref: (s^3, Mp, Cout)         phase-major flattened output
        Cin = x_ref.shape[-1]
        Cout = o_ref.shape[-1]
        bias = b_ref[...].astype(jnp.float32)           # (1, Cout)

        for rd in range(s):
            cd = c_by_r[rd] + pad_lo
            for rh in range(s):
                ch = c_by_r[rh] + pad_lo
                for rw in range(s):
                    cw = c_by_r[rw] + pad_lo
                    ph = (rd * s + rh) * s + rw
                    acc = jnp.zeros((Mp, Cout), jnp.float32)
                    # (K/s)^3 taps, each an (Mp, Cin) @ (Cin, Cout) MXU matmul.
                    for jd in range(Kp):
                        for jh in range(Kp):
                            for jw in range(Kp):
                                xs = x_ref[pl.ds(cd - jd, Qd),
                                           pl.ds(ch - jh, Qh),
                                           pl.ds(cw - jw, Qw), :]
                                xm = xs.reshape(Mp, Cin)
                                flat = ph * n_tap + (jd * Kp + jh) * Kp + jw
                                wt = w_ref[flat, :, :]
                                acc = acc + jnp.dot(
                                    xm, wt, preferred_element_type=jnp.float32)
                    acc = acc + bias                      # broadcast (1, Cout)
                    if neg_slope is not None:             # fused LeakyReLU
                        acc = jnp.where(acc >= 0, acc, acc * neg_slope)
                    o_ref[ph, :, :] = acc.astype(o_ref.dtype)

    return kernel


# ---------------------------------------------------------------------------
# Wrapper: getweight, polyphase weight/layout prep, pallas_call, un-interleave
# ---------------------------------------------------------------------------
def conv_transpose3d_elr_forward(x, weight, bias, *, stride, padding,
                                 weightgain, norm=None, act_negative_slope=None):
    """JAX/Pallas equivalent of ConvTranspose3dELR.forward (w=None path).

    x:      (N, Cin, D, H, W)
    weight: (Cin, Cout, K, K, K)   (PyTorch conv_transpose3d layout)
    bias:   (Cout,)
    """
    N, Cin, Din, Hin, Win = x.shape
    Cw, Cout, K, K2, K3 = weight.shape
    assert Cw == Cin and K == K2 == K3
    s, p = int(stride), int(padding)
    assert s >= 1 and 0 <= p <= K - 1 and K % s == 0
    Kp = K // s

    # ---- getweight(): optional demod norm, then equalized-LR gain ----------
    # (The module's intent is per-output-channel normalization over (Cin, k, k, k);
    #  we use axis (0, 2, 3, 4) on the (Cin, Cout, K, K, K) weight.)
    w = weight.astype(jnp.float32)
    if norm == "demod":
        nrm = jnp.sqrt(jnp.sum(w * w, axis=(0, 2, 3, 4), keepdims=True))
        w = w / jnp.maximum(nrm, 1e-12)
    w = w * jnp.float32(weightgain)

    Dout = (Din - 1) * s - 2 * p + K
    Hout = (Hin - 1) * s - 2 * p + K
    Wout = (Win - 1) * s - 2 * p + K
    assert Dout > 0 and Hout > 0 and Wout > 0

    # ---- polyphase parameters (identical for every spatial dim) ------------
    t_by_r = [(r + p) % s for r in range(s)]     # kernel-tap residue per phase
    c_by_r = [(r + p) // s for r in range(s)]    # input shift per phase
    c_max = (p + s - 1) // s
    pad_lo = (Kp - 1) - p // s                   # >= 0 since p <= K-1
    Qd, Qh, Qw = pl.cdiv(Dout, s), pl.cdiv(Hout, s), pl.cdiv(Wout, s)
    pad_hi_d = max(0, Qd + c_max - Din)
    pad_hi_h = max(0, Qh + c_max - Hin)
    pad_hi_w = max(0, Qw + c_max - Win)

    # NCDHW -> NDHWC (channels on the lane axis) + zero halo. NO zero-dilation.
    x_cl = jnp.transpose(x, (0, 2, 3, 4, 1)).astype(jnp.float32)
    xp = jnp.pad(x_cl, ((0, 0),
                        (pad_lo, pad_hi_d),
                        (pad_lo, pad_hi_h),
                        (pad_lo, pad_hi_w),
                        (0, 0)))
    Dp, Hp, Wp = xp.shape[1], xp.shape[2], xp.shape[3]

    # Per-(phase, tap) weight matrices: wk[ph*Kp^3 + tap] = w[:, :, jd*s+t_d, ...].T
    w_r = jnp.transpose(w, (2, 3, 4, 0, 1)).reshape(Kp, s, Kp, s, Kp, s, Cin, Cout)
    slabs = []
    for rd in range(s):
        for rh in range(s):
            for rw in range(s):
                wp = w_r[:, t_by_r[rd], :, t_by_r[rh], :, t_by_r[rw], :, :]
                slabs.append(wp.reshape(Kp * Kp * Kp, Cin, Cout))
    wk = jnp.concatenate(slabs, axis=0)          # (s^3 * Kp^3, Cin, Cout)

    n_ph = s ** 3
    Mp = Qd * Qh * Qw
    bias2 = bias.reshape(1, Cout).astype(jnp.float32)

    kernel = _make_polyphase_kernel(s, Kp, Qd, Qh, Qw, c_by_r, pad_lo,
                                    act_negative_slope)
    out_ph = pl.pallas_call(
        kernel,
        out_shape=jax.ShapeDtypeStruct((N, n_ph, Mp, Cout), x.dtype),
        grid=(N,),
        in_specs=[
            pl.BlockSpec((pl.Squeezed(), Dp, Hp, Wp, Cin),
                         lambda n: (n, 0, 0, 0, 0)),
            pl.BlockSpec((n_ph * Kp * Kp * Kp, Cin, Cout), lambda n: (0, 0, 0)),
            pl.BlockSpec((1, Cout), lambda n: (0, 0)),
        ],
        out_specs=pl.BlockSpec((pl.Squeezed(), n_ph, Mp, Cout),
                               lambda n: (n, 0, 0, 0)),
        compiler_params=pltpu.CompilerParams(dimension_semantics=("parallel",)),
    )(xp, wk, bias2)

    # Un-interleave phases (pure layout glue, outside the kernel):
    # (N, s,s,s, Qd,Qh,Qw, C) -> (N, Qd,s, Qh,s, Qw,s, C) -> (N, Dout', Hout', Wout', C)
    out = out_ph.reshape(N, s, s, s, Qd, Qh, Qw, Cout)
    out = out.transpose(0, 4, 1, 5, 2, 6, 3, 7).reshape(
        N, Qd * s, Qh * s, Qw * s, Cout)
    out = out[:, :Dout, :Hout, :Wout, :]          # drop over-computed rows
    return out.transpose(0, 4, 1, 2, 3)           # -> NCDHW


# ---------------------------------------------------------------------------
# Module-like parameter container (mirrors ConvTranspose3dELR.__init__)
# ---------------------------------------------------------------------------
class ConvTranspose3dELRPallas:
    def __init__(self, key, inch, outch, kernel_size, stride, padding,
                 norm=None, act_negative_slope=None):
        K, s = int(kernel_size), int(stride)
        assert K % s == 0
        self.inch, self.outch = inch, outch
        self.kernel_size, self.stride, self.padding = K, s, int(padding)
        self.norm = norm
        self.act_negative_slope = act_negative_slope

        # actgain: nn.init.calculate_gain('leaky_relu', slope) for LeakyReLU, else 1.0
        if act_negative_slope is not None:
            actgain = math.sqrt(2.0 / (1.0 + act_negative_slope ** 2))
        else:
            actgain = 1.0
        fan_in = inch * (K ** 3 / s ** 3)
        initgain = s ** 1.5 if norm == "demod" else 1.0 / math.sqrt(fan_in)
        self.weightgain = actgain * initgain

        # blockinit(randn(inch, outch, K//s, K//s, K//s), s): each base tap is
        # repeated `s` times along every spatial dim.
        base = jax.random.normal(key, (inch, outch, K // s, K // s, K // s),
                                 jnp.float32)
        w = jnp.repeat(base, s, axis=2)
        w = jnp.repeat(w, s, axis=3)
        w = jnp.repeat(w, s, axis=4)
        self.weight = w
        self.bias = jnp.zeros((outch,), jnp.float32)

    def __call__(self, x):
        return conv_transpose3d_elr_forward(
            x, self.weight, self.bias,
            stride=self.stride, padding=self.padding,
            weightgain=self.weightgain, norm=self.norm,
            act_negative_slope=self.act_negative_slope)


# ---------------------------------------------------------------------------
# Independent numpy reference: definitional scatter-add form of conv_transpose3d
# ---------------------------------------------------------------------------
def _reference_numpy(x, weight, bias, stride, padding, weightgain,
                     norm=None, act_negative_slope=None):
    x = np.asarray(x, np.float64)
    w = np.asarray(weight, np.float64)
    if norm == "demod":
        nrm = np.sqrt(np.sum(w * w, axis=(0, 2, 3, 4), keepdims=True))
        w = w / np.maximum(nrm, 1e-12)
    w = w * float(weightgain)
    N, Cin, Din, Hin, Win = x.shape
    _, Cout, K, _, _ = w.shape
    s, p = int(stride), int(padding)
    Df, Hf, Wf = (Din - 1) * s + K, (Hin - 1) * s + K, (Win - 1) * s + K
    full = np.zeros((N, Cout, Df, Hf, Wf), np.float64)
    for i in range(Din):
        for j in range(Hin):
            for l in range(Win):
                contrib = np.einsum("nc,coxyz->noxyz", x[:, :, i, j, l], w)
                full[:, :, i * s:i * s + K, j * s:j * s + K, l * s:l * s + K] += contrib
    out = full[:, :, p:Df - p, p:Hf - p, p:Wf - p]
    out = out + np.asarray(bias, np.float64)[None, :, None, None, None]
    if act_negative_slope is not None:
        out = np.where(out >= 0.0, out, out * act_negative_slope)
    return out


if __name__ == "__main__":
    key = jax.random.PRNGKey(0)
    kx, kw1, kw2, kw2b, kw3, kx3 = jax.random.split(key, 6)

    # Small shapes consistent with the module: a 4^3 -> 8^3 upsampler.
    N, Cin, Cout = 2, 4, 8
    D = H = W = 4
    K, s, p = 4, 2, 1

    x = jax.random.normal(kx, (N, Cin, D, H, W), dtype=jnp.float32)

    # Case 1: norm=None, act=None (plain transposed conv + bias).
    mod1 = ConvTranspose3dELRPallas(kw1, Cin, Cout, K, s, p)
    y1 = mod1(x)
    jax.block_until_ready(y1)
    r1 = _reference_numpy(x, mod1.weight, mod1.bias, s, p, mod1.weightgain)
    assert y1.shape == (N, Cout, 8, 8, 8), y1.shape
    assert np.allclose(np.asarray(y1), r1, atol=1e-3, rtol=1e-3)

    # Case 2: fused LeakyReLU(0.2), nonzero bias, fully arbitrary (non-block)
    # weights to exercise every (phase, tap) independently.
    mod2 = ConvTranspose3dELRPallas(kw2, Cin, Cout, K, s, p, act_negative_slope=0.2)
    mod2.weight = jax.random.normal(kw2b, (Cin, Cout, K, K, K), dtype=jnp.float32)
    mod2.bias = 0.1 * jnp.arange(Cout, dtype=jnp.float32)
    y2 = mod2(x)
    jax.block_until_ready(y2)
    r2 = _reference_numpy(x, mod2.weight, mod2.bias, s, p, mod2.weightgain,
                          act_negative_slope=0.2)
    assert y2.shape == (N, Cout, 8, 8, 8), y2.shape
    assert np.allclose(np.asarray(y2), r2, atol=1e-3, rtol=1e-3)

    # Case 3: norm='demod' + LeakyReLU, K=3/s=3/p=1 with non-cubic input
    # (exercises the over-compute + slice path where Dout % s != 0).
    D3, H3, W3 = 3, 4, 5
    mod3 = ConvTranspose3dELRPallas(kw3, Cin, Cout, 3, 3, 1,
                                    norm="demod", act_negative_slope=0.2)
    mod3.bias = 0.05 * jnp.arange(Cout, dtype=jnp.float32)
    x3 = jax.random.normal(kx3, (N, Cin, D3, H3, W3), dtype=jnp.float32)
    y3 = mod3(x3)
    jax.block_until_ready(y3)
    r3 = _reference_numpy(x3, mod3.weight, mod3.bias, 3, 1, mod3.weightgain,
                          norm="demod", act_negative_slope=0.2)
    assert y3.shape == r3.shape, (y3.shape, r3.shape)
    assert np.allclose(np.asarray(y3), r3, atol=1e-3, rtol=1e-3)

    print("KERNEL_OK")
</pallas_src>

<mosaic_0001>
module attributes {stable_mosaic.version = 11 : i64} {
  func.func @kernel(%arg0: i32, %arg1: memref<1x6x6x6x4xf32, #tpu.memory_space<vmem>>, %arg2: memref<64x4x8xf32, #tpu.memory_space<vmem>>, %arg3: memref<1x8xf32, #tpu.memory_space<vmem>>, %arg4: memref<1x8x64x8xf32, #tpu.memory_space<vmem>>) attributes {dimension_semantics = [#tpu.dimension_semantics<parallel>], iteration_bounds = array<i64: 2>, scalar_prefetch = 0 : i64, scratch_operands = 0 : i64, tpu.core_type = #tpu.core_type<tc>, window_params = [{transform_indices = @transform_0, window_bounds = array<i64: 1, 6, 6, 6, 4>}, {pipeline_mode = #tpu.pipeline_mode<synchronous>, transform_indices = @transform_1, window_bounds = array<i64: 64, 4, 8>}, {pipeline_mode = #tpu.pipeline_mode<synchronous>, transform_indices = @transform_2, window_bounds = array<i64: 1, 8>}, {transform_indices = @transform_3, window_bounds = array<i64: 1, 8, 64, 8>}]} {
    %c0 = arith.constant 0 : index
    %c0_0 = arith.constant 0 : index
    %0 = vector.load %arg3[%c0, %c0_0] : memref<1x8xf32, #tpu.memory_space<vmem>>, vector<1x8xf32>
    %cst = arith.constant 0.000000e+00 : f32
    %1 = vector.broadcast %cst : f32 to vector<64x8xf32>
    %c0_1 = arith.constant 0 : index
    %c1 = arith.constant 1 : index
    %c1_2 = arith.constant 1 : index
    %c1_3 = arith.constant 1 : index
    %c0_4 = arith.constant 0 : index
    %2 = vector.load %arg1[%c0_1, %c1, %c1_2, %c1_3, %c0_4] : memref<1x6x6x6x4xf32, #tpu.memory_space<vmem>>, vector<1x4x4x4x4xf32>
    %3 = vector.shape_cast %2 : vector<1x4x4x4x4xf32> to vector<4x4x4x4xf32>
    %4 = vector.shape_cast %3 : vector<4x4x4x4xf32> to vector<64x4xf32>
    %c0_5 = arith.constant 0 : index
    %c0_6 = arith.constant 0 : index
    %c0_7 = arith.constant 0 : index
    %5 = vector.load %arg2[%c0_5, %c0_6, %c0_7] : memref<64x4x8xf32, #tpu.memory_space<vmem>>, vector<1x4x8xf32>
    %6 = vector.shape_cast %5 : vector<1x4x8xf32> to vector<4x8xf32>
    %cst_8 = arith.constant dense<0.000000e+00> : vector<64x8xf32>
    %7 = tpu.matmul %4, %6, %cst_8 {dimension_numbers = #tpu.dot_dimension_numbers<[1], [0], [0], [1], [0, 0, 1, 1], [], []>} : vector<64x4xf32>, vector<4x8xf32>, vector<64x8xf32> -> vector<64x8xf32>
    %8 = arith.addf %1, %7 : vector<64x8xf32>
    %c0_9 = arith.constant 0 : index
    %c1_10 = arith.constant 1 : index
    %c1_11 = arith.constant 1 : index
    %c0_12 = arith.constant 0 : index
    %c0_13 = arith.constant 0 : index
    %9 = vector.load %arg1[%c0_9, %c1_10, %c1_11, %c0_12, %c0_13] : memref<1x6x6x6x4xf32, #tpu.memory_space<vmem>>, vector<1x4x4x4x4xf32>
    %10 = vector.shape_cast %9 : vector<1x4x4x4x4xf32> to vector<4x4x4x4xf32>
    %11 = vector.shape_cast %10 : vector<4x4x4x4xf32> to vector<64x4xf32>
    %c1_14 = arith.constant 1 : index
    %c0_15 = arith.constant 0 : index
    %c0_16 = arith.constant 0 : index
    %12 = vector.load %arg2[%c1_14, %c0_15, %c0_16] : memref<64x4x8xf32, #tpu.memory_space<vmem>>, vector<1x4x8xf32>
    %13 = vector.shape_cast %12 : vector<1x4x8xf32> to vector<4x8xf32>
    %cst_17 = arith.constant dense<0.000000e+00> : vector<64x8xf32>
    %14 = tpu.matmul %11, %13, %cst_17 {dimension_numbers = #tpu.dot_dimension_numbers<[1], [0], [0], [1], [0, 0, 1, 1], [], []>} : vector<64x4xf32>, vector<4x8xf32>, vector<64x8xf32> -> vector<64x8xf32>
    %15 = arith.addf %8, %14 : vector<64x8xf32>
    %c0_18 = arith.constant 0 : index
    %c1_19 = arith.constant 1 : index
    %c0_20 = arith.constant 0 : index
    %c1_21 = arith.constant 1 : index
    %c0_22 = arith.constant 0 : index
    %16 = vector.load %arg1[%c0_18, %c1_19, %c0_20, %c1_21, %c0_22] : memref<1x6x6x6x4xf32, #tpu.memory_space<vmem>>, vector<1x4x4x4x4xf32>
    %17 = vector.shape_cast %16 : vector<1x4x4x4x4xf32> to vector<4x4x4x4xf32>
    %18 = vector.shape_cast %17 : vector<4x4x4x4xf32> to vector<64x4xf32>
    %c2 = arith.constant 2 : index
    %c0_23 = arith.constant 0 : index
    %c0_24 = arith.constant 0 : index
    %19 = vector.load %arg2[%c2, %c0_23, %c0_24] : memref<64x4x8xf32, #tpu.memory_space<vmem>>, vector<1x4x8xf32>
    %20 = vector.shape_cast %19 : vector<1x4x8xf32> to vector<4x8xf32>
    %cst_25 = arith.constant dense<0.000000e+00> : vector<64x8xf32>
    %21 = tpu.matmul %18, %20, %cst_25 {dimension_numbers = #tpu.dot_dimension_numbers<[1], [0], [0], [1], [0, 0, 1, 1], [], []>} : vector<64x4xf32>, vector<4x8xf32>, vector<64x8xf32> -> vector<64x8xf32>
    %22 = arith.addf %15, %21 : vector<64x8xf32>
    %c0_26 = arith.constant 0 : index
    %c1_27 = arith.constant 1 : index
    %c0_28 = arith.constant 0 : index
    %c0_29 = arith.constant 0 : index
    %c0_30 = arith.constant 0 : index
    %23 = vector.load %arg1[%c0_26, %c1_27, %c0_28, %c0_29, %c0_30] : memref<1x6x6x6x4xf32, #tpu.memory_space<vmem>>, vector<1x4x4x4x4xf32>
    %24 = vector.shape_cast %23 : vector<1x4x4x4x4xf32> to vector<4x4x4x4xf32>
    %25 = vector.shape_cast %24 : vector<4x4x4x4xf32> to vector<64x4xf32>
    %c3 = arith.constant 3 : index
    %c0_31 = arith.constant 0 : index
    %c0_32 = arith.constant 0 : index
    %26 = vector.load %arg2[%c3, %c0_31, %c0_32] : memref<64x4x8xf32, #tpu.memory_space<vmem>>, vector<1x4x8xf32>
    %27 = vector.shape_cast %26 : vector<1x4x8xf32> to vector<4x8xf32>
    %cst_33 = arith.constant dense<0.000000e+00> : vector<64x8xf32>
    %28 = tpu.matmul %25, %27, %cst_33 {dimension_numbers = #tpu.dot_dimension_numbers<[1], [0], [0], [1], [0, 0, 1, 1], [], []>} : vector<64x4xf32>, vector<4x8xf32>, vector<64x8xf32> -> vector<64x8xf32>
    %29 = arith.addf %22, %28 : vector<64x8xf32>
    %c0_34 = arith.constant 0 : index
    %c0_35 = arith.constant 0 : index
    %c1_36 = arith.constant 1 : index
    %c1_37 = arith.constant 1 : index
    %c0_38 = arith.constant 0 : index
    %30 = vector.load %arg1[%c0_34, %c0_35, %c1_36, %c1_37, %c0_38] : memref<1x6x6x6x4xf32, #tpu.memory_space<vmem>>, vector<1x4x4x4x4xf32>
    %31 = vector.shape_cast %30 : vector<1x4x4x4x4xf32> to vector<4x4x4x4xf32>
    %32 = vector.shape_cast %31 : vector<4x4x4x4xf32> to vector<64x4xf32>
    %c4 = arith.constant 4 : index
    %c0_39 = arith.constant 0 : index
    %c0_40 = arith.constant 0 : index
    %33 = vector.load %arg2[%c4, %c0_39, %c0_40] : memref<64x4x8xf32, #tpu.memory_space<vmem>>, vector<1x4x8xf32>
    %34 = vector.shape_cast %33 : vector<1x4x8xf32> to vector<4x8xf32>
    %cst_41 = arith.constant dense<0.000000e+00> : vector<64x8xf32>
    %35 = tpu.matmul %32, %34, %cst_41 {dimension_numbers = #tpu.dot_dimension_numbers<[1], [0], [0], [1], [0, 0, 1, 1], [], []>} : vector<64x4xf32>, vector<4x8xf32>, vector<64x8xf32> -> vector<64x8xf32>
    %36 = arith.addf %29, %35 : vector<64x8xf32>
    %c0_42 = arith.constant 0 : index
    %c0_43 = arith.constant 0 : index
    %c1_44 = arith.constant 1 : index
    %c0_45 = arith.constant 0 : index
    %c0_46 = arith.constant 0 : index
    %37 = vector.load %arg1[%c0_42, %c0_43, %c1_44, %c0_45, %c0_46] : memref<1x6x6x6x4xf32, #tpu.memory_space<vmem>>, vector<1x4x4x4x4xf32>
    %38 = vector.shape_cast %37 : vector<1x4x4x4x4xf32> to vector<4x4x4x4xf32>
    %39 = vector.shape_cast %38 : vector<4x4x4x4xf32> to vector<64x4xf32>
    %c5 = arith.constant 5 : index
    %c0_47 = arith.constant 0 : index
    %c0_48 = arith.constant 0 : index
    %40 = vector.load %arg2[%c5, %c0_47, %c0_48] : memref<64x4x8xf32, #tpu.memory_space<vmem>>, vector<1x4x8xf32>
    %41 = vector.shape_cast %40 : vector<1x4x8xf32> to vector<4x8xf32>
    %cst_49 = arith.constant dense<0.000000e+00> : vector<64x8xf32>
    %42 = tpu.matmul %39, %41, %cst_49 {dimension_numbers = #tpu.dot_dimension_numbers<[1], [0], [0], [1], [0, 0, 1, 1], [], []>} : vector<64x4xf32>, vector<4x8xf32>, vector<64x8xf32> -> vector<64x8xf32>
    %43 = arith.addf %36, %42 : vector<64x8xf32>
    %c0_50 = arith.constant 0 : index
    %c0_51 = arith.constant 0 : index
    %c0_52 = arith.constant 0 : index
    %c1_53 = arith.constant 1 : index
    %c0_54 = arith.constant 0 : index
    %44 = vector.load %arg1[%c0_50, %c0_51, %c0_52, %c1_53, %c0_54] : memref<1x6x6x6x4xf32, #tpu.memory_space<vmem>>, vector<1x4x4x4x4xf32>
    %45 = vector.shape_cast %44 : vector<1x4x4x4x4xf32> to vector<4x4x4x4xf32>
    %46 = vector.shape_cast %45 : vector<4x4x4x4xf32> to vector<64x4xf32>
    %c6 = arith.constant 6 : index
    %c0_55 = arith.constant 0 : index
    %c0_56 = arith.constant 0 : index
    %47 = vector.load %arg2[%c6, %c0_55, %c0_56] : memref<64x4x8xf32, #tpu.memory_space<vmem>>, vector<1x4x8xf32>
    %48 = vector.shape_cast %47 : vector<1x4x8xf32> to vector<4x8xf32>
    %cst_57 = arith.constant dense<0.000000e+00> : vector<64x8xf32>
    %49 = tpu.matmul %46, %48, %cst_57 {dimension_numbers = #tpu.dot_dimension_numbers<[1], [0], [0], [1], [0, 0, 1, 1], [], []>} : vector<64x4xf32>, vector<4x8xf32>, vector<64x8xf32> -> vector<64x8xf32>
    %50 = arith.addf %43, %49 : vector<64x8xf32>
    %c0_58 = arith.constant 0 : index
    %c0_59 = arith.constant 0 : index
    %c0_60 = arith.constant 0 : index
    %c0_61 = arith.constant 0 : index
    %c0_62 = arith.constant 0 : index
    %51 = vector.load %arg1[%c0_58, %c0_59, %c0_60, %c0_61, %c0_62] : memref<1x6x6x6x4xf32, #tpu.memory_space<vmem>>, vector<1x4x4x4x4xf32>
    %52 = vector.shape_cast %51 : vector<1x4x4x4x4xf32> to vector<4x4x4x4xf32>
    %53 = vector.shape_cast %52 : vector<4x4x4x4xf32> to vector<64x4xf32>
    %c7 = arith.constant 7 : index
    %c0_63 = arith.constant 0 : index
    %c0_64 = arith.constant 0 : index
    %54 = vector.load %arg2[%c7, %c0_63, %c0_64] : memref<64x4x8xf32, #tpu.memory_space<vmem>>, vector<1x4x8xf32>
    %55 = vector.shape_cast %54 : vector<1x4x8xf32> to vector<4x8xf32>
    %cst_65 = arith.constant dense<0.000000e+00> : vector<64x8xf32>
    %56 = tpu.matmul %53, %55, %cst_65 {dimension_numbers = #tpu.dot_dimension_numbers<[1], [0], [0], [1], [0, 0, 1, 1], [], []>} : vector<64x4xf32>, vector<4x8xf32>, vector<64x8xf32> -> vector<64x8xf32>
    %57 = arith.addf %50, %56 : vector<64x8xf32>
    %58 = vector.broadcast %0 : vector<1x8xf32> to vector<64x8xf32>
    %59 = arith.addf %57, %58 : vector<64x8xf32>
    %c0_66 = arith.constant 0 : index
    %c0_67 = arith.constant 0 : index
    %c0_68 = arith.constant 0 : index
    %c0_69 = arith.constant 0 : index
    %60 = vector.load %arg4[%c0_66, %c0_67, %c0_68, %c0_69] : memref<1x8x64x8xf32, #tpu.memory_space<vmem>>, vector<1x1x64x8xf32>
    %61 = vector.shape_cast %60 : vector<1x1x64x8xf32> to vector<64x8xf32>
    %62 = vector.shape_cast %59 : vector<64x8xf32> to vector<1x1x64x8xf32>
    tpu.vector_store %arg4[%c0_66, %c0_67, %c0_68, %c0_69], %62 {strides = array<i32>} : memref<1x8x64x8xf32, #tpu.memory_space<vmem>>, vector<1x1x64x8xf32>,
    %cst_70 = arith.constant 0.000000e+00 : f32
    %63 = vector.broadcast %cst_70 : f32 to vector<64x8xf32>
    %c0_71 = arith.constant 0 : index
    %c1_72 = arith.constant 1 : index
    %c1_73 = arith.constant 1 : index
    %c2_74 = arith.constant 2 : index
    %c0_75 = arith.constant 0 : index
    %64 = vector.load %arg1[%c0_71, %c1_72, %c1_73, %c2_74, %c0_75] : memref<1x6x6x6x4xf32, #tpu.memory_space<vmem>>, vector<1x4x4x4x4xf32>
    %65 = vector.shape_cast %64 : vector<1x4x4x4x4xf32> to vector<4x4x4x4xf32>
    %66 = vector.shape_cast %65 : vector<4x4x4x4xf32> to vector<64x4xf32>
    %c8 = arith.constant 8 : index
    %c0_76 = arith.constant 0 : index
    %c0_77 = arith.constant 0 : index
    %67 = vector.load %arg2[%c8, %c0_76, %c0_77] : memref<64x4x8xf32, #tpu.memory_space<vmem>>, vector<1x4x8xf32>
    %68 = vector.shape_cast %67 : vector<1x4x8xf32> to vector<4x8xf32>
    %cst_78 = arith.constant dense<0.000000e+00> : vector<64x8xf32>
    %69 = tpu.matmul %66, %68, %cst_78 {dimension_numbers = #tpu.dot_dimension_numbers<[1], [0], [0], [1], [0, 0, 1, 1], [], []>} : vector<64x4xf32>, vector<4x8xf32>, vector<64x8xf32> -> vector<64x8xf32>
    %70 = arith.addf %63, %69 : vector<64x8xf32>
    %c0_79 = arith.constant 0 : index
    %c1_80 = arith.constant 1 : index
    %c1_81 = arith.constant 1 : index
    %c1_82 = arith.constant 1 : index
    %c0_83 = arith.constant 0 : index
    %71 = vector.load %arg1[%c0_79, %c1_80, %c1_81, %c1_82, %c0_83] : memref<1x6x6x6x4xf32, #tpu.memory_space<vmem>>, vector<1x4x4x4x4xf32>
    %72 = vector.shape_cast %71 : vector<1x4x4x4x4xf32> to vector<4x4x4x4xf32>
    %73 = vector.shape_cast %72 : vector<4x4x4x4xf32> to vector<64x4xf32>
    %c9 = arith.constant 9 : index
    %c0_84 = arith.constant 0 : index
    %c0_85 = arith.constant 0 : index
    %74 = vector.load %arg2[%c9, %c0_84, %c0_85] : memref<64x4x8xf32, #tpu.memory_space<vmem>>, vector<1x4x8xf32>
    %75 = vector.shape_cast %74 : vector<1x4x8xf32> to vector<4x8xf32>
    %cst_86 = arith.constant dense<0.000000e+00> : vector<64x8xf32>
    %76 = tpu.matmul %73, %75, %cst_86 {dimension_numbers = #tpu.dot_dimension_numbers<[1], [0], [0], [1], [0, 0, 1, 1], [], []>} : vector<64x4xf32>, vector<4x8xf32>, vector<64x8xf32> -> vector<64x8xf32>
    %77 = arith.addf %70, %76 : vector<64x8xf32>
    %c0_87 = arith.constant 0 : index
    %c1_88 = arith.constant 1 : index
    %c0_89 = arith.constant 0 : index
    %c2_90 = arith.constant 2 : index
    %c0_91 = arith.constant 0 : index
    %78 = vector.load %arg1[%c0_87, %c1_88, %c0_89, %c2_90, %c0_91] : memref<1x6x6x6x4xf32, #tpu.memory_space<vmem>>, vector<1x4x4x4x4xf32>
    %79 = vector.shape_cast %78 : vector<1x4x4x4x4xf32> to vector<4x4x4x4xf32>
    %80 = vector.shape_cast %79 : vector<4x4x4x4xf32> to vector<64x4xf32>
    %c10 = arith.constant 10 : index
    %c0_92 = arith.constant 0 : index
    %c0_93 = arith.constant 0 : index
    %81 = vector.load %arg2[%c10, %c0_92, %c0_93] : memref<64x4x8xf32, #tpu.memory_space<vmem>>, vector<1x4x8xf32>
    %82 = vector.shape_cast %81 : vector<1x4x8xf32> to vector<4x8xf32>
    %cst_94 = arith.constant dense<0.000000e+00> : vector<64x8xf32>
    %83 = tpu.matmul %80, %82, %cst_94 {dimension_numbers = #tpu.dot_dimension_numbers<[1], [0], [0], [1], [0, 0, 1, 1], [], []>} : vector<64x4xf32>, vector<4x8xf32>, vector<64x8xf32> -> vector<64x8xf32>
    %84 = arith.addf %77, %83 : vector<64x8xf32>
    %c0_95 = arith.constant 0 : index
    %c1_96 = arith.constant 1 : index
    %c0_97 = arith.constant 0 : index
    %c1_98 = arith.constant 1 : index
    %c0_99 = arith.constant 0 : index
    %85 = vector.load %arg1[%c0_95, %c1_96, %c0_97, %c1_98, %c0_99] : memref<1x6x6x6x4xf32, #tpu.memory_space<vmem>>, vector<1x4x4x4x4xf32>
    %86 = vector.shape_cast %85 : vector<1x4x4x4x4xf32> to vector<4x4x4x4xf32>
    %87 = vector.shape_cast %86 : vector<4x4x4x4xf32> to vector<64x4xf32>
    %c11 = arith.constant 11 : index
    %c0_100 = arith.constant 0 : index
    %c0_101 = arith.constant 0 : index
    %88 = vector.load %arg2[%c11, %c0_100, %c0_101] : memref<64x4x8xf32, #tpu.memory_space<vmem>>, vector<1x4x8xf32>
    %89 = vector.shape_cast %88 : vector<1x4x8xf32> to vector<4x8xf32>
    %cst_102 = arith.constant dense<0.000000e+00> : vector<64x8xf32>
    %90 = tpu.matmul %87, %89, %cst_102 {dimension_numbers = #tpu.dot_dimension_numbers<[1], [0], [0], [1], [0, 0, 1, 1], [], []>} : vector<64x4xf32>, vector<4x8xf32>, vector<64x8xf32> -> vector<64x8xf32>
    %91 = arith.addf %84, %90 : vector<64x8xf32>
    %c0_103 = arith.constant 0 : index
    %c0_104 = arith.constant 0 : index
    %c1_105 = arith.constant 1 : index
    %c2_106 = arith.constant 2 : index
    %c0_107 = arith.constant 0 : index
    %92 = vector.load %arg1[%c0_103, %c0_104, %c1_105, %c2_106, %c0_107] : memref<1x6x6x6x4xf32, #tpu.memory_space<vmem>>, vector<1x4x4x4x4xf32>
    %93 = vector.shape_cast %92 : vector<1x4x4x4x4xf32> to vector<4x4x4x4xf32>
    %94 = vector.shape_cast %93 : vector<4x4x4x4xf32> to vector<64x4xf32>
    %c12 = arith.constant 12 : index
    %c0_108 = arith.constant 0 : index
    %c0_109 = arith.constant 0 : index
    %95 = vector.load %arg2[%c12, %c0_108, %c0_109] : memref<64x4x8xf32, #tpu.memory_space<vmem>>, vector<1x4x8xf32>
    %96 = vector.shape_cast %95 : vector<1x4x8xf32> to vector<4x8xf32>
    %cst_110 = arith.constant dense<0.000000e+00> : vector<64x8xf32>
    %97 = tpu.matmul %94, %96, %cst_110 {dimension_numbers = #tpu.dot_dimension_numbers<[1], [0], [0], [1], [0, 0, 1, 1], [], []>} : vector<64x4xf32>, vector<4x8xf32>, vector<64x8xf32> -> vector<64x8xf32>
    %98 = arith.addf %91, %97 : vector<64x8xf32>
    %c0_111 = arith.constant 0 : index
    %c0_112 = arith.constant 0 : index
    %c1_113 = arith.constant 1 : index
    %c1_114 = arith.constant 1 : index
    %c0_115 = arith.constant 0 : index
    %99 = vector.load %arg1[%c0_111, %c0_112, %c1_113, %c1_114, %c0_115] : memref<1x6x6x6x4xf32, #tpu.memory_space<vmem>>, vector<1x4x4x4x4xf32>
    %100 = vector.shape_cast %99 : vector<1x4x4x4x4xf32> to vector<4x4x4x4xf32>
    %101 = vector.shape_cast %100 : vector<4x4x4x4xf32> to vector<64x4xf32>
    %c13 = arith.constant 13 : index
    %c0_116 = arith.constant 0 : index
    %c0_117 = arith.constant 0 : index
    %102 = vector.load %arg2[%c13, %c0_116, %c0_117] : memref<64x4x8xf32, #tpu.memory_space<vmem>>, vector<1x4x8xf32>
    %103 = vector.shape_cast %102 : vector<1x4x8xf32> to vector<4x8xf32>
    %cst_118 = arith.constant dense<0.000000e+00> : vector<64x8xf32>
    %104 = tpu.matmul %101, %103, %cst_118 {dimension_numbers = #tpu.dot_dimension_numbers<[1], [0], [0], [1], [0, 0, 1, 1], [], []>} : vector<64x4xf32>, vector<4x8xf32>, vector<64x8xf32> -> vector<64x8xf32>
    %105 = arith.addf %98, %104 : vector<64x8xf32>
    %c0_119 = arith.constant 0 : index
    %c0_120 = arith.constant 0 : index
    %c0_121 = arith.constant 0 : index
    %c2_122 = arith.constant 2 : index
    %c0_123 = arith.constant 0 : index
    %106 = vector.load %arg1[%c0_119, %c0_120, %c0_121, %c2_122, %c0_123] : memref<1x6x6x6x4xf32, #tpu.memory_space<vmem>>, vector<1x4x4x4x4xf32>
    %107 = vector.shape_cast %106 : vector<1x4x4x4x4xf32> to vector<4x4x4x4xf32>
    %108 = vector.shape_cast %107 : vector<4x4x4x4xf32> to vector<64x4xf32>
    %c14 = arith.constant 14 : index
    %c0_124 = arith.constant 0 : index
    %c0_125 = arith.constant 0 : index
    %109 = vector.load %arg2[%c14, %c0_124, %c0_125] : memref<64x4x8xf32, #tpu.memory_space<vmem>>, vector<1x4x8xf32>
    %110 = vector.shape_cast %109 : vector<1x4x8xf32> to vector<4x8xf32>
    %cst_126 = arith.constant dense<0.000000e+00> : vector<64x8xf32>
    %111 = tpu.matmul %108, %110, %cst_126 {dimension_numbers = #tpu.dot_dimension_numbers<[1], [0], [0], [1], [0, 0, 1, 1], [], []>} : vector<64x4xf32>, vector<4x8xf32>, vector<64x8xf32> -> vector<64x8xf32>
    %112 = arith.addf %105, %111 : vector<64x8xf32>
    %c0_127 = arith.constant 0 : index
    %c0_128 = arith.constant 0 : index
    %c0_129 = arith.constant 0 : index
    %c1_130 = arith.constant 1 : index
    %c0_131 = arith.constant 0 : index
    %113 = vector.load %arg1[%c0_127, %c0_128, %c0_129, %c1_130, %c0_131] : memref<1x6x6x6x4xf32, #tpu.memory_space<vmem>>, vector<1x4x4x4x4xf32>
    %114 = vector.shape_cast %113 : vector<1x4x4x4x4xf32> to vector<4x4x4x4xf32>
    %115 = vector.shape_cast %114 : vector<4x4x4x4xf32> to vector<64x4xf32>
    %c15 = arith.constant 15 : index
    %c0_132 = arith.constant 0 : index
    %c0_133 = arith.constant 0 : index
    %116 = vector.load %arg2[%c15, %c0_132, %c0_133] : memref<64x4x8xf32, #tpu.memory_space<vmem>>, vector<1x4x8xf32>
    %117 = vector.shape_cast %116 : vector<1x4x8xf32> to vector<4x8xf32>
    %cst_134 = arith.constant dense<0.000000e+00> : vector<64x8xf32>
    %118 = tpu.matmul %115, %117, %cst_134 {dimension_numbers = #tpu.dot_dimension_numbers<[1], [0], [0], [1], [0, 0, 1, 1], [], []>} : vector<64x4xf32>, vector<4x8xf32>, vector<64x8xf32> -> vector<64x8xf32>
    %119 = arith.addf %112, %118 : vector<64x8xf32>
    %120 = vector.broadcast %0 : vector<1x8xf32> to vector<64x8xf32>
    %121 = arith.addf %119, %120 : vector<64x8xf32>
    %c0_135 = arith.constant 0 : index
    %c1_136 = arith.constant 1 : index
    %c0_137 = arith.constant 0 : index
    %c0_138 = arith.constant 0 : index
    %122 = vector.load %arg4[%c0_135, %c1_136, %c0_137, %c0_138] : memref<1x8x64x8xf32, #tpu.memory_space<vmem>>, vector<1x1x64x8xf32>
    %123 = vector.shape_cast %122 : vector<1x1x64x8xf32> to vector<64x8xf32>
    %124 = vector.shape_cast %121 : vector<64x8xf32> to vector<1x1x64x8xf32>
    tpu.vector_store %arg4[%c0_135, %c1_136, %c0_137, %c0_138], %124 {strides = array<i32>} : memref<1x8x64x8xf32, #tpu.memory_space<vmem>>, vector<1x1x64x8xf32>,
    %cst_139 = arith.constant 0.000000e+00 : f32
    %125 = vector.broadcast %cst_139 : f32 to vector<64x8xf32>
    %c0_140 = arith.constant 0 : index
    %c1_141 = arith.constant 1 : index
    %c2_142 = arith.constant 2 : index
    %c1_143 = arith.constant 1 : index
    %c0_144 = arith.constant 0 : index
    %126 = vector.load %arg1[%c0_140, %c1_141, %c2_142, %c1_143, %c0_144] : memref<1x6x6x6x4xf32, #tpu.memory_space<vmem>>, vector<1x4x4x4x4xf32>
    %127 = vector.shape_cast %126 : vector<1x4x4x4x4xf32> to vector<4x4x4x4xf32>
    %128 = vector.shape_cast %127 : vector<4x4x4x4xf32> to vector<64x4xf32>
    %c16 = arith.constant 16 : index
    %c0_145 = arith.constant 0 : index
    %c0_146 = arith.constant 0 : index
    %129 = vector.load %arg2[%c16, %c0_145, %c0_146] : memref<64x4x8xf32, #tpu.memory_space<vmem>>, vector<1x4x8xf32>
    %130 = vector.shape_cast %129 : vector<1x4x8xf32> to vector<4x8xf32>
    %cst_147 = arith.constant dense<0.000000e+00> : vector<64x8xf32>
    %131 = tpu.matmul %128, %130, %cst_147 {dimension_numbers = #tpu.dot_dimension_numbers<[1], [0], [0], [1], [0, 0, 1, 1], [], []>} : vector<64x4xf32>, vector<4x8xf32>, vector<64x8xf32> -> vector<64x8xf32>
    %132 = arith.addf %125, %131 : vector<64x8xf32>
    %c0_148 = arith.constant 0 : index
    %c1_149 = arith.constant 1 : index
    %c2_150 = arith.constant 2 : index
    %c0_151 = arith.constant 0 : index
    %c0_152 = arith.constant 0 : index
    %133 = vector.load %arg1[%c0_148, %c1_149, %c2_150, %c0_151, %c0_152] : memref<1x6x6x6x4xf32, #tpu.memory_space<vmem>>, vector<1x4x4x4x4xf32>
    %134 = vector.shape_cast %133 : vector<1x4x4x4x4xf32> to vector<4x4x4x4xf32>
    %135 = vector.shape_cast %134 : vector<4x4x4x4xf32> to vector<64x4xf32>
    %c17 = arith.constant 17 : index
    %c0_153 = arith.constant 0 : index
    %c0_154 = arith.constant 0 : index
    %136 = vector.load %arg2[%c17, %c0_153, %c0_154] : memref<64x4x8xf32, #tpu.memory_space<vmem>>, vector<1x4x8xf32>
    %137 = vector.shape_cast %136 : vector<1x4x8xf32> to vector<4x8xf32>
    %cst_155 = arith.constant dense<0.000000e+00> : vector<64x8xf32>
    %138 = tpu.matmul %135, %137, %cst_155 {dimension_numbers = #tpu.dot_dimension_numbers<[1], [0], [0], [1], [0, 0, 1, 1], [], []>} : vector<64x4xf32>, vector<4x8xf32>, vector<64x8xf32> -> vector<64x8xf32>
    %139 = arith.addf %132, %138 : vector<64x8xf32>
    %c0_156 = arith.constant 0 : index
    %c1_157 = arith.constant 1 : index
    %c1_158 = arith.constant 1 : index
    %c1_159 = arith.constant 1 : index
    %c0_160 = arith.constant 0 : index
    %140 = vector.load %arg1[%c0_156, %c1_157, %c1_158, %c1_159, %c0_160] : memref<1x6x6x6x4xf32, #tpu.memory_space<vmem>>, vector<1x4x4x4x4xf32>
    %141 = vector.shape_cast %140 : vector<1x4x4x4x4xf32> to vector<4x4x4x4xf32>
    %142 = vector.shape_cast %141 : vector<4x4x4x4xf32> to vector<64x4xf32>
    %c18 = arith.constant 18 : index
    %c0_161 = arith.constant 0 : index
    %c0_162 = arith.constant 0 : index
    %143 = vector.load %arg2[%c18, %c0_161, %c0_162] : memref<64x4x8xf32, #tpu.memory_space<vmem>>, vector<1x4x8xf32>
    %144 = vector.shape_cast %143 : vector<1x4x8xf32> to vector<4x8xf32>
    %cst_163 = arith.constant dense<0.000000e+00> : vector<64x8xf32>
    %145 = tpu.matmul %142, %144, %cst_163 {dimension_numbers = #tpu.dot_dimension_numbers<[1], [0], [0], [1], [0, 0, 1, 1], [], []>} : vector<64x4xf32>, vector<4x8xf32>, vector<64x8xf32> -> vector<64x8xf32>
    %146 = arith.addf %139, %145 : vector<64x8xf32>
    %c0_164 = arith.constant 0 : index
    %c1_165 = arith.constant 1 : index
    %c1_166 = arith.constant 1 : index
    %c0_167 = arith.constant 0 : index
    %c0_168 = arith.constant 0 : index
    %147 = vector.load %arg1[%c0_164, %c1_165, %c1_166, %c0_167, %c0_168] : memref<1x6x6x6x4xf32, #tpu.memory_space<vmem>>, vector<1x4x4x4x4xf32>
    %148 = vector.shape_cast %147 : vector<1x4x4x4x4xf32> to vector<4x4x4x4xf32>
    %149 = vector.shape_cast %148 : vector<4x4x4x4xf32> to vector<64x4xf32>
    %c19 = arith.constant 19 : index
    %c0_169 = arith.constant 0 : index
    %c0_170 = arith.constant 0 : index
    %150 = vector.load %arg2[%c19, %c0_169, %c0_170] : memref<64x4x8xf32, #tpu.memory_space<vmem>>, vector<1x4x8xf32>
    %151 = vector.shape_cast %150 : vector<1x4x8xf32> to vector<4x8xf32>
    %cst_171 = arith.constant dense<0.000000e+00> : vector<64x8xf32>
    %152 = tpu.matmul %149, %151, %cst_171 {dimension_numbers = #tpu.dot_dimension_numbers<[1], [0], [0], [1], [0, 0, 1, 1], [], []>} : vector<64x4xf32>, vector<4x8xf32>, vector<64x8xf32> -> vector<64x8xf32>
    %153 = arith.addf %146, %152 : vector<64x8xf32>
    %c0_172 = arith.constant 0 : index
    %c0_173 = arith.constant 0 : index
    %c2_174 = arith.constant 2 : index
    %c1_175 = arith.constant 1 : index
    %c0_176 = arith.constant 0 : index
    %154 = vector.load %arg1[%c0_172, %c0_173, %c2_174, %c1_175, %c0_176] : memref<1x6x6x6x4xf32, #tpu.memory_space<vmem>>, vector<1x4x4x4x4xf32>
    %155 = vector.shape_cast %154 : vector<1x4x4x4x4xf32> to vector<4x4x4x4xf32>
    %156 = vector.shape_cast %155 : vector<4x4x4x4xf32> to vector<64x4xf32>
    %c20 = arith.constant 20 : index
    %c0_177 = arith.constant 0 : index
    %c0_178 = arith.constant 0 : index
    %157 = vector.load %arg2[%c20, %c0_177, %c0_178] : memref<64x4x8xf32, #tpu.memory_space<vmem>>, vector<1x4x8xf32>
    %158 = vector.shape_cast %157 : vector<1x4x8xf32> to vector<4x8xf32>
    %cst_179 = arith.constant dense<0.000000e+00> : vector<64x8xf32>
    %159 = tpu.matmul %156, %158, %cst_179 {dimension_numbers = #tpu.dot_dimension_numbers<[1], [0], [0], [1], [0, 0, 1, 1], [], []>} : vector<64x4xf32>, vector<4x8xf32>, vector<64x8xf32> -> vector<64x8xf32>
    %160 = arith.addf %153, %159 : vector<64x8xf32>
    %c0_180 = arith.constant 0 : index
    %c0_181 = arith.constant 0 : index
    %c2_182 = arith.constant 2 : index
    %c0_183 = arith.constant 0 : index
    %c0_184 = arith.constant 0 : index
    %161 = vector.load %arg1[%c0_180, %c0_181, %c2_182, %c0_183, %c0_184] : memref<1x6x6x6x4xf32, #tpu.memory_space<vmem>>, vector<1x4x4x4x4xf32>
    %162 = vector.shape_cast %161 : vector<1x4x4x4x4xf32> to vector<4x4x4x4xf32>
    %163 = vector.shape_cast %162 : vector<4x4x4x4xf32> to vector<64x4xf32>
    %c21 = arith.constant 21 : index
    %c0_185 = arith.constant 0 : index
    %c0_186 = arith.constant 0 : index
    %164 = vector.load %arg2[%c21, %c0_185, %c0_186] : memref<64x4x8xf32, #tpu.memory_space<vmem>>, vector<1x4x8xf32>
    %165 = vector.shape_cast %164 : vector<1x4x8xf32> to vector<4x8xf32>
    %cst_187 = arith.constant dense<0.000000e+00> : vector<64x8xf32>
    %166 = tpu.matmul %163, %165, %cst_187 {dimension_numbers = #tpu.dot_dimension_numbers<[1], [0], [0], [1], [0, 0, 1, 1], [], []>} : vector<64x4xf32>, vector<4x8xf32>, vector<64x8xf32> -> vector<64x8xf32>
    %167 = arith.addf %160, %166 : vector<64x8xf32>
    %c0_188 = arith.constant 0 : index
    %c0_189 = arith.constant 0 : index
    %c1_190 = arith.constant 1 : index
    %c1_191 = arith.constant 1 : index
    %c0_192 = arith.constant 0 : index
    %168 = vector.load %arg1[%c0_188, %c0_189, %c1_190, %c1_191, %c0_192] : memref<1x6x6x6x4xf32, #tpu.memory_space<vmem>>, vector<1x4x4x4x4xf32>
    %169 = vector.shape_cast %168 : vector<1x4x4x4x4xf32> to vector<4x4x4x4xf32>
    %170 = vector.shape_cast %169 : vector<4x4x4x4xf32> to vector<64x4xf32>
    %c22 = arith.constant 22 : index
    %c0_193 = arith.constant 0 : index
    %c0_194 = arith.constant 0 : index
    %171 = vector.load %arg2[%c22, %c0_193, %c0_194] : memref<64x4x8xf32, #tpu.memory_space<vmem>>, vector<1x4x8xf32>
    %172 = vector.shape_cast %171 : vector<1x4x8xf32> to vector<4x8xf32>
    %cst_195 = arith.constant dense<0.000000e+00> : vector<64x8xf32>
    %173 = tpu.matmul %170, %172, %cst_195 {dimension_numbers = #tpu.dot_dimension_numbers<[1], [0], [0], [1], [0, 0, 1, 1], [], []>} : vector<64x4xf32>, vector<4x8xf32>, vector<64x8xf32> -> vector<64x8xf32>
    %174 = arith.addf %167, %173 : vector<64x8xf32>
    %c0_196 = arith.constant 0 : index
    %c0_197 = arith.constant 0 : index
    %c1_198 = arith.constant 1 : index
    %c0_199 = arith.constant 0 : index
    %c0_200 = arith.constant 0 : index
    %175 = vector.load %arg1[%c0_196, %c0_197, %c1_198, %c0_199, %c0_200] : memref<1x6x6x6x4xf32, #tpu.memory_space<vmem>>, vector<1x4x4x4x4xf32>
    %176 = vector.shape_cast %175 : vector<1x4x4x4x4xf32> to vector<4x4x4x4xf32>
    %177 = vector.shape_cast %176 : vector<4x4x4x4xf32> to vector<64x4xf32>
    %c23 = arith.constant 23 : index
    %c0_201 = arith.constant 0 : index
    %c0_202 = arith.constant 0 : index
    %178 = vector.load %arg2[%c23, %c0_201, %c0_202] : memref<64x4x8xf32, #tpu.memory_space<vmem>>, vector<1x4x8xf32>
    %179 = vector.shape_cast %178 : vector<1x4x8xf32> to vector<4x8xf32>
    %cst_203 = arith.constant dense<0.000000e+00> : vector<64x8xf32>
    %180 = tpu.matmul %177, %179, %cst_203 {dimension_numbers = #tpu.dot_dimension_numbers<[1], [0], [0], [1], [0, 0, 1, 1], [], []>} : vector<64x4xf32>, vector<4x8xf32>, vector<64x8xf32> -> vector<64x8xf32>
    %181 = arith.addf %174, %180 : vector<64x8xf32>
    %182 = vector.broadcast %0 : vector<1x8xf32> to vector<64x8xf32>
    %183 = arith.addf %181, %182 : vector<64x8xf32>
    %c0_204 = arith.constant 0 : index
    %c2_205 = arith.constant 2 : index
    %c0_206 = arith.constant 0 : index
    %c0_207 = arith.constant 0 : index
    %184 = vector.load %arg4[%c0_204, %c2_205, %c0_206, %c0_207] : memref<1x8x64x8xf32, #tpu.memory_space<vmem>>, vector<1x1x64x8xf32>
    %185 = vector.shape_cast %184 : vector<1x1x64x8xf32> to vector<64x8xf32>
    %186 = vector.shape_cast %183 : vector<64x8xf32> to vector<1x1x64x8xf32>
    tpu.vector_store %arg4[%c0_204, %c2_205, %c0_206, %c0_207], %186 {strides = array<i32>} : memref<1x8x64x8xf32, #tpu.memory_space<vmem>>, vector<1x1x64x8xf32>,
    %cst_208 = arith.constant 0.000000e+00 : f32
    %187 = vector.broadcast %cst_208 : f32 to vector<64x8xf32>
    %c0_209 = arith.constant 0 : index
    %c1_210 = arith.constant 1 : index
    %c2_211 = arith.constant 2 : index
    %c2_212 = arith.constant 2 : index
    %c0_213 = arith.constant 0 : index
    %188 = vector.load %arg1[%c0_209, %c1_210, %c2_211, %c2_212, %c0_213] : memref<1x6x6x6x4xf32, #tpu.memory_space<vmem>>, vector<1x4x4x4x4xf32>
    %189 = vector.shape_cast %188 : vector<1x4x4x4x4xf32> to vector<4x4x4x4xf32>
    %190 = vector.shape_cast %189 : vector<4x4x4x4xf32> to vector<64x4xf32>
    %c24 = arith.constant 24 : index
    %c0_214 = arith.constant 0 : index
    %c0_215 = arith.constant 0 : index
    %191 = vector.load %arg2[%c24, %c0_214, %c0_215] : memref<64x4x8xf32, #tpu.memory_space<vmem>>, vector<1x4x8xf32>
    %192 = vector.shape_cast %191 : vector<1x4x8xf32> to vector<4x8xf32>
    %cst_216 = arith.constant dense<0.000000e+00> : vector<64x8xf32>
    %193 = tpu.matmul %190, %192, %cst_216 {dimension_numbers = #tpu.dot_dimension_numbers<[1], [0], [0], [1], [0, 0, 1, 1], [], []>} : vector<64x4xf32>, vector<4x8xf32>, vector<64x8xf32> -> vector<64x8xf32>
    %194 = arith.addf %187, %193 : vector<64x8xf32>
    %c0_217 = arith.constant 0 : index
    %c1_218 = arith.constant 1 : index
    %c2_219 = arith.constant 2 : index
    %c1_220 = arith.constant 1 : index
    %c0_221 = arith.constant 0 : index
    %195 = vector.load %arg1[%c0_217, %c1_218, %c2_219, %c1_220, %c0_221] : memref<1x6x6x6x4xf32, #tpu.memory_space<vmem>>, vector<1x4x4x4x4xf32>
    %196 = vector.shape_cast %195 : vector<1x4x4x4x4xf32> to vector<4x4x4x4xf32>
    %197 = vector.shape_cast %196 : vector<4x4x4x4xf32> to vector<64x4xf32>
    %c25 = arith.constant 25 : index
    %c0_222 = arith.constant 0 : index
    %c0_223 = arith.constant 0 : index
    %198 = vector.load %arg2[%c25, %c0_222, %c0_223] : memref<64x4x8xf32, #tpu.memory_space<vmem>>, vector<1x4x8xf32>
    %199 = vector.shape_cast %198 : vector<1x4x8xf32> to vector<4x8xf32>
    %cst_224 = arith.constant dense<0.000000e+00> : vector<64x8xf32>
    %200 = tpu.matmul %197, %199, %cst_224 {dimension_numbers = #tpu.dot_dimension_numbers<[1], [0], [0], [1], [0, 0, 1, 1], [], []>} : vector<64x4xf32>, vector<4x8xf32>, vector<64x8xf32> -> vector<64x8xf32>
    %201 = arith.addf %194, %200 : vector<64x8xf32>
    %c0_225 = arith.constant 0 : index
    %c1_226 = arith.constant 1 : index
    %c1_227 = arith.constant 1 : index
    %c2_228 = arith.constant 2 : index
    %c0_229 = arith.constant 0 : index
    %202 = vector.load %arg1[%c0_225, %c1_226, %c1_227, %c2_228, %c0_229] : memref<1x6x6x6x4xf32, #tpu.memory_space<vmem>>, vector<1x4x4x4x4xf32>
    %203 = vector.shape_cast %202 : vector<1x4x4x4x4xf32> to vector<4x4x4x4xf32>
    %204 = vector.shape_cast %203 : vector<4x4x4x4xf32> to vector<64x4xf32>
    %c26 = arith.constant 26 : index
    %c0_230 = arith.constant 0 : index
    %c0_231 = arith.constant 0 : index
    %205 = vector.load %arg2[%c26, %c0_230, %c0_231] : memref<64x4x8xf32, #tpu.memory_space<vmem>>, vector<1x4x8xf32>
    %206 = vector.shape_cast %205 : vector<1x4x8xf32> to vector<4x8xf32>
    %cst_232 = arith.constant dense<0.000000e+00> : vector<64x8xf32>
    %207 = tpu.matmul %204, %206, %cst_232 {dimension_numbers = #tpu.dot_dimension_numbers<[1], [0], [0], [1], [0, 0, 1, 1], [], []>} : vector<64x4xf32>, vector<4x8xf32>, vector<64x8xf32> -> vector<64x8xf32>
    %208 = arith.addf %201, %207 : vector<64x8xf32>
    %c0_233 = arith.constant 0 : index
    %c1_234 = arith.constant 1 : index
    %c1_235 = arith.constant 1 : index
    %c1_236 = arith.constant 1 : index
    %c0_237 = arith.constant 0 : index
    %209 = vector.load %arg1[%c0_233, %c1_234, %c1_235, %c1_236, %c0_237] : memref<1x6x6x6x4xf32, #tpu.memory_space<vmem>>, vector<1x4x4x4x4xf32>
    %210 = vector.shape_cast %209 : vector<1x4x4x4x4xf32> to vector<4x4x4x4xf32>
    %211 = vector.shape_cast %210 : vector<4x4x4x4xf32> to vector<64x4xf32>
    %c27 = arith.constant 27 : index
    %c0_238 = arith.constant 0 : index
    %c0_239 = arith.constant 0 : index
    %212 = vector.load %arg2[%c27, %c0_238, %c0_239] : memref<64x4x8xf32, #tpu.memory_space<vmem>>, vector<1x4x8xf32>
    %213 = vector.shape_cast %212 : vector<1x4x8xf32> to vector<4x8xf32>
    %cst_240 = arith.constant dense<0.000000e+00> : vector<64x8xf32>
    %214 = tpu.matmul %211, %213, %cst_240 {dimension_numbers = #tpu.dot_dimension_numbers<[1], [0], [0], [1], [0, 0, 1, 1], [], []>} : vector<64x4xf32>, vector<4x8xf32>, vector<64x8xf32> -> vector<64x8xf32>
    %215 = arith.addf %208, %214 : vector<64x8xf32>
    %c0_241 = arith.constant 0 : index
    %c0_242 = arith.constant 0 : index
    %c2_243 = arith.constant 2 : index
    %c2_244 = arith.constant 2 : index
    %c0_245 = arith.constant 0 : index
    %216 = vector.load %arg1[%c0_241, %c0_242, %c2_243, %c2_244, %c0_245] : memref<1x6x6x6x4xf32, #tpu.memory_space<vmem>>, vector<1x4x4x4x4xf32>
    %217 = vector.shape_cast %216 : vector<1x4x4x4x4xf32> to vector<4x4x4x4xf32>
    %218 = vector.shape_cast %217 : vector<4x4x4x4xf32> to vector<64x4xf32>
    %c28 = arith.constant 28 : index
    %c0_246 = arith.constant 0 : index
    %c0_247 = arith.constant 0 : index
    %219 = vector.load %arg2[%c28, %c0_246, %c0_247] : memref<64x4x8xf32, #tpu.memory_space<vmem>>, vector<1x4x8xf32>
    %220 = vector.shape_cast %219 : vector<1x4x8xf32> to vector<4x8xf32>
    %cst_248 = arith.constant dense<0.000000e+00> : vector<64x8xf32>
    %221 = tpu.matmul %218, %220, %cst_248 {dimension_numbers = #tpu.dot_dimension_numbers<[1], [0], [0], [1], [0, 0, 1, 1], [], []>} : vector<64x4xf32>, vector<4x8xf32>, vector<64x8xf32> -> vector<64x8xf32>
    %222 = arith.addf %215, %221 : vector<64x8xf32>
    %c0_249 = arith.constant 0 : index
    %c0_250 = arith.constant 0 : index
    %c2_251 = arith.constant 2 : index
    %c1_252 = arith.constant 1 : index
    %c0_253 = arith.constant 0 : index
    %223 = vector.load %arg1[%c0_249, %c0_250, %c2_251, %c1_252, %c0_253] : memref<1x6x6x6x4xf32, #tpu.memory_space<vmem>>, vector<1x4x4x4x4xf32>
    %224 = vector.shape_cast %223 : vector<1x4x4x4x4xf32> to vector<4x4x4x4xf32>
    %225 = vector.shape_cast %224 : vector<4x4x4x4xf32> to vector<64x4xf32>
    %c29 = arith.constant 29 : index
    %c0_254 = arith.constant 0 : index
    %c0_255 = arith.constant 0 : index
    %226 = vector.load %arg2[%c29, %c0_254, %c0_255] : memref<64x4x8xf32, #tpu.memory_space<vmem>>, vector<1x4x8xf32>
    %227 = vector.shape_cast %226 : vector<1x4x8xf32> to vector<4x8xf32>
    %cst_256 = arith.constant dense<0.000000e+00> : vector<64x8xf32>
    %228 = tpu.matmul %225, %227, %cst_256 {dimension_numbers = #tpu.dot_dimension_numbers<[1], [0], [0], [1], [0, 0, 1, 1], [], []>} : vector<64x4xf32>, vector<4x8xf32>, vector<64x8xf32> -> vector<64x8xf32>
    %229 = arith.addf %222, %228 : vector<64x8xf32>
    %c0_257 = arith.constant 0 : index
    %c0_258 = arith.constant 0 : index
    %c1_259 = arith.constant 1 : index
    %c2_260 = arith.constant 2 : index
    %c0_261 = arith.constant 0 : index
    %230 = vector.load %arg1[%c0_257, %c0_258, %c1_259, %c2_260, %c0_261] : memref<1x6x6x6x4xf32, #tpu.memory_space<vmem>>, vector<1x4x4x4x4xf32>
    %231 = vector.shape_cast %230 : vector<1x4x4x4x4xf32> to vector<4x4x4x4xf32>
    %232 = vector.shape_cast %231 : vector<4x4x4x4xf32> to vector<64x4xf32>
    %c30 = arith.constant 30 : index
    %c0_262 = arith.constant 0 : index
    %c0_263 = arith.constant 0 : index
    %233 = vector.load %arg2[%c30, %c0_262, %c0_263] : memref<64x4x8xf32, #tpu.memory_space<vmem>>, vector<1x4x8xf32>
    %234 = vector.shape_cast %233 : vector<1x4x8xf32> to vector<4x8xf32>
    %cst_264 = arith.constant dense<0.000000e+00> : vector<64x8xf32>
    %235 = tpu.matmul %232, %234, %cst_264 {dimension_numbers = #tpu.dot_dimension_numbers<[1], [0], [0], [1], [0, 0, 1, 1], [], []>} : vector<64x4xf32>, vector<4x8xf32>, vector<64x8xf32> -> vector<64x8xf32>
    %236 = arith.addf %229, %235 : vector<64x8xf32>
    %c0_265 = arith.constant 0 : index
    %c0_266 = arith.constant 0 : index
    %c1_267 = arith.constant 1 : index
    %c1_268 = arith.constant 1 : index
    %c0_269 = arith.constant 0 : index
    %237 = vector.load %arg1[%c0_265, %c0_266, %c1_267, %c1_268, %c0_269] : memref<1x6x6x6x4xf32, #tpu.memory_space<vmem>>, vector<1x4x4x4x4xf32>
    %238 = vector.shape_cast %237 : vector<1x4x4x4x4xf32> to vector<4x4x4x4xf32>
    %239 = vector.shape_cast %238 : vector<4x4x4x4xf32> to vector<64x4xf32>
    %c31 = arith.constant 31 : index
    %c0_270 = arith.constant 0 : index
    %c0_271 = arith.constant 0 : index
    %240 = vector.load %arg2[%c31, %c0_270, %c0_271] : memref<64x4x8xf32, #tpu.memory_space<vmem>>, vector<1x4x8xf32>
    %241 = vector.shape_cast %240 : vector<1x4x8xf32> to vector<4x8xf32>
    %cst_272 = arith.constant dense<0.000000e+00> : vector<64x8xf32>
    %242 = tpu.matmul %239, %241, %cst_272 {dimension_numbers = #tpu.dot_dimension_numbers<[1], [0], [0], [1], [0, 0, 1, 1], [], []>} : vector<64x4xf32>, vector<4x8xf32>, vector<64x8xf32> -> vector<64x8xf32>
    %243 = arith.addf %236, %242 : vector<64x8xf32>
    %244 = vector.broadcast %0 : vector<1x8xf32> to vector<64x8xf32>
    %245 = arith.addf %243, %244 : vector<64x8xf32>
    %c0_273 = arith.constant 0 : index
    %c3_274 = arith.constant 3 : index
    %c0_275 = arith.constant 0 : index
    %c0_276 = arith.constant 0 : index
    %246 = vector.load %arg4[%c0_273, %c3_274, %c0_275, %c0_276] : memref<1x8x64x8xf32, #tpu.memory_space<vmem>>, vector<1x1x64x8xf32>
    %247 = vector.shape_cast %246 : vector<1x1x64x8xf32> to vector<64x8xf32>
    %248 = vector.shape_cast %245 : vector<64x8xf32> to vector<1x1x64x8xf32>
    tpu.vector_store %arg4[%c0_273, %c3_274, %c0_275, %c0_276], %248 {strides = array<i32>} : memref<1x8x64x8xf32, #tpu.memory_space<vmem>>, vector<1x1x64x8xf32>,
    %cst_277 = arith.constant 0.000000e+00 : f32
    %249 = vector.broadcast %cst_277 : f32 to vector<64x8xf32>
    %c0_278 = arith.constant 0 : index
    %c2_279 = arith.constant 2 : index
    %c1_280 = arith.constant 1 : index
    %c1_281 = arith.constant 1 : index
    %c0_282 = arith.constant 0 : index
    %250 = vector.load %arg1[%c0_278, %c2_279, %c1_280, %c1_281, %c0_282] : memref<1x6x6x6x4xf32, #tpu.memory_space<vmem>>, vector<1x4x4x4x4xf32>
    %251 = vector.shape_cast %250 : vector<1x4x4x4x4xf32> to vector<4x4x4x4xf32>
    %252 = vector.shape_cast %251 : vector<4x4x4x4xf32> to vector<64x4xf32>
    %c32 = arith.constant 32 : index
    %c0_283 = arith.constant 0 : index
    %c0_284 = arith.constant 0 : index
    %253 = vector.load %arg2[%c32, %c0_283, %c0_284] : memref<64x4x8xf32, #tpu.memory_space<vmem>>, vector<1x4x8xf32>
    %254 = vector.shape_cast %253 : vector<1x4x8xf32> to vector<4x8xf32>
    %cst_285 = arith.constant dense<0.000000e+00> : vector<64x8xf32>
    %255 = tpu.matmul %252, %254, %cst_285 {dimension_numbers = #tpu.dot_dimension_numbers<[1], [0], [0], [1], [0, 0, 1, 1], [], []>} : vector<64x4xf32>, vector<4x8xf32>, vector<64x8xf32> -> vector<64x8xf32>
    %256 = arith.addf %249, %255 : vector<64x8xf32>
    %c0_286 = arith.constant 0 : index
    %c2_287 = arith.constant 2 : index
    %c1_288 = arith.constant 1 : index
    %c0_289 = arith.constant 0 : index
    %c0_290 = arith.constant 0 : index
    %257 = vector.load %arg1[%c0_286, %c2_287, %c1_288, %c0_289, %c0_290] : memref<1x6x6x6x4xf32, #tpu.memory_space<vmem>>, vector<1x4x4x4x4xf32>
    %258 = vector.shape_cast %257 : vector<1x4x4x4x4xf32> to vector<4x4x4x4xf32>
    %259 = vector.shape_cast %258 : vector<4x4x4x4xf32> to vector<64x4xf32>
    %c33 = arith.constant 33 : index
    %c0_291 = arith.constant 0 : index
    %c0_292 = arith.constant 0 : index
    %260 = vector.load %arg2[%c33, %c0_291, %c0_292] : memref<64x4x8xf32, #tpu.memory_space<vmem>>, vector<1x4x8xf32>
    %261 = vector.shape_cast %260 : vector<1x4x8xf32> to vector<4x8xf32>
    %cst_293 = arith.constant dense<0.000000e+00> : vector<64x8xf32>
    %262 = tpu.matmul %259, %261, %cst_293 {dimension_numbers = #tpu.dot_dimension_numbers<[1], [0], [0], [1], [0, 0, 1, 1], [], []>} : vector<64x4xf32>, vector<4x8xf32>, vector<64x8xf32> -> vector<64x8xf32>
    %263 = arith.addf %256, %262 : vector<64x8xf32>
    %c0_294 = arith.constant 0 : index
    %c2_295 = arith.constant 2 : index
    %c0_296 = arith.constant 0 : index
    %c1_297 = arith.constant 1 : index
    %c0_298 = arith.constant 0 : index
    %264 = vector.load %arg1[%c0_294, %c2_295, %c0_296, %c1_297, %c0_298] : memref<1x6x6x6x4xf32, #tpu.memory_space<vmem>>, vector<1x4x4x4x4xf32>
    %265 = vector.shape_cast %264 : vector<1x4x4x4x4xf32> to vector<4x4x4x4xf32>
    %266 = vector.shape_cast %265 : vector<4x4x4x4xf32> to vector<64x4xf32>
    %c34 = arith.constant 34 : index
    %c0_299 = arith.constant 0 : index
    %c0_300 = arith.constant 0 : index
    %267 = vector.load %arg2[%c34, %c0_299, %c0_300] : memref<64x4x8xf32, #tpu.memory_space<vmem>>, vector<1x4x8xf32>
    %268 = vector.shape_cast %267 : vector<1x4x8xf32> to vector<4x8xf32>
    %cst_301 = arith.constant dense<0.000000e+00> : vector<64x8xf32>
    %269 = tpu.matmul %266, %268, %cst_301 {dimension_numbers = #tpu.dot_dimension_numbers<[1], [0], [0], [1], [0, 0, 1, 1], [], []>} : vector<64x4xf32>, vector<4x8xf32>, vector<64x8xf32> -> vector<64x8xf32>
    %270 = arith.addf %263, %269 : vector<64x8xf32>
    %c0_302 = arith.constant 0 : index
    %c2_303 = arith.constant 2 : index
    %c0_304 = arith.constant 0 : index
    %c0_305 = arith.constant 0 : index
    %c0_306 = arith.constant 0 : index
    %271 = vector.load %arg1[%c0_302, %c2_303, %c0_304, %c0_305, %c0_306] : memref<1x6x6x6x4xf32, #tpu.memory_space<vmem>>, vector<1x4x4x4x4xf32>
    %272 = vector.shape_cast %271 : vector<1x4x4x4x4xf32> to vector<4x4x4x4xf32>
    %273 = vector.shape_cast %272 : vector<4x4x4x4xf32> to vector<64x4xf32>
    %c35 = arith.constant 35 : index
    %c0_307 = arith.constant 0 : index
    %c0_308 = arith.constant 0 : index
    %274 = vector.load %arg2[%c35, %c0_307, %c0_308] : memref<64x4x8xf32, #tpu.memory_space<vmem>>, vector<1x4x8xf32>
    %275 = vector.shape_cast %274 : vector<1x4x8xf32> to vector<4x8xf32>
    %cst_309 = arith.constant dense<0.000000e+00> : vector<64x8xf32>
    %276 = tpu.matmul %273, %275, %cst_309 {dimension_numbers = #tpu.dot_dimension_numbers<[1], [0], [0], [1], [0, 0, 1, 1], [], []>} : vector<64x4xf32>, vector<4x8xf32>, vector<64x8xf32> -> vector<64x8xf32>
    %277 = arith.addf %270, %276 : vector<64x8xf32>
    %c0_310 = arith.constant 0 : index
    %c1_311 = arith.constant 1 : index
    %c1_312 = arith.constant 1 : index
    %c1_313 = arith.constant 1 : index
    %c0_314 = arith.constant 0 : index
    %278 = vector.load %arg1[%c0_310, %c1_311, %c1_312, %c1_313, %c0_314] : memref<1x6x6x6x4xf32, #tpu.memory_space<vmem>>, vector<1x4x4x4x4xf32>
    %279 = vector.shape_cast %278 : vector<1x4x4x4x4xf32> to vector<4x4x4x4xf32>
    %280 = vector.shape_cast %279 : vector<4x4x4x4xf32> to vector<64x4xf32>
    %c36 = arith.constant 36 : index
    %c0_315 = arith.constant 0 : index
    %c0_316 = arith.constant 0 : index
    %281 = vector.load %arg2[%c36, %c0_315, %c0_316] : memref<64x4x8xf32, #tpu.memory_space<vmem>>, vector<1x4x8xf32>
    %282 = vector.shape_cast %281 : vector<1x4x8xf32> to vector<4x8xf32>
    %cst_317 = arith.constant dense<0.000000e+00> : vector<64x8xf32>
    %283 = tpu.matmul %280, %282, %cst_317 {dimension_numbers = #tpu.dot_dimension_numbers<[1], [0], [0], [1], [0, 0, 1, 1], [], []>} : vector<64x4xf32>, vector<4x8xf32>, vector<64x8xf32> -> vector<64x8xf32>
    %284 = arith.addf %277, %283 : vector<64x8xf32>
    %c0_318 = arith.constant 0 : index
    %c1_319 = arith.constant 1 : index
    %c1_320 = arith.constant 1 : index
    %c0_321 = arith.constant 0 : index
    %c0_322 = arith.constant 0 : index
    %285 = vector.load %arg1[%c0_318, %c1_319, %c1_320, %c0_321, %c0_322] : memref<1x6x6x6x4xf32, #tpu.memory_space<vmem>>, vector<1x4x4x4x4xf32>
    %286 = vector.shape_cast %285 : vector<1x4x4x4x4xf32> to vector<4x4x4x4xf32>
    %287 = vector.shape_cast %286 : vector<4x4x4x4xf32> to vector<64x4xf32>
    %c37 = arith.constant 37 : index
    %c0_323 = arith.constant 0 : index
    %c0_324 = arith.constant 0 : index
    %288 = vector.load %arg2[%c37, %c0_323, %c0_324] : memref<64x4x8xf32, #tpu.memory_space<vmem>>, vector<1x4x8xf32>
    %289 = vector.shape_cast %288 : vector<1x4x8xf32> to vector<4x8xf32>
    %cst_325 = arith.constant dense<0.000000e+00> : vector<64x8xf32>
    %290 = tpu.matmul %287, %289, %cst_325 {dimension_numbers = #tpu.dot_dimension_numbers<[1], [0], [0], [1], [0, 0, 1, 1], [], []>} : vector<64x4xf32>, vector<4x8xf32>, vector<64x8xf32> -> vector<64x8xf32>
    %291 = arith.addf %284, %290 : vector<64x8xf32>
    %c0_326 = arith.constant 0 : index
    %c1_327 = arith.constant 1 : index
    %c0_328 = arith.constant 0 : index
    %c1_329 = arith.constant 1 : index
    %c0_330 = arith.constant 0 : index
    %292 = vector.load %arg1[%c0_326, %c1_327, %c0_328, %c1_329, %c0_330] : memref<1x6x6x6x4xf32, #tpu.memory_space<vmem>>, vector<1x4x4x4x4xf32>
    %293 = vector.shape_cast %292 : vector<1x4x4x4x4xf32> to vector<4x4x4x4xf32>
    %294 = vector.shape_cast %293 : vector<4x4x4x4xf32> to vector<64x4xf32>
    %c38 = arith.constant 38 : index
    %c0_331 = arith.constant 0 : index
    %c0_332 = arith.constant 0 : index
    %295 = vector.load %arg2[%c38, %c0_331, %c0_332] : memref<64x4x8xf32, #tpu.memory_space<vmem>>, vector<1x4x8xf32>
    %296 = vector.shape_cast %295 : vector<1x4x8xf32> to vector<4x8xf32>
    %cst_333 = arith.constant dense<0.000000e+00> : vector<64x8xf32>
    %297 = tpu.matmul %294, %296, %cst_333 {dimension_numbers = #tpu.dot_dimension_numbers<[1], [0], [0], [1], [0, 0, 1, 1], [], []>} : vector<64x4xf32>, vector<4x8xf32>, vector<64x8xf32> -> vector<64x8xf32>
    %298 = arith.addf %291, %297 : vector<64x8xf32>
    %c0_334 = arith.constant 0 : index
    %c1_335 = arith.constant 1 : index
    %c0_336 = arith.constant 0 : index
    %c0_337 = arith.constant 0 : index
    %c0_338 = arith.constant 0 : index
    %299 = vector.load %arg1[%c0_334, %c1_335, %c0_336, %c0_337, %c0_338] : memref<1x6x6x6x4xf32, #tpu.memory_space<vmem>>, vector<1x4x4x4x4xf32>
    %300 = vector.shape_cast %299 : vector<1x4x4x4x4xf32> to vector<4x4x4x4xf32>
    %301 = vector.shape_cast %300 : vector<4x4x4x4xf32> to vector<64x4xf32>
    %c39 = arith.constant 39 : index
    %c0_339 = arith.constant 0 : index
    %c0_340 = arith.constant 0 : index
    %302 = vector.load %arg2[%c39, %c0_339, %c0_340] : memref<64x4x8xf32, #tpu.memory_space<vmem>>, vector<1x4x8xf32>
    %303 = vector.shape_cast %302 : vector<1x4x8xf32> to vector<4x8xf32>
    %cst_341 = arith.constant dense<0.000000e+00> : vector<64x8xf32>
    %304 = tpu.matmul %301, %303, %cst_341 {dimension_numbers = #tpu.dot_dimension_numbers<[1], [0], [0], [1], [0, 0, 1, 1], [], []>} : vector<64x4xf32>, vector<4x8xf32>, vector<64x8xf32> -> vector<64x8xf32>
    %305 = arith.addf %298, %304 : vector<64x8xf32>
    %306 = vector.broadcast %0 : vector<1x8xf32> to vector<64x8xf32>
    %307 = arith.addf %305, %306 : vector<64x8xf32>
    %c0_342 = arith.constant 0 : index
    %c4_343 = arith.constant 4 : index
    %c0_344 = arith.constant 0 : index
    %c0_345 = arith.constant 0 : index
    %308 = vector.load %arg4[%c0_342, %c4_343, %c0_344, %c0_345] : memref<1x8x64x8xf32, #tpu.memory_space<vmem>>, vector<1x1x64x8xf32>
    %309 = vector.shape_cast %308 : vector<1x1x64x8xf32> to vector<64x8xf32>
    %310 = vector.shape_cast %307 : vector<64x8xf32> to vector<1x1x64x8xf32>
    tpu.vector_store %arg4[%c0_342, %c4_343, %c0_344, %c0_345], %310 {strides = array<i32>} : memref<1x8x64x8xf32, #tpu.memory_space<vmem>>, vector<1x1x64x8xf32>,
    %cst_346 = arith.constant 0.000000e+00 : f32
    %311 = vector.broadcast %cst_346 : f32 to vector<64x8xf32>
    %c0_347 = arith.constant 0 : index
    %c2_348 = arith.constant 2 : index
    %c1_349 = arith.constant 1 : index
    %c2_350 = arith.constant 2 : index
    %c0_351 = arith.constant 0 : index
    %312 = vector.load %arg1[%c0_347, %c2_348, %c1_349, %c2_350, %c0_351] : memref<1x6x6x6x4xf32, #tpu.memory_space<vmem>>, vector<1x4x4x4x4xf32>
    %313 = vector.shape_cast %312 : vector<1x4x4x4x4xf32> to vector<4x4x4x4xf32>
    %314 = vector.shape_cast %313 : vector<4x4x4x4xf32> to vector<64x4xf32>
    %c40 = arith.constant 40 : index
    %c0_352 = arith.constant 0 : index
    %c0_353 = arith.constant 0 : index
    %315 = vector.load %arg2[%c40, %c0_352, %c0_353] : memref<64x4x8xf32, #tpu.memory_space<vmem>>, vector<1x4x8xf32>
    %316 = vector.shape_cast %315 : vector<1x4x8xf32> to vector<4x8xf32>
    %cst_354 = arith.constant dense<0.000000e+00> : vector<64x8xf32>
    %317 = tpu.matmul %314, %316, %cst_354 {dimension_numbers = #tpu.dot_dimension_numbers<[1], [0], [0], [1], [0, 0, 1, 1], [], []>} : vector<64x4xf32>, vector<4x8xf32>, vector<64x8xf32> -> vector<64x8xf32>
    %318 = arith.addf %311, %317 : vector<64x8xf32>
    %c0_355 = arith.constant 0 : index
    %c2_356 = arith.constant 2 : index
    %c1_357 = arith.constant 1 : index
    %c1_358 = arith.constant 1 : index
    %c0_359 = arith.constant 0 : index
    %319 = vector.load %arg1[%c0_355, %c2_356, %c1_357, %c1_358, %c0_359] : memref<1x6x6x6x4xf32, #tpu.memory_space<vmem>>, vector<1x4x4x4x4xf32>
    %320 = vector.shape_cast %319 : vector<1x4x4x4x4xf32> to vector<4x4x4x4xf32>
    %321 = vector.shape_cast %320 : vector<4x4x4x4xf32> to vector<64x4xf32>
    %c41 = arith.constant 41 : index
    %c0_360 = arith.constant 0 : index
    %c0_361 = arith.constant 0 : index
    %322 = vector.load %arg2[%c41, %c0_360, %c0_361] : memref<64x4x8xf32, #tpu.memory_space<vmem>>, vector<1x4x8xf32>
    %323 = vector.shape_cast %322 : vector<1x4x8xf32> to vector<4x8xf32>
    %cst_362 = arith.constant dense<0.000000e+00> : vector<64x8xf32>
    %324 = tpu.matmul %321, %323, %cst_362 {dimension_numbers = #tpu.dot_dimension_numbers<[1], [0], [0], [1], [0, 0, 1, 1], [], []>} : vector<64x4xf32>, vector<4x8xf32>, vector<64x8xf32> -> vector<64x8xf32>
    %325 = arith.addf %318, %324 : vector<64x8xf32>
    %c0_363 = arith.constant 0 : index
    %c2_364 = arith.constant 2 : index
    %c0_365 = arith.constant 0 : index
    %c2_366 = arith.constant 2 : index
    %c0_367 = arith.constant 0 : index
    %326 = vector.load %arg1[%c0_363, %c2_364, %c0_365, %c2_366, %c0_367] : memref<1x6x6x6x4xf32, #tpu.memory_space<vmem>>, vector<1x4x4x4x4xf32>
    %327 = vector.shape_cast %326 : vector<1x4x4x4x4xf32> to vector<4x4x4x4xf32>
    %328 = vector.shape_cast %327 : vector<4x4x4x4xf32> to vector<64x4xf32>
    %c42 = arith.constant 42 : index
    %c0_368 = arith.constant 0 : index
    %c0_369 = arith.constant 0 : index
    %329 = vector.load %arg2[%c42, %c0_368, %c0_369] : memref<64x4x8xf32, #tpu.memory_space<vmem>>, vector<1x4x8xf32>
    %330 = vector.shape_cast %329 : vector<1x4x8xf32> to vector<4x8xf32>
    %cst_370 = arith.constant dense<0.000000e+00> : vector<64x8xf32>
    %331 = tpu.matmul %328, %330, %cst_370 {dimension_numbers = #tpu.dot_dimension_numbers<[1], [0], [0], [1], [0, 0, 1, 1], [], []>} : vector<64x4xf32>, vector<4x8xf32>, vector<64x8xf32> -> vector<64x8xf32>
    %332 = arith.addf %325, %331 : vector<64x8xf32>
    %c0_371 = arith.constant 0 : index
    %c2_372 = arith.constant 2 : index
    %c0_373 = arith.constant 0 : index
    %c1_374 = arith.constant 1 : index
    %c0_375 = arith.constant 0 : index
    %333 = vector.load %arg1[%c0_371, %c2_372, %c0_373, %c1_374, %c0_375] : memref<1x6x6x6x4xf32, #tpu.memory_space<vmem>>, vector<1x4x4x4x4xf32>
    %334 = vector.shape_cast %333 : vector<1x4x4x4x4xf32> to vector<4x4x4x4xf32>
    %335 = vector.shape_cast %334 : vector<4x4x4x4xf32> to vector<64x4xf32>
    %c43 = arith.constant 43 : index
    %c0_376 = arith.constant 0 : index
    %c0_377 = arith.constant 0 : index
    %336 = vector.load %arg2[%c43, %c0_376, %c0_377] : memref<64x4x8xf32, #tpu.memory_space<vmem>>, vector<1x4x8xf32>
    %337 = vector.shape_cast %336 : vector<1x4x8xf32> to vector<4x8xf32>
    %cst_378 = arith.constant dense<0.000000e+00> : vector<64x8xf32>
    %338 = tpu.matmul %335, %337, %cst_378 {dimension_numbers = #tpu.dot_dimension_numbers<[1], [0], [0], [1], [0, 0, 1, 1], [], []>} : vector<64x4xf32>, vector<4x8xf32>, vector<64x8xf32> -> vector<64x8xf32>
    %339 = arith.addf %332, %338 : vector<64x8xf32>
    %c0_379 = arith.constant 0 : index
    %c1_380 = arith.constant 1 : index
    %c1_381 = arith.constant 1 : index
    %c2_382 = arith.constant 2 : index
    %c0_383 = arith.constant 0 : index
    %340 = vector.load %arg1[%c0_379, %c1_380, %c1_381, %c2_382, %c0_383] : memref<1x6x6x6x4xf32, #tpu.memory_space<vmem>>, vector<1x4x4x4x4xf32>
    %341 = vector.shape_cast %340 : vector<1x4x4x4x4xf32> to vector<4x4x4x4xf32>
    %342 = vector.shape_cast %341 : vector<4x4x4x4xf32> to vector<64x4xf32>
    %c44 = arith.constant 44 : index
    %c0_384 = arith.constant 0 : index
    %c0_385 = arith.constant 0 : index
    %343 = vector.load %arg2[%c44, %c0_384, %c0_385] : memref<64x4x8xf32, #tpu.memory_space<vmem>>, vector<1x4x8xf32>
    %344 = vector.shape_cast %343 : vector<1x4x8xf32> to vector<4x8xf32>
    %cst_386 = arith.constant dense<0.000000e+00> : vector<64x8xf32>
    %345 = tpu.matmul %342, %344, %cst_386 {dimension_numbers = #tpu.dot_dimension_numbers<[1], [0], [0], [1], [0, 0, 1, 1], [], []>} : vector<64x4xf32>, vector<4x8xf32>, vector<64x8xf32> -> vector<64x8xf32>
    %346 = arith.addf %339, %345 : vector<64x8xf32>
    %c0_387 = arith.constant 0 : index
    %c1_388 = arith.constant 1 : index
    %c1_389 = arith.constant 1 : index
    %c1_390 = arith.constant 1 : index
    %c0_391 = arith.constant 0 : index
    %347 = vector.load %arg1[%c0_387, %c1_388, %c1_389, %c1_390, %c0_391] : memref<1x6x6x6x4xf32, #tpu.memory_space<vmem>>, vector<1x4x4x4x4xf32>
    %348 = vector.shape_cast %347 : vector<1x4x4x4x4xf32> to vector<4x4x4x4xf32>
    %349 = vector.shape_cast %348 : vector<4x4x4x4xf32> to vector<64x4xf32>
    %c45 = arith.constant 45 : index
    %c0_392 = arith.constant 0 : index
    %c0_393 = arith.constant 0 : index
    %350 = vector.load %arg2[%c45, %c0_392, %c0_393] : memref<64x4x8xf32, #tpu.memory_space<vmem>>, vector<1x4x8xf32>
    %351 = vector.shape_cast %350 : vector<1x4x8xf32> to vector<4x8xf32>
    %cst_394 = arith.constant dense<0.000000e+00> : vector<64x8xf32>
    %352 = tpu.matmul %349, %351, %cst_394 {dimension_numbers = #tpu.dot_dimension_numbers<[1], [0], [0], [1], [0, 0, 1, 1], [], []>} : vector<64x4xf32>, vector<4x8xf32>, vector<64x8xf32> -> vector<64x8xf32>
    %353 = arith.addf %346, %352 : vector<64x8xf32>
    %c0_395 = arith.constant 0 : index
    %c1_396 = arith.constant 1 : index
    %c0_397 = arith.constant 0 : index
    %c2_398 = arith.constant 2 : index
    %c0_399 = arith.constant 0 : index
    %354 = vector.load %arg1[%c0_395, %c1_396, %c0_397, %c2_398, %c0_399] : memref<1x6x6x6x4xf32, #tpu.memory_space<vmem>>, vector<1x4x4x4x4xf32>
    %355 = vector.shape_cast %354 : vector<1x4x4x4x4xf32> to vector<4x4x4x4xf32>
    %356 = vector.shape_cast %355 : vector<4x4x4x4xf32> to vector<64x4xf32>
    %c46 = arith.constant 46 : index
    %c0_400 = arith.constant 0 : index
    %c0_401 = arith.constant 0 : index
    %357 = vector.load %arg2[%c46, %c0_400, %c0_401] : memref<64x4x8xf32, #tpu.memory_space<vmem>>, vector<1x4x8xf32>
    %358 = vector.shape_cast %357 : vector<1x4x8xf32> to vector<4x8xf32>
    %cst_402 = arith.constant dense<0.000000e+00> : vector<64x8xf32>
    %359 = tpu.matmul %356, %358, %cst_402 {dimension_numbers = #tpu.dot_dimension_numbers<[1], [0], [0], [1], [0, 0, 1, 1], [], []>} : vector<64x4xf32>, vector<4x8xf32>, vector<64x8xf32> -> vector<64x8xf32>
    %360 = arith.addf %353, %359 : vector<64x8xf32>
    %c0_403 = arith.constant 0 : index
    %c1_404 = arith.constant 1 : index
    %c0_405 = arith.constant 0 : index
    %c1_406 = arith.constant 1 : index
    %c0_407 = arith.constant 0 : index
    %361 = vector.load %arg1[%c0_403, %c1_404, %c0_405, %c1_406, %c0_407] : memref<1x6x6x6x4xf32, #tpu.memory_space<vmem>>, vector<1x4x4x4x4xf32>
    %362 = vector.shape_cast %361 : vector<1x4x4x4x4xf32> to vector<4x4x4x4xf32>
    %363 = vector.shape_cast %362 : vector<4x4x4x4xf32> to vector<64x4xf32>
    %c47 = arith.constant 47 : index
    %c0_408 = arith.constant 0 : index
    %c0_409 = arith.constant 0 : index
    %364 = vector.load %arg2[%c47, %c0_408, %c0_409] : memref<64x4x8xf32, #tpu.memory_space<vmem>>, vector<1x4x8xf32>
    %365 = vector.shape_cast %364 : vector<1x4x8xf32> to vector<4x8xf32>
    %cst_410 = arith.constant dense<0.000000e+00> : vector<64x8xf32>
    %366 = tpu.matmul %363, %365, %cst_410 {dimension_numbers = #tpu.dot_dimension_numbers<[1], [0], [0], [1], [0, 0, 1, 1], [], []>} : vector<64x4xf32>, vector<4x8xf32>, vector<64x8xf32> -> vector<64x8xf32>
    %367 = arith.addf %360, %366 : vector<64x8xf32>
    %368 = vector.broadcast %0 : vector<1x8xf32> to vector<64x8xf32>
    %369 = arith.addf %367, %368 : vector<64x8xf32>
    %c0_411 = arith.constant 0 : index
    %c5_412 = arith.constant 5 : index
    %c0_413 = arith.constant 0 : index
    %c0_414 = arith.constant 0 : index
    %370 = vector.load %arg4[%c0_411, %c5_412, %c0_413, %c0_414] : memref<1x8x64x8xf32, #tpu.memory_space<vmem>>, vector<1x1x64x8xf32>
    %371 = vector.shape_cast %370 : vector<1x1x64x8xf32> to vector<64x8xf32>
    %372 = vector.shape_cast %369 : vector<64x8xf32> to vector<1x1x64x8xf32>
    tpu.vector_store %arg4[%c0_411, %c5_412, %c0_413, %c0_414], %372 {strides = array<i32>} : memref<1x8x64x8xf32, #tpu.memory_space<vmem>>, vector<1x1x64x8xf32>,
    %cst_415 = arith.constant 0.000000e+00 : f32
    %373 = vector.broadcast %cst_415 : f32 to vector<64x8xf32>
    %c0_416 = arith.constant 0 : index
    %c2_417 = arith.constant 2 : index
    %c2_418 = arith.constant 2 : index
    %c1_419 = arith.constant 1 : index
    %c0_420 = arith.constant 0 : index
    %374 = vector.load %arg1[%c0_416, %c2_417, %c2_418, %c1_419, %c0_420] : memref<1x6x6x6x4xf32, #tpu.memory_space<vmem>>, vector<1x4x4x4x4xf32>
    %375 = vector.shape_cast %374 : vector<1x4x4x4x4xf32> to vector<4x4x4x4xf32>
    %376 = vector.shape_cast %375 : vector<4x4x4x4xf32> to vector<64x4xf32>
    %c48 = arith.constant 48 : index
    %c0_421 = arith.constant 0 : index
    %c0_422 = arith.constant 0 : index
    %377 = vector.load %arg2[%c48, %c0_421, %c0_422] : memref<64x4x8xf32, #tpu.memory_space<vmem>>, vector<1x4x8xf32>
    %378 = vector.shape_cast %377 : vector<1x4x8xf32> to vector<4x8xf32>
    %cst_423 = arith.constant dense<0.000000e+00> : vector<64x8xf32>
    %379 = tpu.matmul %376, %378, %cst_423 {dimension_numbers = #tpu.dot_dimension_numbers<[1], [0], [0], [1], [0, 0, 1, 1], [], []>} : vector<64x4xf32>, vector<4x8xf32>, vector<64x8xf32> -> vector<64x8xf32>
    %380 = arith.addf %373, %379 : vector<64x8xf32>
    %c0_424 = arith.constant 0 : index
    %c2_425 = arith.constant 2 : index
    %c2_426 = arith.constant 2 : index
    %c0_427 = arith.constant 0 : index
    %c0_428 = arith.constant 0 : index
    %381 = vector.load %arg1[%c0_424, %c2_425, %c2_426, %c0_427, %c0_428] : memref<1x6x6x6x4xf32, #tpu.memory_space<vmem>>, vector<1x4x4x4x4xf32>
    %382 = vector.shape_cast %381 : vector<1x4x4x4x4xf32> to vector<4x4x4x4xf32>
    %383 = vector.shape_cast %382 : vector<4x4x4x4xf32> to vector<64x4xf32>
    %c49 = arith.constant 49 : index
    %c0_429 = arith.constant 0 : index
    %c0_430 = arith.constant 0 : index
    %384 = vector.load %arg2[%c49, %c0_429, %c0_430] : memref<64x4x8xf32, #tpu.memory_space<vmem>>, vector<1x4x8xf32>
    %385 = vector.shape_cast %384 : vector<1x4x8xf32> to vector<4x8xf32>
    %cst_431 = arith.constant dense<0.000000e+00> : vector<64x8xf32>
    %386 = tpu.matmul %383, %385, %cst_431 {dimension_numbers = #tpu.dot_dimension_numbers<[1], [0], [0], [1], [0, 0, 1, 1], [], []>} : vector<64x4xf32>, vector<4x8xf32>, vector<64x8xf32> -> vector<64x8xf32>
    %387 = arith.addf %380, %386 : vector<64x8xf32>
    %c0_432 = arith.constant 0 : index
    %c2_433 = arith.constant 2 : index
    %c1_434 = arith.constant 1 : index
    %c1_435 = arith.constant 1 : index
    %c0_436 = arith.constant 0 : index
    %388 = vector.load %arg1[%c0_432, %c2_433, %c1_434, %c1_435, %c0_436] : memref<1x6x6x6x4xf32, #tpu.memory_space<vmem>>, vector<1x4x4x4x4xf32>
    %389 = vector.shape_cast %388 : vector<1x4x4x4x4xf32> to vector<4x4x4x4xf32>
    %390 = vector.shape_cast %389 : vector<4x4x4x4xf32> to vector<64x4xf32>
    %c50 = arith.constant 50 : index
    %c0_437 = arith.constant 0 : index
    %c0_438 = arith.constant 0 : index
    %391 = vector.load %arg2[%c50, %c0_437, %c0_438] : memref<64x4x8xf32, #tpu.memory_space<vmem>>, vector<1x4x8xf32>
    %392 = vector.shape_cast %391 : vector<1x4x8xf32> to vector<4x8xf32>
    %cst_439 = arith.constant dense<0.000000e+00> : vector<64x8xf32>
    %393 = tpu.matmul %390, %392, %cst_439 {dimension_numbers = #tpu.dot_dimension_numbers<[1], [0], [0], [1], [0, 0, 1, 1], [], []>} : vector<64x4xf32>, vector<4x8xf32>, vector<64x8xf32> -> vector<64x8xf32>
    %394 = arith.addf %387, %393 : vector<64x8xf32>
    %c0_440 = arith.constant 0 : index
    %c2_441 = arith.constant 2 : index
    %c1_442 = arith.constant 1 : index
    %c0_443 = arith.constant 0 : index
    %c0_444 = arith.constant 0 : index
    %395 = vector.load %arg1[%c0_440, %c2_441, %c1_442, %c0_443, %c0_444] : memref<1x6x6x6x4xf32, #tpu.memory_space<vmem>>, vector<1x4x4x4x4xf32>
    %396 = vector.shape_cast %395 : vector<1x4x4x4x4xf32> to vector<4x4x4x4xf32>
    %397 = vector.shape_cast %396 : vector<4x4x4x4xf32> to vector<64x4xf32>
    %c51 = arith.constant 51 : index
    %c0_445 = arith.constant 0 : index
    %c0_446 = arith.constant 0 : index
    %398 = vector.load %arg2[%c51, %c0_445, %c0_446] : memref<64x4x8xf32, #tpu.memory_space<vmem>>, vector<1x4x8xf32>
    %399 = vector.shape_cast %398 : vector<1x4x8xf32> to vector<4x8xf32>
    %cst_447 = arith.constant dense<0.000000e+00> : vector<64x8xf32>
    %400 = tpu.matmul %397, %399, %cst_447 {dimension_numbers = #tpu.dot_dimension_numbers<[1], [0], [0], [1], [0, 0, 1, 1], [], []>} : vector<64x4xf32>, vector<4x8xf32>, vector<64x8xf32> -> vector<64x8xf32>
    %401 = arith.addf %394, %400 : vector<64x8xf32>
    %c0_448 = arith.constant 0 : index
    %c1_449 = arith.constant 1 : index
    %c2_450 = arith.constant 2 : index
    %c1_451 = arith.constant 1 : index
    %c0_452 = arith.constant 0 : index
    %402 = vector.load %arg1[%c0_448, %c1_449, %c2_450, %c1_451, %c0_452] : memref<1x6x6x6x4xf32, #tpu.memory_space<vmem>>, vector<1x4x4x4x4xf32>
    %403 = vector.shape_cast %402 : vector<1x4x4x4x4xf32> to vector<4x4x4x4xf32>
    %404 = vector.shape_cast %403 : vector<4x4x4x4xf32> to vector<64x4xf32>
    %c52 = arith.constant 52 : index
    %c0_453 = arith.constant 0 : index
    %c0_454 = arith.constant 0 : index
    %405 = vector.load %arg2[%c52, %c0_453, %c0_454] : memref<64x4x8xf32, #tpu.memory_space<vmem>>, vector<1x4x8xf32>
    %406 = vector.shape_cast %405 : vector<1x4x8xf32> to vector<4x8xf32>
    %cst_455 = arith.constant dense<0.000000e+00> : vector<64x8xf32>
    %407 = tpu.matmul %404, %406, %cst_455 {dimension_numbers = #tpu.dot_dimension_numbers<[1], [0], [0], [1], [0, 0, 1, 1], [], []>} : vector<64x4xf32>, vector<4x8xf32>, vector<64x8xf32> -> vector<64x8xf32>
    %408 = arith.addf %401, %407 : vector<64x8xf32>
    %c0_456 = arith.constant 0 : index
    %c1_457 = arith.constant 1 : index
    %c2_458 = arith.constant 2 : index
    %c0_459 = arith.constant 0 : index
    %c0_460 = arith.constant 0 : index
    %409 = vector.load %arg1[%c0_456, %c1_457, %c2_458, %c0_459, %c0_460] : memref<1x6x6x6x4xf32, #tpu.memory_space<vmem>>, vector<1x4x4x4x4xf32>
    %410 = vector.shape_cast %409 : vector<1x4x4x4x4xf32> to vector<4x4x4x4xf32>
    %411 = vector.shape_cast %410 : vector<4x4x4x4xf32> to vector<64x4xf32>
    %c53 = arith.constant 53 : index
    %c0_461 = arith.constant 0 : index
    %c0_462 = arith.constant 0 : index
    %412 = vector.load %arg2[%c53, %c0_461, %c0_462] : memref<64x4x8xf32, #tpu.memory_space<vmem>>, vector<1x4x8xf32>
    %413 = vector.shape_cast %412 : vector<1x4x8xf32> to vector<4x8xf32>
    %cst_463 = arith.constant dense<0.000000e+00> : vector<64x8xf32>
    %414 = tpu.matmul %411, %413, %cst_463 {dimension_numbers = #tpu.dot_dimension_numbers<[1], [0], [0], [1], [0, 0, 1, 1], [], []>} : vector<64x4xf32>, vector<4x8xf32>, vector<64x8xf32> -> vector<64x8xf32>
    %415 = arith.addf %408, %414 : vector<64x8xf32>
    %c0_464 = arith.constant 0 : index
    %c1_465 = arith.constant 1 : index
    %c1_466 = arith.constant 1 : index
    %c1_467 = arith.constant 1 : index
    %c0_468 = arith.constant 0 : index
    %416 = vector.load %arg1[%c0_464, %c1_465, %c1_466, %c1_467, %c0_468] : memref<1x6x6x6x4xf32, #tpu.memory_space<vmem>>, vector<1x4x4x4x4xf32>
    %417 = vector.shape_cast %416 : vector<1x4x4x4x4xf32> to vector<4x4x4x4xf32>
    %418 = vector.shape_cast %417 : vector<4x4x4x4xf32> to vector<64x4xf32>
    %c54 = arith.constant 54 : index
    %c0_469 = arith.constant 0 : index
    %c0_470 = arith.constant 0 : index
    %419 = vector.load %arg2[%c54, %c0_469, %c0_470] : memref<64x4x8xf32, #tpu.memory_space<vmem>>, vector<1x4x8xf32>
    %420 = vector.shape_cast %419 : vector<1x4x8xf32> to vector<4x8xf32>
    %cst_471 = arith.constant dense<0.000000e+00> : vector<64x8xf32>
    %421 = tpu.matmul %418, %420, %cst_471 {dimension_numbers = #tpu.dot_dimension_numbers<[1], [0], [0], [1], [0, 0, 1, 1], [], []>} : vector<64x4xf32>, vector<4x8xf32>, vector<64x8xf32> -> vector<64x8xf32>
    %422 = arith.addf %415, %421 : vector<64x8xf32>
    %c0_472 = arith.constant 0 : index
    %c1_473 = arith.constant 1 : index
    %c1_474 = arith.constant 1 : index
    %c0_475 = arith.constant 0 : index
    %c0_476 = arith.constant 0 : index
    %423 = vector.load %arg1[%c0_472, %c1_473, %c1_474, %c0_475, %c0_476] : memref<1x6x6x6x4xf32, #tpu.memory_space<vmem>>, vector<1x4x4x4x4xf32>
    %424 = vector.shape_cast %423 : vector<1x4x4x4x4xf32> to vector<4x4x4x4xf32>
    %425 = vector.shape_cast %424 : vector<4x4x4x4xf32> to vector<64x4xf32>
    %c55 = arith.constant 55 : index
    %c0_477 = arith.constant 0 : index
    %c0_478 = arith.constant 0 : index
    %426 = vector.load %arg2[%c55, %c0_477, %c0_478] : memref<64x4x8xf32, #tpu.memory_space<vmem>>, vector<1x4x8xf32>
    %427 = vector.shape_cast %426 : vector<1x4x8xf32> to vector<4x8xf32>
    %cst_479 = arith.constant dense<0.000000e+00> : vector<64x8xf32>
    %428 = tpu.matmul %425, %427, %cst_479 {dimension_numbers = #tpu.dot_dimension_numbers<[1], [0], [0], [1], [0, 0, 1, 1], [], []>} : vector<64x4xf32>, vector<4x8xf32>, vector<64x8xf32> -> vector<64x8xf32>
    %429 = arith.addf %422, %428 : vector<64x8xf32>
    %430 = vector.broadcast %0 : vector<1x8xf32> to vector<64x8xf32>
    %431 = arith.addf %429, %430 : vector<64x8xf32>
    %c0_480 = arith.constant 0 : index
    %c6_481 = arith.constant 6 : index
    %c0_482 = arith.constant 0 : index
    %c0_483 = arith.constant 0 : index
    %432 = vector.load %arg4[%c0_480, %c6_481, %c0_482, %c0_483] : memref<1x8x64x8xf32, #tpu.memory_space<vmem>>, vector<1x1x64x8xf32>
    %433 = vector.shape_cast %432 : vector<1x1x64x8xf32> to vector<64x8xf32>
    %434 = vector.shape_cast %431 : vector<64x8xf32> to vector<1x1x64x8xf32>
    tpu.vector_store %arg4[%c0_480, %c6_481, %c0_482, %c0_483], %434 {strides = array<i32>} : memref<1x8x64x8xf32, #tpu.memory_space<vmem>>, vector<1x1x64x8xf32>,
    %cst_484 = arith.constant 0.000000e+00 : f32
    %435 = vector.broadcast %cst_484 : f32 to vector<64x8xf32>
    %c0_485 = arith.constant 0 : index
    %c2_486 = arith.constant 2 : index
    %c2_487 = arith.constant 2 : index
    %c2_488 = arith.constant 2 : index
    %c0_489 = arith.constant 0 : index
    %436 = vector.load %arg1[%c0_485, %c2_486, %c2_487, %c2_488, %c0_489] : memref<1x6x6x6x4xf32, #tpu.memory_space<vmem>>, vector<1x4x4x4x4xf32>
    %437 = vector.shape_cast %436 : vector<1x4x4x4x4xf32> to vector<4x4x4x4xf32>
    %438 = vector.shape_cast %437 : vector<4x4x4x4xf32> to vector<64x4xf32>
    %c56 = arith.constant 56 : index
    %c0_490 = arith.constant 0 : index
    %c0_491 = arith.constant 0 : index
    %439 = vector.load %arg2[%c56, %c0_490, %c0_491] : memref<64x4x8xf32, #tpu.memory_space<vmem>>, vector<1x4x8xf32>
    %440 = vector.shape_cast %439 : vector<1x4x8xf32> to vector<4x8xf32>
    %cst_492 = arith.constant dense<0.000000e+00> : vector<64x8xf32>
    %441 = tpu.matmul %438, %440, %cst_492 {dimension_numbers = #tpu.dot_dimension_numbers<[1], [0], [0], [1], [0, 0, 1, 1], [], []>} : vector<64x4xf32>, vector<4x8xf32>, vector<64x8xf32> -> vector<64x8xf32>
    %442 = arith.addf %435, %441 : vector<64x8xf32>
    %c0_493 = arith.constant 0 : index
    %c2_494 = arith.constant 2 : index
    %c2_495 = arith.constant 2 : index
    %c1_496 = arith.constant 1 : index
    %c0_497 = arith.constant 0 : index
    %443 = vector.load %arg1[%c0_493, %c2_494, %c2_495, %c1_496, %c0_497] : memref<1x6x6x6x4xf32, #tpu.memory_space<vmem>>, vector<1x4x4x4x4xf32>
    %444 = vector.shape_cast %443 : vector<1x4x4x4x4xf32> to vector<4x4x4x4xf32>
    %445 = vector.shape_cast %444 : vector<4x4x4x4xf32> to vector<64x4xf32>
    %c57 = arith.constant 57 : index
    %c0_498 = arith.constant 0 : index
    %c0_499 = arith.constant 0 : index
    %446 = vector.load %arg2[%c57, %c0_498, %c0_499] : memref<64x4x8xf32, #tpu.memory_space<vmem>>, vector<1x4x8xf32>
    %447 = vector.shape_cast %446 : vector<1x4x8xf32> to vector<4x8xf32>
    %cst_500 = arith.constant dense<0.000000e+00> : vector<64x8xf32>
    %448 = tpu.matmul %445, %447, %cst_500 {dimension_numbers = #tpu.dot_dimension_numbers<[1], [0], [0], [1], [0, 0, 1, 1], [], []>} : vector<64x4xf32>, vector<4x8xf32>, vector<64x8xf32> -> vector<64x8xf32>
    %449 = arith.addf %442, %448 : vector<64x8xf32>
    %c0_501 = arith.constant 0 : index
    %c2_502 = arith.constant 2 : index
    %c1_503 = arith.constant 1 : index
    %c2_504 = arith.constant 2 : index
    %c0_505 = arith.constant 0 : index
    %450 = vector.load %arg1[%c0_501, %c2_502, %c1_503, %c2_504, %c0_505] : memref<1x6x6x6x4xf32, #tpu.memory_space<vmem>>, vector<1x4x4x4x4xf32>
    %451 = vector.shape_cast %450 : vector<1x4x4x4x4xf32> to vector<4x4x4x4xf32>
    %452 = vector.shape_cast %451 : vector<4x4x4x4xf32> to vector<64x4xf32>
    %c58 = arith.constant 58 : index
    %c0_506 = arith.constant 0 : index
    %c0_507 = arith.constant 0 : index
    %453 = vector.load %arg2[%c58, %c0_506, %c0_507] : memref<64x4x8xf32, #tpu.memory_space<vmem>>, vector<1x4x8xf32>
    %454 = vector.shape_cast %453 : vector<1x4x8xf32> to vector<4x8xf32>
    %cst_508 = arith.constant dense<0.000000e+00> : vector<64x8xf32>
    %455 = tpu.matmul %452, %454, %cst_508 {dimension_numbers = #tpu.dot_dimension_numbers<[1], [0], [0], [1], [0, 0, 1, 1], [], []>} : vector<64x4xf32>, vector<4x8xf32>, vector<64x8xf32> -> vector<64x8xf32>
    %456 = arith.addf %449, %455 : vector<64x8xf32>
    %c0_509 = arith.constant 0 : index
    %c2_510 = arith.constant 2 : index
    %c1_511 = arith.constant 1 : index
    %c1_512 = arith.constant 1 : index
    %c0_513 = arith.constant 0 : index
    %457 = vector.load %arg1[%c0_509, %c2_510, %c1_511, %c1_512, %c0_513] : memref<1x6x6x6x4xf32, #tpu.memory_space<vmem>>, vector<1x4x4x4x4xf32>
    %458 = vector.shape_cast %457 : vector<1x4x4x4x4xf32> to vector<4x4x4x4xf32>
    %459 = vector.shape_cast %458 : vector<4x4x4x4xf32> to vector<64x4xf32>
    %c59 = arith.constant 59 : index
    %c0_514 = arith.constant 0 : index
    %c0_515 = arith.constant 0 : index
    %460 = vector.load %arg2[%c59, %c0_514, %c0_515] : memref<64x4x8xf32, #tpu.memory_space<vmem>>, vector<1x4x8xf32>
    %461 = vector.shape_cast %460 : vector<1x4x8xf32> to vector<4x8xf32>
    %cst_516 = arith.constant dense<0.000000e+00> : vector<64x8xf32>
    %462 = tpu.matmul %459, %461, %cst_516 {dimension_numbers = #tpu.dot_dimension_numbers<[1], [0], [0], [1], [0, 0, 1, 1], [], []>} : vector<64x4xf32>, vector<4x8xf32>, vector<64x8xf32> -> vector<64x8xf32>
    %463 = arith.addf %456, %462 : vector<64x8xf32>
    %c0_517 = arith.constant 0 : index
    %c1_518 = arith.constant 1 : index
    %c2_519 = arith.constant 2 : index
    %c2_520 = arith.constant 2 : index
    %c0_521 = arith.constant 0 : index
    %464 = vector.load %arg1[%c0_517, %c1_518, %c2_519, %c2_520, %c0_521] : memref<1x6x6x6x4xf32, #tpu.memory_space<vmem>>, vector<1x4x4x4x4xf32>
    %465 = vector.shape_cast %464 : vector<1x4x4x4x4xf32> to vector<4x4x4x4xf32>
    %466 = vector.shape_cast %465 : vector<4x4x4x4xf32> to vector<64x4xf32>
    %c60 = arith.constant 60 : index
    %c0_522 = arith.constant 0 : index
    %c0_523 = arith.constant 0 : index
    %467 = vector.load %arg2[%c60, %c0_522, %c0_523] : memref<64x4x8xf32, #tpu.memory_space<vmem>>, vector<1x4x8xf32>
    %468 = vector.shape_cast %467 : vector<1x4x8xf32> to vector<4x8xf32>
    %cst_524 = arith.constant dense<0.000000e+00> : vector<64x8xf32>
    %469 = tpu.matmul %466, %468, %cst_524 {dimension_numbers = #tpu.dot_dimension_numbers<[1], [0], [0], [1], [0, 0, 1, 1], [], []>} : vector<64x4xf32>, vector<4x8xf32>, vector<64x8xf32> -> vector<64x8xf32>
    %470 = arith.addf %463, %469 : vector<64x8xf32>
    %c0_525 = arith.constant 0 : index
    %c1_526 = arith.constant 1 : index
    %c2_527 = arith.constant 2 : index
    %c1_528 = arith.constant 1 : index
    %c0_529 = arith.constant 0 : index
    %471 = vector.load %arg1[%c0_525, %c1_526, %c2_527, %c1_528, %c0_529] : memref<1x6x6x6x4xf32, #tpu.memory_space<vmem>>, vector<1x4x4x4x4xf32>
    %472 = vector.shape_cast %471 : vector<1x4x4x4x4xf32> to vector<4x4x4x4xf32>
    %473 = vector.shape_cast %472 : vector<4x4x4x4xf32> to vector<64x4xf32>
    %c61 = arith.constant 61 : index
    %c0_530 = arith.constant 0 : index
    %c0_531 = arith.constant 0 : index
    %474 = vector.load %arg2[%c61, %c0_530, %c0_531] : memref<64x4x8xf32, #tpu.memory_space<vmem>>, vector<1x4x8xf32>
    %475 = vector.shape_cast %474 : vector<1x4x8xf32> to vector<4x8xf32>
    %cst_532 = arith.constant dense<0.000000e+00> : vector<64x8xf32>
    %476 = tpu.matmul %473, %475, %cst_532 {dimension_numbers = #tpu.dot_dimension_numbers<[1], [0], [0], [1], [0, 0, 1, 1], [], []>} : vector<64x4xf32>, vector<4x8xf32>, vector<64x8xf32> -> vector<64x8xf32>
    %477 = arith.addf %470, %476 : vector<64x8xf32>
    %c0_533 = arith.constant 0 : index
    %c1_534 = arith.constant 1 : index
    %c1_535 = arith.constant 1 : index
    %c2_536 = arith.constant 2 : index
    %c0_537 = arith.constant 0 : index
    %478 = vector.load %arg1[%c0_533, %c1_534, %c1_535, %c2_536, %c0_537] : memref<1x6x6x6x4xf32, #tpu.memory_space<vmem>>, vector<1x4x4x4x4xf32>
    %479 = vector.shape_cast %478 : vector<1x4x4x4x4xf32> to vector<4x4x4x4xf32>
    %480 = vector.shape_cast %479 : vector<4x4x4x4xf32> to vector<64x4xf32>
    %c62 = arith.constant 62 : index
    %c0_538 = arith.constant 0 : index
    %c0_539 = arith.constant 0 : index
    %481 = vector.load %arg2[%c62, %c0_538, %c0_539] : memref<64x4x8xf32, #tpu.memory_space<vmem>>, vector<1x4x8xf32>
    %482 = vector.shape_cast %481 : vector<1x4x8xf32> to vector<4x8xf32>
    %cst_540 = arith.constant dense<0.000000e+00> : vector<64x8xf32>
    %483 = tpu.matmul %480, %482, %cst_540 {dimension_numbers = #tpu.dot_dimension_numbers<[1], [0], [0], [1], [0, 0, 1, 1], [], []>} : vector<64x4xf32>, vector<4x8xf32>, vector<64x8xf32> -> vector<64x8xf32>
    %484 = arith.addf %477, %483 : vector<64x8xf32>
    %c0_541 = arith.constant 0 : index
    %c1_542 = arith.constant 1 : index
    %c1_543 = arith.constant 1 : index
    %c1_544 = arith.constant 1 : index
    %c0_545 = arith.constant 0 : index
    %485 = vector.load %arg1[%c0_541, %c1_542, %c1_543, %c1_544, %c0_545] : memref<1x6x6x6x4xf32, #tpu.memory_space<vmem>>, vector<1x4x4x4x4xf32>
    %486 = vector.shape_cast %485 : vector<1x4x4x4x4xf32> to vector<4x4x4x4xf32>
    %487 = vector.shape_cast %486 : vector<4x4x4x4xf32> to vector<64x4xf32>
    %c63 = arith.constant 63 : index
    %c0_546 = arith.constant 0 : index
    %c0_547 = arith.constant 0 : index
    %488 = vector.load %arg2[%c63, %c0_546, %c0_547] : memref<64x4x8xf32, #tpu.memory_space<vmem>>, vector<1x4x8xf32>
    %489 = vector.shape_cast %488 : vector<1x4x8xf32> to vector<4x8xf32>
    %cst_548 = arith.constant dense<0.000000e+00> : vector<64x8xf32>
    %490 = tpu.matmul %487, %489, %cst_548 {dimension_numbers = #tpu.dot_dimension_numbers<[1], [0], [0], [1], [0, 0, 1, 1], [], []>} : vector<64x4xf32>, vector<4x8xf32>, vector<64x8xf32> -> vector<64x8xf32>
    %491 = arith.addf %484, %490 : vector<64x8xf32>
    %492 = vector.broadcast %0 : vector<1x8xf32> to vector<64x8xf32>
    %493 = arith.addf %491, %492 : vector<64x8xf32>
    %c0_549 = arith.constant 0 : index
    %c7_550 = arith.constant 7 : index
    %c0_551 = arith.constant 0 : index
    %c0_552 = arith.constant 0 : index
    %494 = vector.load %arg4[%c0_549, %c7_550, %c0_551, %c0_552] : memref<1x8x64x8xf32, #tpu.memory_space<vmem>>, vector<1x1x64x8xf32>
    %495 = vector.shape_cast %494 : vector<1x1x64x8xf32> to vector<64x8xf32>
    %496 = vector.shape_cast %493 : vector<64x8xf32> to vector<1x1x64x8xf32>
    tpu.vector_store %arg4[%c0_549, %c7_550, %c0_551, %c0_552], %496 {strides = array<i32>} : memref<1x8x64x8xf32, #tpu.memory_space<vmem>>, vector<1x1x64x8xf32>,
    return
  }
  func.func @transform_0(%arg0: i32) -> (i32, i32, i32, i32, i32) {
    %c0_i32 = arith.constant 0 : i32
    %c0_i32_0 = arith.constant 0 : i32
    %c0_i32_1 = arith.constant 0 : i32
    %c0_i32_2 = arith.constant 0 : i32
    %c0_i32_3 = arith.constant 0 : i32
    return %arg0, %c0_i32, %c0_i32_0, %c0_i32_1, %c0_i32_2 : i32, i32, i32, i32, i32
  }
  func.func @transform_1(%arg0: i32) -> (i32, i32, i32) {
    %c0_i32 = arith.constant 0 : i32
    %c0_i32_0 = arith.constant 0 : i32
    %c0_i32_1 = arith.constant 0 : i32
    %c0_i32_2 = arith.constant 0 : i32
    return %c0_i32, %c0_i32_0, %c0_i32_1 : i32, i32, i32
  }
  func.func @transform_2(%arg0: i32) -> (i32, i32) {
    %c0_i32 = arith.constant 0 : i32
    %c0_i32_0 = arith.constant 0 : i32
    %c0_i32_1 = arith.constant 0 : i32
    return %c0_i32, %c0_i32_0 : i32, i32
  }
  func.func @transform_3(%arg0: i32) -> (i32, i32, i32, i32) {
    %c0_i32 = arith.constant 0 : i32
    %c0_i32_0 = arith.constant 0 : i32
    %c0_i32_1 = arith.constant 0 : i32
    %c0_i32_2 = arith.constant 0 : i32
    return %arg0, %c0_i32, %c0_i32_0, %c0_i32_1 : i32, i32, i32, i32
  }
}

</mosaic_0001>

<bundles_post_ra>
// kernel: tpu_custom_call.1
= control target key start
LH: loop header
LB: loop body
LE: loop exit
PB: predicated region body
PF: predicated region fallthrough
CT: control target
= control target key end

     0   :  { %s15077_s12 = smov 0   ;;  %s17276_s0 = inlined_call_operand.vmem [shape: f32[2,6,6,6,4], index: 0, kind: input, shape index: {}]   ;;  %s17277_s1 = inlined_call_operand.vmem [shape: f32[64,4,8], index: 1, kind: input, shape index: {}]   ;;  %s17278_s2 = inlined_call_operand.vmem [shape: f32[1,8], index: 2, kind: input, shape index: {}]   ;;  %s17279_s3 = inlined_call_operand.vmem [shape: f32[2,8,64,8], index: 3, kind: output, shape index: {}]  }
   0x1 LB: > { %s11386_s13 = sadd.s32 4294967295, %s15055_s12   ;;  %p11390_p0 = scmp.ge.s32.totalorder %s15055_s12, 1  ;;  %s15055_s12 = sphi %s15077_s12, %s13_s12  }
   0x2   : > { %p137_p1 = scmp.lt.s32.totalorder %s15055_s12, 3 }
   0x4   : > { %p138_p2 = pnand %p11390_p0, %p137_p1 }
   0x5   : > { %p161_p3 = scmp.lt.s32.totalorder (!%p138_p2), %s11386_s13, 1 }
   0x6   : > { %141 = sbr.rel (%p138_p2) target bundleno = 727 (0x2d7), region = 32 }
   0xb   : > { %v11426_v0 = vld [vmem:[%s17277_s1 + $0x4] sm:$0xf]  ;;  %vm249_vm0 = vcmask 1043456   ;;  %v189_v1 = vld [vmem:[%s17277_s1] sm:$0xf]  ;;  %s17281_s13 = smov (!%p161_p3, %s11386_s13), 1 }
   0xc   : > { %13629 = vmatprep.subr.msk.mxu0 %vm249_vm0, %v11426_v0  ;;  %13643 = vmatprep.subr.msk.mxu1 %vm249_vm0, %v189_v1  ;;  %v11461_v2 = vld [vmem:[%s17277_s1 + $0x8] sm:$0xf]  ;;  %v11487_v3 = vld [vmem:[%s17277_s1 + $0xc] sm:$0xf]  ;;  %s14525_s22 = smul.u32 288, %s17281_s13  ;;  %vm232_vm1 = vcmask 31744  }
   0xd   : > { %13630 = vmatpush3.msk.msra.mxu0 %vm249_vm0, %v11426_v0  ;;  %13644 = vmatpush3.msk.msra.mxu1 %vm249_vm0, %v189_v1  ;;  %v11513_v7 = vld [vmem:[%s17277_s1 + $0x10] sm:$0xf]  ;;  %v11539_v9 = vld [vmem:[%s17277_s1 + $0x14] sm:$0xf]  ;;  %v11549_v25 = vld [vmem:[%s17277_s1 + $0x18] sm:$0xf] }
   0xe   : > { %13657 = vmatprep.subr.msk.mxu0 %vm249_vm0, %v11461_v2  ;;  %13671 = vmatprep.subr.msk.mxu1 %vm249_vm0, %v11487_v3  ;;  %s15109_s25 = scalar_lea.vmem %s17276_s0, %s14525_s22  ;;  %v11559_v27 = vld [vmem:[%s17277_s1 + $0x1c] sm:$0xf]  ;;  %v11603_v43 = vld [vmem:[%s17277_s1 + $0x24] sm:$0xf]  ;;  %v11586_v45 = vld [vmem:[%s17277_s1 + $0x20] sm:$0xf] }
   0xf   : > { %v14534_v4 = vld [vmem:[%s15109_s25 + $0x38] ss:$8 sps:$4 sm:$0xff]   ;;  %v14536_v6 = vld [vmem:[%s15109_s25 + $0x48] ss:$8 sps:$4 sm:$0xff]   ;;  %v11664_v63 = vld [vmem:[%s17277_s1 + $0x2c] sm:$0xf] }
  0x10   : > { %v14535_v5 = vld [vmem:[%s15109_s25 + $0x39] ss:$8 sps:$4 sm:$0xff]   ;;  %13631 = vmatprep.mubr.msk.f32.mxu0 %vm232_vm1, %v14534_v4  ;;  %v14537_v8 = vld [vmem:[%s15109_s25 + $0x49] ss:$8 sps:$4 sm:$0xff]   ;;  %s13052_s9 = sshll.u32 %s17281_s13, 9  ;;  %vm1566_vm2 = vcmask 64512  }
  0x11   : > { %13645 = vmatprep.mubr.msk.f32.mxu1 %vm232_vm1, %v14535_v5  ;;  %13632 = vmatmul.mubr.msk.f32.vlgmr.msra.gmra.mxu0 %vm232_vm1, %v14536_v6  ;;  %v14538_v10 = vld [vmem:[%s15109_s25 + $0x68] ss:$8 sps:$4 sm:$0xff]   ;;  %v14540_v12 = vld [vmem:[%s15109_s25 + $0x78] ss:$8 sps:$4 sm:$0xff]   ;;  %s15864_s13 = scalar_lea.vmem %s17279_s3, %s13052_s9 }
  0x12   : > { %13646 = vmatmul.mubr.msk.f32.vlgmr.msra.gmra.mxu1 %vm232_vm1, %v14537_v8  ;;  %13658 = vmatpush3.msk.msra.mxu0 %vm249_vm0, %v11461_v2  ;;  %v14539_v11 = vld [vmem:[%s15109_s25 + $0x69] ss:$8 sps:$4 sm:$0xff]   ;;  %v14541_v13 = vld [vmem:[%s15109_s25 + $0x79] ss:$8 sps:$4 sm:$0xff]  }
  0x13   : > { %13672 = vmatpush3.msk.msra.mxu1 %vm249_vm0, %v11487_v3  ;;  %13634 = vmatprep.mubr.msk.f32.mxu0 %vm232_vm1, %v14538_v10  ;;  %v14542_v14 = vld [vmem:[%s15109_s25 + $0x98] ss:$8 sps:$4 sm:$0xff]   ;;  %v14544_v16 = vld [vmem:[%s15109_s25 + $0xa8] ss:$8 sps:$4 sm:$0xff]  }
  0x14   : > { %13648 = vmatprep.mubr.msk.f32.mxu1 %vm232_vm1, %v14539_v11  ;;  %13685 = vmatprep.subr.msk.mxu0 %vm249_vm0, %v11513_v7  ;;  %v14543_v15 = vld [vmem:[%s15109_s25 + $0x99] ss:$8 sps:$4 sm:$0xff]   ;;  %v14545_v17 = vld [vmem:[%s15109_s25 + $0xa9] ss:$8 sps:$4 sm:$0xff]  }
  0x15   : > { %13635 = vmatmul.mubr.msk.f32.gmra.mxu0 %vm232_vm1, %v14540_v12  ;;  %13699 = vmatprep.subr.msk.mxu1 %vm249_vm0, %v11539_v9  ;;  %v14546_v18 = vld [vmem:[%s15109_s25 + $0xc8] ss:$8 sps:$4 sm:$0xff]   ;;  %v14548_v20 = vld [vmem:[%s15109_s25 + $0xd8] ss:$8 sps:$4 sm:$0xff]  }
  0x16   : > { %13649 = vmatmul.mubr.msk.f32.gmra.mxu1 %vm232_vm1, %v14541_v13  ;;  %13637 = vmatprep.mubr.msk.f32.mxu0 %vm232_vm1, %v14542_v14  ;;  %v14547_v19 = vld [vmem:[%s15109_s25 + $0xc9] ss:$8 sps:$4 sm:$0xff]   ;;  %v14549_v21 = vld [vmem:[%s15109_s25 + $0xd9] ss:$8 sps:$4 sm:$0xff]  }
  0x17   : > { %13651 = vmatprep.mubr.msk.f32.mxu1 %vm232_vm1, %v14543_v15  ;;  %v14550_v22 = vld [vmem:[%s15109_s25 + $0x31] ss:$8 sps:$4 sm:$0xff]   ;;  %v14552_v24 = vld [vmem:[%s15109_s25 + $0x41] ss:$8 sps:$4 sm:$0xff]  }
  0x18   : > { %v14551_v23 = vld [vmem:[%s15109_s25 + $0x30] ss:$8 sps:$4 sm:$0xff]   ;;  %v14553_v26 = vld [vmem:[%s15109_s25 + $0x40] ss:$8 sps:$4 sm:$0xff]  }
  0x19   : > { %13638 = vmatmul.mubr.msk.f32.gmra.mxu0 %vm232_vm1, %v14544_v16  ;;  %v14554_v28 = vld [vmem:[%s15109_s25 + $0x61] ss:$8 sps:$4 sm:$0xff]   ;;  %v14556_v30 = vld [vmem:[%s15109_s25 + $0x71] ss:$8 sps:$4 sm:$0xff]  }
  0x1a   : > { %13652 = vmatmul.mubr.msk.f32.gmra.mxu1 %vm232_vm1, %v14545_v17  ;;  %13640 = vmatprep.mubr.msk.f32.mxu0 %vm232_vm1, %v14546_v18  ;;  %v14555_v29 = vld [vmem:[%s15109_s25 + $0x60] ss:$8 sps:$4 sm:$0xff]   ;;  %v14557_v31 = vld [vmem:[%s15109_s25 + $0x70] ss:$8 sps:$4 sm:$0xff]   ;;  %v11716_v17 = vld [vmem:[%s17277_s1 + $0x34] sm:$0xf] }
  0x1b   : > { %13654 = vmatprep.mubr.msk.f32.mxu1 %vm232_vm1, %v14547_v19  ;;  %v14558_v32 = vld [vmem:[%s15109_s25 + $0x91] ss:$8 sps:$4 sm:$0xff]   ;;  %v14560_v34 = vld [vmem:[%s15109_s25 + $0xa1] ss:$8 sps:$4 sm:$0xff]  }
  0x1c   : > { %v14559_v33 = vld [vmem:[%s15109_s25 + $0x90] ss:$8 sps:$4 sm:$0xff]   ;;  %v14561_v35 = vld [vmem:[%s15109_s25 + $0xa0] ss:$8 sps:$4 sm:$0xff]  }
  0x1d   : > { %13641 = vmatmul.mubr.msk.f32.gmra.mxu0 %vm232_vm1, %v14548_v20  ;;  %v14562_v36 = vld [vmem:[%s15109_s25 + $0xc1] ss:$8 sps:$4 sm:$0xff]   ;;  %v14564_v38 = vld [vmem:[%s15109_s25 + $0xd1] ss:$8 sps:$4 sm:$0xff]  }
  0x1e   : > { %13655 = vmatmul.mubr.msk.f32.gmra.mxu1 %vm232_vm1, %v14549_v21  ;;  %13659 = vmatprep.mubr.msk.f32.mxu0 %vm232_vm1, %v14550_v22  ;;  %v14563_v37 = vld [vmem:[%s15109_s25 + $0xc0] ss:$8 sps:$4 sm:$0xff]   ;;  %v14565_v39 = vld [vmem:[%s15109_s25 + $0xd0] ss:$8 sps:$4 sm:$0xff]  }
  0x1f   : > { %13673 = vmatprep.mubr.msk.f32.mxu1 %vm232_vm1, %v14551_v23  ;;  %v14566_v40 = vld [vmem:[%s15109_s25 + $0x9] ss:$8 sps:$4 sm:$0xff]   ;;  %v14568_v42 = vld [vmem:[%s15109_s25 + $0x19] ss:$8 sps:$4 sm:$0xff]  }
  0x20   : > { %v14567_v41 = vld [vmem:[%s15109_s25 + $0x8] ss:$8 sps:$4 sm:$0xff]   ;;  %v14569_v44 = vld [vmem:[%s15109_s25 + $0x18] ss:$8 sps:$4 sm:$0xff]  }
  0x21   : > { %13660 = vmatmul.mubr.msk.f32.vlgmr.msra.gmra.mxu0 %vm232_vm1, %v14552_v24  ;;  %v14570_v46 = vld [vmem:[%s15109_s25 + $0x39] ss:$8 sps:$4 sm:$0xff]   ;;  %v14572_v48 = vld [vmem:[%s15109_s25 + $0x49] ss:$8 sps:$4 sm:$0xff]  }
  0x22   : > { %13674 = vmatmul.mubr.msk.f32.vlgmr.msra.gmra.mxu1 %vm232_vm1, %v14553_v26  ;;  %13686 = vmatpush3.msk.msra.mxu0 %vm249_vm0, %v11513_v7  ;;  %v14571_v47 = vld [vmem:[%s15109_s25 + $0x38] ss:$8 sps:$4 sm:$0xff]   ;;  %v14573_v49 = vld [vmem:[%s15109_s25 + $0x48] ss:$8 sps:$4 sm:$0xff]  }
  0x23   : > { %13700 = vmatpush3.msk.msra.mxu1 %vm249_vm0, %v11539_v9  ;;  %13662 = vmatprep.mubr.msk.f32.mxu0 %vm232_vm1, %v14554_v28  ;;  %v14574_v50 = vld [vmem:[%s15109_s25 + $0x69] ss:$8 sps:$4 sm:$0xff]   ;;  %v14576_v52 = vld [vmem:[%s15109_s25 + $0x79] ss:$8 sps:$4 sm:$0xff]  }
  0x24   : > { %13676 = vmatprep.mubr.msk.f32.mxu1 %vm232_vm1, %v14555_v29  ;;  %13713 = vmatprep.subr.msk.mxu0 %vm249_vm0, %v11549_v25  ;;  %v14575_v51 = vld [vmem:[%s15109_s25 + $0x68] ss:$8 sps:$4 sm:$0xff]   ;;  %v14577_v53 = vld [vmem:[%s15109_s25 + $0x78] ss:$8 sps:$4 sm:$0xff]  }
  0x25   : > { %13663 = vmatmul.mubr.msk.f32.gmra.mxu0 %vm232_vm1, %v14556_v30  ;;  %13727 = vmatprep.subr.msk.mxu1 %vm249_vm0, %v11559_v27  ;;  %v14578_v54 = vld [vmem:[%s15109_s25 + $0x99] ss:$8 sps:$4 sm:$0xff]   ;;  %v14580_v56 = vld [vmem:[%s15109_s25 + $0xa9] ss:$8 sps:$4 sm:$0xff]  }
  0x26   : > { %13677 = vmatmul.mubr.msk.f32.gmra.mxu1 %vm232_vm1, %v14557_v31  ;;  %13665 = vmatprep.mubr.msk.f32.mxu0 %vm232_vm1, %v14558_v32  ;;  %v14579_v55 = vld [vmem:[%s15109_s25 + $0x98] ss:$8 sps:$4 sm:$0xff]   ;;  %v14581_v57 = vld [vmem:[%s15109_s25 + $0xa8] ss:$8 sps:$4 sm:$0xff]  }
  0x27   : > { %13679 = vmatprep.mubr.msk.f32.mxu1 %vm232_vm1, %v14559_v33  ;;  %v14582_v58 = vld [vmem:[%s15109_s25 + $0x1] ss:$8 sps:$4 sm:$0xff]   ;;  %v14584_v60 = vld [vmem:[%s15109_s25 + $0x11] ss:$8 sps:$4 sm:$0xff]  }
  0x28   : > { %v14583_v59 = vld [vmem:[%s15109_s25] ss:$8 sps:$4 sm:$0xff]   ;;  %v14585_v62 = vld [vmem:[%s15109_s25 + $0x10] ss:$8 sps:$4 sm:$0xff]  }
  0x29   : > { %13666 = vmatmul.mubr.msk.f32.gmra.mxu0 %vm232_vm1, %v14560_v34  ;;  %v11638_v61 = vld [vmem:[%s17277_s1 + $0x28] sm:$0xf]  ;;  %v14586_v0 = vld [vmem:[%s15109_s25 + $0x31] ss:$8 sps:$4 sm:$0xff]  }
  0x2a   : > { %13680 = vmatmul.mubr.msk.f32.gmra.mxu1 %vm232_vm1, %v14561_v35  ;;  %13668 = vmatprep.mubr.msk.f32.mxu0 %vm232_vm1, %v14562_v36  ;;  %v14587_v1 = vld [vmem:[%s15109_s25 + $0x30] ss:$8 sps:$4 sm:$0xff]   ;;  %v14588_v2 = vld [vmem:[%s15109_s25 + $0x41] ss:$8 sps:$4 sm:$0xff]   ;;  %v11736_v35 = vld [vmem:[%s17277_s1 + $0x3c] sm:$0xf] }
  0x2b   : > { %13682 = vmatprep.mubr.msk.f32.mxu1 %vm232_vm1, %v14563_v37  ;;  %v14589_v3 = vld [vmem:[%s15109_s25 + $0x40] ss:$8 sps:$4 sm:$0xff]   ;;  %v14592_v6 = vld [vmem:[%s15109_s25 + $0x71] ss:$8 sps:$4 sm:$0xff]  }
  0x2c   : > { %v14590_v4 = vld [vmem:[%s15109_s25 + $0x61] ss:$8 sps:$4 sm:$0xff]   ;;  %v14593_v7 = vld [vmem:[%s15109_s25 + $0x70] ss:$8 sps:$4 sm:$0xff]  }
  0x2d   : > { %13669 = vmatmul.mubr.msk.f32.gmra.mxu0 %vm232_vm1, %v14564_v38  ;;  %v14591_v5 = vld [vmem:[%s15109_s25 + $0x60] ss:$8 sps:$4 sm:$0xff]   ;;  %v14594_v8 = vld [vmem:[%s15109_s25 + $0x91] ss:$8 sps:$4 sm:$0xff]  }
  0x2e   : > { %13683 = vmatmul.mubr.msk.f32.gmra.mxu1 %vm232_vm1, %v14565_v39  ;;  %13687 = vmatprep.mubr.msk.f32.mxu0 %vm232_vm1, %v14566_v40  ;;  %v14595_v9 = vld [vmem:[%s15109_s25 + $0x90] ss:$8 sps:$4 sm:$0xff]   ;;  %v14596_v10 = vld [vmem:[%s15109_s25 + $0xa1] ss:$8 sps:$4 sm:$0xff]  }
  0x2f   : > { %13701 = vmatprep.mubr.msk.f32.mxu1 %vm232_vm1, %v14567_v41  ;;  %v14597_v11 = vld [vmem:[%s15109_s25 + $0xa0] ss:$8 sps:$4 sm:$0xff]   ;;  %v11690_v15 = vld [vmem:[%s17277_s1 + $0x30] sm:$0xf]  ;;  %v11726_v33 = vld [vmem:[%s17277_s1 + $0x38] sm:$0xf] }
  0x30   : > { %v14598_v12 = vld [vmem:[%s15109_s25 + $0x39] ss:$8 sps:$4 sm:$0xff]   ;;  %v14600_v14 = vld [vmem:[%s15109_s25 + $0x49] ss:$8 sps:$4 sm:$0xff]  }
  0x31   : > { %13688 = vmatmul.mubr.msk.f32.vlgmr.msra.gmra.mxu0 %vm232_vm1, %v14568_v42  ;;  %v14599_v13 = vld [vmem:[%s15109_s25 + $0x3a] ss:$8 sps:$4 sm:$0xff]   ;;  %v14601_v16 = vld [vmem:[%s15109_s25 + $0x4a] ss:$8 sps:$4 sm:$0xff]  }
  0x32   : > { %13702 = vmatmul.mubr.msk.f32.vlgmr.msra.gmra.mxu1 %vm232_vm1, %v14569_v44  ;;  %13714 = vmatpush3.msk.msra.mxu0 %vm249_vm0, %v11549_v25  ;;  %v14602_v18 = vld [vmem:[%s15109_s25 + $0x69] ss:$8 sps:$4 sm:$0xff]   ;;  %v14604_v20 = vld [vmem:[%s15109_s25 + $0x79] ss:$8 sps:$4 sm:$0xff]  }
  0x33   : > { %13728 = vmatpush3.msk.msra.mxu1 %vm249_vm0, %v11559_v27  ;;  %13690 = vmatprep.mubr.msk.f32.mxu0 %vm232_vm1, %v14570_v46  ;;  %v14603_v19 = vld [vmem:[%s15109_s25 + $0x6a] ss:$8 sps:$4 sm:$0xff]   ;;  %v14605_v21 = vld [vmem:[%s15109_s25 + $0x7a] ss:$8 sps:$4 sm:$0xff]  }
  0x34   : > { %13704 = vmatprep.mubr.msk.f32.mxu1 %vm232_vm1, %v14571_v47  ;;  %13741 = vmatprep.subr.msk.mxu0 %vm249_vm0, %v11603_v43  ;;  %v14606_v22 = vld [vmem:[%s15109_s25 + $0x99] ss:$8 sps:$4 sm:$0xff]   ;;  %v14608_v24 = vld [vmem:[%s15109_s25 + $0xa9] ss:$8 sps:$4 sm:$0xff]  }
  0x35   : > { %13691 = vmatmul.mubr.msk.f32.gmra.mxu0 %vm232_vm1, %v14572_v48  ;;  %13755 = vmatprep.subr.msk.mxu1 %vm249_vm0, %v11586_v45  ;;  %v14607_v23 = vld [vmem:[%s15109_s25 + $0x9a] ss:$8 sps:$4 sm:$0xff]   ;;  %v14609_v25 = vld [vmem:[%s15109_s25 + $0xaa] ss:$8 sps:$4 sm:$0xff]  }
  0x36   : > { %13705 = vmatmul.mubr.msk.f32.gmra.mxu1 %vm232_vm1, %v14573_v49  ;;  %13693 = vmatprep.mubr.msk.f32.mxu0 %vm232_vm1, %v14574_v50  ;;  %v14610_v26 = vld [vmem:[%s15109_s25 + $0xc9] ss:$8 sps:$4 sm:$0xff]   ;;  %v14612_v28 = vld [vmem:[%s15109_s25 + $0xd9] ss:$8 sps:$4 sm:$0xff]  }
  0x37   : > { %13707 = vmatprep.mubr.msk.f32.mxu1 %vm232_vm1, %v14575_v51  ;;  %v14611_v27 = vld [vmem:[%s15109_s25 + $0xca] ss:$8 sps:$4 sm:$0xff]   ;;  %v14613_v29 = vld [vmem:[%s15109_s25 + $0xda] ss:$8 sps:$4 sm:$0xff]  }
  0x38   : > { %v14614_v30 = vld [vmem:[%s15109_s25 + $0x32] ss:$8 sps:$4 sm:$0xff]   ;;  %v14616_v32 = vld [vmem:[%s15109_s25 + $0x42] ss:$8 sps:$4 sm:$0xff]  }
  0x39   : > { %13694 = vmatmul.mubr.msk.f32.gmra.mxu0 %vm232_vm1, %v14576_v52  ;;  %v14615_v31 = vld [vmem:[%s15109_s25 + $0x31] ss:$8 sps:$4 sm:$0xff]   ;;  %v14617_v34 = vld [vmem:[%s15109_s25 + $0x41] ss:$8 sps:$4 sm:$0xff]  }
  0x3a   : > { %13708 = vmatmul.mubr.msk.f32.gmra.mxu1 %vm232_vm1, %v14577_v53  ;;  %13696 = vmatprep.mubr.msk.f32.mxu0 %vm232_vm1, %v14578_v54  ;;  %v14618_v36 = vld [vmem:[%s15109_s25 + $0x62] ss:$8 sps:$4 sm:$0xff]   ;;  %v14620_v38 = vld [vmem:[%s15109_s25 + $0x72] ss:$8 sps:$4 sm:$0xff]  }
  0x3b   : > { %13710 = vmatprep.mubr.msk.f32.mxu1 %vm232_vm1, %v14579_v55  ;;  %v14619_v37 = vld [vmem:[%s15109_s25 + $0x61] ss:$8 sps:$4 sm:$0xff]   ;;  %v14621_v39 = vld [vmem:[%s15109_s25 + $0x71] ss:$8 sps:$4 sm:$0xff]  }
  0x3c   : > { %v14622_v40 = vld [vmem:[%s15109_s25 + $0x92] ss:$8 sps:$4 sm:$0xff]   ;;  %v14624_v42 = vld [vmem:[%s15109_s25 + $0xa2] ss:$8 sps:$4 sm:$0xff]  }
  0x3d   : > { %13697 = vmatmul.mubr.msk.f32.gmra.mxu0 %vm232_vm1, %v14580_v56  ;;  %v14623_v41 = vld [vmem:[%s15109_s25 + $0x91] ss:$8 sps:$4 sm:$0xff]   ;;  %v14626_v44 = vld [vmem:[%s15109_s25 + $0xc2] ss:$8 sps:$4 sm:$0xff]  }
  0x3e   : > { %13711 = vmatmul.mubr.msk.f32.gmra.mxu1 %vm232_vm1, %v14581_v57  ;;  %13715 = vmatprep.mubr.msk.f32.mxu0 %vm232_vm1, %v14582_v58  ;;  %v14628_v46 = vld [vmem:[%s15109_s25 + $0xd2] ss:$8 sps:$4 sm:$0xff]   ;;  %v11787_v51 = vld [vmem:[%s17277_s1 + $0x44] sm:$0xf] }
  0x3f   : > { %13729 = vmatprep.mubr.msk.f32.mxu1 %vm232_vm1, %v14583_v59  ;;  %v14629_v47 = vld [vmem:[%s15109_s25 + $0xd1] ss:$8 sps:$4 sm:$0xff]  }
  0x40   : > { %v14630_v48 = vld [vmem:[%s15109_s25 + $0xa] ss:$8 sps:$4 sm:$0xff]   ;;  %v14632_v50 = vld [vmem:[%s15109_s25 + $0x1a] ss:$8 sps:$4 sm:$0xff]  }
  0x41   : > { %13716 = vmatmul.mubr.msk.f32.vlgmr.msra.gmra.mxu0 %vm232_vm1, %v14584_v60  ;;  %v14631_v49 = vld [vmem:[%s15109_s25 + $0x9] ss:$8 sps:$4 sm:$0xff]   ;;  %v14633_v52 = vld [vmem:[%s15109_s25 + $0x19] ss:$8 sps:$4 sm:$0xff]  }
  0x42   : > { %13730 = vmatmul.mubr.msk.f32.vlgmr.msra.gmra.mxu1 %vm232_vm1, %v14585_v62  ;;  %13742 = vmatpush3.msk.msra.mxu0 %vm249_vm0, %v11603_v43  ;;  %v14625_v43 = vld [vmem:[%s15109_s25 + $0xa1] ss:$8 sps:$4 sm:$0xff]  }
  0x43   : > { %13756 = vmatpush3.msk.msra.mxu1 %vm249_vm0, %v11586_v45  ;;  %13718 = vmatprep.mubr.msk.f32.mxu0 %vm232_vm1, %v14586_v0  ;;  %v14627_v45 = vld [vmem:[%s15109_s25 + $0xc1] ss:$8 sps:$4 sm:$0xff]  }
  0x44   : > { %13732 = vmatprep.mubr.msk.f32.mxu1 %vm232_vm1, %v14587_v1  ;;  %13769 = vmatprep.subr.msk.mxu0 %vm249_vm0, %v11638_v61  ;;  %v14634_v53 = vld [vmem:[%s15109_s25 + $0x3a] ss:$8 sps:$4 sm:$0xff]   ;;  %v14636_v55 = vld [vmem:[%s15109_s25 + $0x4a] ss:$8 sps:$4 sm:$0xff]  }
  0x45   : > { %13719 = vmatmul.mubr.msk.f32.gmra.mxu0 %vm232_vm1, %v14588_v2  ;;  %13783 = vmatprep.subr.msk.mxu1 %vm249_vm0, %v11664_v63  ;;  %v14635_v54 = vld [vmem:[%s15109_s25 + $0x39] ss:$8 sps:$4 sm:$0xff]   ;;  %v14637_v56 = vld [vmem:[%s15109_s25 + $0x49] ss:$8 sps:$4 sm:$0xff]  }
  0x46   : > { %13733 = vmatmul.mubr.msk.f32.gmra.mxu1 %vm232_vm1, %v14589_v3  ;;  %13721 = vmatprep.mubr.msk.f32.mxu0 %vm232_vm1, %v14590_v4  ;;  %v14638_v57 = vld [vmem:[%s15109_s25 + $0x6a] ss:$8 sps:$4 sm:$0xff]   ;;  %v14640_v59 = vld [vmem:[%s15109_s25 + $0x7a] ss:$8 sps:$4 sm:$0xff]  }
  0x47   : > { %13735 = vmatprep.mubr.msk.f32.mxu1 %vm232_vm1, %v14591_v5  ;;  %v14639_v58 = vld [vmem:[%s15109_s25 + $0x69] ss:$8 sps:$4 sm:$0xff]   ;;  %v14641_v60 = vld [vmem:[%s15109_s25 + $0x79] ss:$8 sps:$4 sm:$0xff]  }
  0x48   : > { %v14643_v62 = vld [vmem:[%s15109_s25 + $0x99] ss:$8 sps:$4 sm:$0xff]   ;;  %v14645_v0 = vld [vmem:[%s15109_s25 + $0xa9] ss:$8 sps:$4 sm:$0xff]  }
  0x49   : > { %13722 = vmatmul.mubr.msk.f32.gmra.mxu0 %vm232_vm1, %v14592_v6  ;;  %v14646_v1 = vld [vmem:[%s15109_s25 + $0x2] ss:$8 sps:$4 sm:$0xff]   ;;  %v14648_v3 = vld [vmem:[%s15109_s25 + $0x12] ss:$8 sps:$4 sm:$0xff]  }
  0x4a   : > { %13736 = vmatmul.mubr.msk.f32.gmra.mxu1 %vm232_vm1, %v14593_v7  ;;  %13724 = vmatprep.mubr.msk.f32.mxu0 %vm232_vm1, %v14594_v8  ;;  %v14647_v2 = vld [vmem:[%s15109_s25 + $0x1] ss:$8 sps:$4 sm:$0xff]   ;;  %v14649_v4 = vld [vmem:[%s15109_s25 + $0x11] ss:$8 sps:$4 sm:$0xff]  }
  0x4b   : > { %13738 = vmatprep.mubr.msk.f32.mxu1 %vm232_vm1, %v14595_v9  ;;  %v11770_v5 = vld [vmem:[%s17277_s1 + $0x40] sm:$0xf]  ;;  %v14650_v6 = vld [vmem:[%s15109_s25 + $0x32] ss:$8 sps:$4 sm:$0xff]  }
  0x4c   : > { %v14651_v7 = vld [vmem:[%s15109_s25 + $0x31] ss:$8 sps:$4 sm:$0xff]   ;;  %v14652_v8 = vld [vmem:[%s15109_s25 + $0x42] ss:$8 sps:$4 sm:$0xff]  }
  0x4d   : > { %13725 = vmatmul.mubr.msk.f32.gmra.mxu0 %vm232_vm1, %v14596_v10  ;;  %v14653_v9 = vld [vmem:[%s15109_s25 + $0x41] ss:$8 sps:$4 sm:$0xff]  }
  0x4e   : > { %13739 = vmatmul.mubr.msk.f32.gmra.mxu1 %vm232_vm1, %v14597_v11  ;;  %13743 = vmatprep.mubr.msk.f32.mxu0 %vm232_vm1, %v14598_v12  ;;  %v14654_v10 = vld [vmem:[%s15109_s25 + $0x62] ss:$8 sps:$4 sm:$0xff]   ;;  %v14656_v12 = vld [vmem:[%s15109_s25 + $0x72] ss:$8 sps:$4 sm:$0xff]  }
  0x4f   : > { %13757 = vmatprep.mubr.msk.f32.mxu1 %vm232_vm1, %v14599_v13  ;;  %v14655_v11 = vld [vmem:[%s15109_s25 + $0x61] ss:$8 sps:$4 sm:$0xff]   ;;  %v14657_v13 = vld [vmem:[%s15109_s25 + $0x71] ss:$8 sps:$4 sm:$0xff]  }
  0x51   : > { %13744 = vmatmul.mubr.msk.f32.vlgmr.msra.gmra.mxu0 %vm232_vm1, %v14600_v14  ;;  %v14658_v14 = vld [vmem:[%s15109_s25 + $0x92] ss:$8 sps:$4 sm:$0xff]  }
  0x52   : > { %13758 = vmatmul.mubr.msk.f32.vlgmr.msra.gmra.mxu1 %vm232_vm1, %v14601_v16  ;;  %13770 = vmatpush3.msk.msra.mxu0 %vm249_vm0, %v11638_v61  ;;  %v14642_v61 = vld [vmem:[%s15109_s25 + $0x9a] ss:$8 sps:$4 sm:$0xff]  }
  0x53   : > { %13784 = vmatpush3.msk.msra.mxu1 %vm249_vm0, %v11664_v63  ;;  %13746 = vmatprep.mubr.msk.f32.mxu0 %vm232_vm1, %v14602_v18  ;;  %v14644_v63 = vld [vmem:[%s15109_s25 + $0xaa] ss:$8 sps:$4 sm:$0xff]  }
  0x54   : > { %13760 = vmatprep.mubr.msk.f32.mxu1 %vm232_vm1, %v14603_v19  ;;  %13797 = vmatprep.subr.msk.mxu0 %vm249_vm0, %v11690_v15  ;;  %v14660_v16 = vld [vmem:[%s15109_s25 + $0xa2] ss:$8 sps:$4 sm:$0xff]  }
  0x55   : > { %13747 = vmatmul.mubr.msk.f32.gmra.mxu0 %vm232_vm1, %v14604_v20  ;;  %13811 = vmatprep.subr.msk.mxu1 %vm249_vm0, %v11716_v17  ;;  %v14662_v18 = vld [vmem:[%s15109_s25 + $0x40] ss:$8 sps:$4 sm:$0xff]  }
  0x56   : > { %13761 = vmatmul.mubr.msk.f32.gmra.mxu1 %vm232_vm1, %v14605_v21  ;;  %13749 = vmatprep.mubr.msk.f32.mxu0 %vm232_vm1, %v14606_v22  ;;  %v14663_v19 = vld [vmem:[%s15109_s25 + $0x41] ss:$8 sps:$4 sm:$0xff]   ;;  %v14664_v21 = vld [vmem:[%s15109_s25 + $0x50] ss:$8 sps:$4 sm:$0xff]  }
  0x57   : > { %13763 = vmatprep.mubr.msk.f32.mxu1 %vm232_vm1, %v14607_v23  ;;  %v11822_v20 = vld [vmem:[%s17277_s1 + $0x48] sm:$0xf]  ;;  %v14665_v22 = vld [vmem:[%s15109_s25 + $0x51] ss:$8 sps:$4 sm:$0xff]   ;;  %v11848_v23 = vld [vmem:[%s17277_s1 + $0x4c] sm:$0xf] }
  0x59   : > { %13750 = vmatmul.mubr.msk.f32.gmra.mxu0 %vm232_vm1, %v14608_v24  ;;  %v14666_v24 = vld [vmem:[%s15109_s25 + $0x70] ss:$8 sps:$4 sm:$0xff]  }
  0x5a   : > { %13764 = vmatmul.mubr.msk.f32.gmra.mxu1 %vm232_vm1, %v14609_v25  ;;  %13752 = vmatprep.mubr.msk.f32.mxu0 %vm232_vm1, %v14610_v26  ;;  %v14667_v25 = vld [vmem:[%s15109_s25 + $0x71] ss:$8 sps:$4 sm:$0xff]   ;;  %v14668_v26 = vld [vmem:[%s15109_s25 + $0x80] ss:$8 sps:$4 sm:$0xff]  }
  0x5b   : > { %13766 = vmatprep.mubr.msk.f32.mxu1 %vm232_vm1, %v14611_v27  ;;  %v14669_v27 = vld [vmem:[%s15109_s25 + $0x81] ss:$8 sps:$4 sm:$0xff]  }
  0x5d   : > { %13753 = vmatmul.mubr.msk.f32.gmra.mxu0 %vm232_vm1, %v14612_v28  ;;  %v14670_v28 = vld [vmem:[%s15109_s25 + $0xa0] ss:$8 sps:$4 sm:$0xff]  }
  0x5e   : > { %13767 = vmatmul.mubr.msk.f32.gmra.mxu1 %vm232_vm1, %v14613_v29  ;;  %13771 = vmatprep.mubr.msk.f32.mxu0 %vm232_vm1, %v14614_v30  ;;  %v14671_v29 = vld [vmem:[%s15109_s25 + $0xa1] ss:$8 sps:$4 sm:$0xff]   ;;  %v14672_v30 = vld [vmem:[%s15109_s25 + $0xb0] ss:$8 sps:$4 sm:$0xff]  }
  0x5f   : > { %13785 = vmatprep.mubr.msk.f32.mxu1 %vm232_vm1, %v14615_v31  ;;  %v14673_v31 = vld [vmem:[%s15109_s25 + $0xb1] ss:$8 sps:$4 sm:$0xff]  }
  0x61   : > { %13772 = vmatmul.mubr.msk.f32.vlgmr.msra.gmra.mxu0 %vm232_vm1, %v14616_v32  ;;  %v14674_v32 = vld [vmem:[%s15109_s25 + $0xd0] ss:$8 sps:$4 sm:$0xff]  }
  0x62   : > { %13786 = vmatmul.mubr.msk.f32.vlgmr.msra.gmra.mxu1 %vm232_vm1, %v14617_v34  ;;  %13798 = vmatpush3.msk.msra.mxu0 %vm249_vm0, %v11690_v15  ;;  %v14659_v15 = vld [vmem:[%s15109_s25 + $0x91] ss:$8 sps:$4 sm:$0xff]   ;;  %v14676_v34 = vld [vmem:[%s15109_s25 + $0xe0] ss:$8 sps:$4 sm:$0xff]  }
  0x63   : > { %13812 = vmatpush3.msk.msra.mxu1 %vm249_vm0, %v11716_v17  ;;  %13774 = vmatprep.mubr.msk.f32.mxu0 %vm232_vm1, %v14618_v36  ;;  %v14661_v17 = vld [vmem:[%s15109_s25 + $0xa1] ss:$8 sps:$4 sm:$0xff]  }
  0x64   : > { %13788 = vmatprep.mubr.msk.f32.mxu1 %vm232_vm1, %v14619_v37  ;;  %13825 = vmatprep.subr.msk.mxu0 %vm249_vm0, %v11726_v33  ;;  %v14678_v36 = vld [vmem:[%s15109_s25 + $0x39] ss:$8 sps:$4 sm:$0xff]  }
  0x65   : > { %13775 = vmatmul.mubr.msk.f32.gmra.mxu0 %vm232_vm1, %v14620_v38  ;;  %13839 = vmatprep.subr.msk.mxu1 %vm249_vm0, %v11736_v35  ;;  %v14679_v37 = vld [vmem:[%s15109_s25 + $0x38] ss:$8 sps:$4 sm:$0xff]   ;;  %v11874_v38 = vld [vmem:[%s17277_s1 + $0x50] sm:$0xf] }
  0x66   : > { %13789 = vmatmul.mubr.msk.f32.gmra.mxu1 %vm232_vm1, %v14621_v39  ;;  %13777 = vmatprep.mubr.msk.f32.mxu0 %vm232_vm1, %v14622_v40  ;;  %v14680_v39 = vld [vmem:[%s15109_s25 + $0x49] ss:$8 sps:$4 sm:$0xff]  }
  0x67   : > { %13791 = vmatprep.mubr.msk.f32.mxu1 %vm232_vm1, %v14623_v41  ;;  %v14681_v40 = vld [vmem:[%s15109_s25 + $0x48] ss:$8 sps:$4 sm:$0xff]   ;;  %v11900_v41 = vld [vmem:[%s17277_s1 + $0x54] sm:$0xf] }
  0x69   : > { %13778 = vmatmul.mubr.msk.f32.gmra.mxu0 %vm232_vm1, %v14624_v42  ;;  %v14682_v42 = vld [vmem:[%s15109_s25 + $0x69] ss:$8 sps:$4 sm:$0xff]  }
  0x6a   : > { %13792 = vmatmul.mubr.msk.f32.gmra.mxu1 %vm232_vm1, %v14625_v43  ;;  %13780 = vmatprep.mubr.msk.f32.mxu0 %vm232_vm1, %v14626_v44  ;;  %v14683_v43 = vld [vmem:[%s15109_s25 + $0x68] ss:$8 sps:$4 sm:$0xff]   ;;  %v14684_v44 = vld [vmem:[%s15109_s25 + $0x79] ss:$8 sps:$4 sm:$0xff]  }
  0x6b   : > { %13794 = vmatprep.mubr.msk.f32.mxu1 %vm232_vm1, %v14627_v45  ;;  %v14685_v45 = vld [vmem:[%s15109_s25 + $0x78] ss:$8 sps:$4 sm:$0xff]  }
  0x6d   : > { %13781 = vmatmul.mubr.msk.f32.gmra.mxu0 %vm232_vm1, %v14628_v46  ;;  %v14686_v46 = vld [vmem:[%s15109_s25 + $0x99] ss:$8 sps:$4 sm:$0xff]  }
  0x6e   : > { %13795 = vmatmul.mubr.msk.f32.gmra.mxu1 %vm232_vm1, %v14629_v47  ;;  %13799 = vmatprep.mubr.msk.f32.mxu0 %vm232_vm1, %v14630_v48  ;;  %v14687_v47 = vld [vmem:[%s15109_s25 + $0x98] ss:$8 sps:$4 sm:$0xff]   ;;  %v14688_v48 = vld [vmem:[%s15109_s25 + $0xa9] ss:$8 sps:$4 sm:$0xff]  }
  0x6f   : > { %13813 = vmatprep.mubr.msk.f32.mxu1 %vm232_vm1, %v14631_v49  ;;  %v14689_v49 = vld [vmem:[%s15109_s25 + $0xa8] ss:$8 sps:$4 sm:$0xff]  }
  0x71   : > { %13800 = vmatmul.mubr.msk.f32.vlgmr.msra.gmra.mxu0 %vm232_vm1, %v14632_v50  ;;  %v14690_v50 = vld [vmem:[%s15109_s25 + $0xc9] ss:$8 sps:$4 sm:$0xff]  }
  0x72   : > { %13814 = vmatmul.mubr.msk.f32.vlgmr.msra.gmra.mxu1 %vm232_vm1, %v14633_v52  ;;  %13826 = vmatpush3.msk.msra.mxu0 %vm249_vm0, %v11726_v33  ;;  %v14675_v33 = vld [vmem:[%s15109_s25 + $0xd1] ss:$8 sps:$4 sm:$0xff]  }
  0x73   : > { %13840 = vmatpush3.msk.msra.mxu1 %vm249_vm0, %v11736_v35  ;;  %13802 = vmatprep.mubr.msk.f32.mxu0 %vm232_vm1, %v14634_v53  ;;  %v14677_v35 = vld [vmem:[%s15109_s25 + $0xe1] ss:$8 sps:$4 sm:$0xff]  }
  0x74   : > { %13816 = vmatprep.mubr.msk.f32.mxu1 %vm232_vm1, %v14635_v54  ;;  %13853 = vmatprep.subr.msk.mxu0 %vm249_vm0, %v11787_v51  ;;  %v14692_v52 = vld [vmem:[%s15109_s25 + $0xd9] ss:$8 sps:$4 sm:$0xff]  }
  0x75   : > { %13803 = vmatmul.mubr.msk.f32.gmra.mxu0 %vm232_vm1, %v14636_v55  ;;  %13867 = vmatprep.subr.msk.mxu1 %vm249_vm0, %v11770_v5  ;;  %v14693_v53 = vld [vmem:[%s15109_s25 + $0xd8] ss:$8 sps:$4 sm:$0xff]  }
  0x76   : > { %13817 = vmatmul.mubr.msk.f32.gmra.mxu1 %vm232_vm1, %v14637_v56  ;;  %13805 = vmatprep.mubr.msk.f32.mxu0 %vm232_vm1, %v14638_v57  ;;  %v14694_v54 = vld [vmem:[%s15109_s25 + $0x11] ss:$8 sps:$4 sm:$0xff]   ;;  %v14696_v57 = vld [vmem:[%s15109_s25 + $0x21] ss:$8 sps:$4 sm:$0xff]  }
  0x77   : > { %13819 = vmatprep.mubr.msk.f32.mxu1 %vm232_vm1, %v14639_v58  ;;  %v14695_v55 = vld [vmem:[%s15109_s25 + $0x10] ss:$8 sps:$4 sm:$0xff]   ;;  %v14697_v58 = vld [vmem:[%s15109_s25 + $0x20] ss:$8 sps:$4 sm:$0xff]  }
  0x78   : > { %v11926_v56 = vld [vmem:[%s17277_s1 + $0x58] sm:$0xf] }
  0x79   : > { %13806 = vmatmul.mubr.msk.f32.gmra.mxu0 %vm232_vm1, %v14640_v59  ;;  %v11952_v59 = vld [vmem:[%s17277_s1 + $0x5c] sm:$0xf] }
  0x7a   : > { %13820 = vmatmul.mubr.msk.f32.gmra.mxu1 %vm232_vm1, %v14641_v60  ;;  %13808 = vmatprep.mubr.msk.f32.mxu0 %vm232_vm1, %v14642_v61  ;;  %v14698_v60 = vld [vmem:[%s15109_s25 + $0x41] ss:$8 sps:$4 sm:$0xff]  }
  0x7b   : > { %13822 = vmatprep.mubr.msk.f32.mxu1 %vm232_vm1, %v14643_v62  ;;  %v14699_v61 = vld [vmem:[%s15109_s25 + $0x40] ss:$8 sps:$4 sm:$0xff]   ;;  %v14700_v62 = vld [vmem:[%s15109_s25 + $0x51] ss:$8 sps:$4 sm:$0xff]  }
  0x7d   : > { %13809 = vmatmul.mubr.msk.f32.gmra.mxu0 %vm232_vm1, %v14644_v63  ;;  %v14701_v63 = vld [vmem:[%s15109_s25 + $0x50] ss:$8 sps:$4 sm:$0xff]  }
  0x7e   : > { %13823 = vmatmul.mubr.msk.f32.gmra.mxu1 %vm232_vm1, %v14645_v0  ;;  %13827 = vmatprep.mubr.msk.f32.mxu0 %vm232_vm1, %v14646_v1  ;;  %v14702_v0 = vld [vmem:[%s15109_s25 + $0x71] ss:$8 sps:$4 sm:$0xff]  }
  0x7f   : > { %13841 = vmatprep.mubr.msk.f32.mxu1 %vm232_vm1, %v14647_v2  ;;  %v14703_v1 = vld [vmem:[%s15109_s25 + $0x70] ss:$8 sps:$4 sm:$0xff]   ;;  %v14704_v2 = vld [vmem:[%s15109_s25 + $0x81] ss:$8 sps:$4 sm:$0xff]  }
  0x81   : > { %13828 = vmatmul.mubr.msk.f32.vlgmr.msra.gmra.mxu0 %vm232_vm1, %v14648_v3  ;;  %v14705_v3 = vld [vmem:[%s15109_s25 + $0x80] ss:$8 sps:$4 sm:$0xff]  }
  0x82   : > { %13842 = vmatmul.mubr.msk.f32.vlgmr.msra.gmra.mxu1 %vm232_vm1, %v14649_v4  ;;  %13854 = vmatpush3.msk.msra.mxu0 %vm249_vm0, %v11787_v51  ;;  %v14691_v51 = vld [vmem:[%s15109_s25 + $0xc8] ss:$8 sps:$4 sm:$0xff]  }
  0x83   : > { %13868 = vmatpush3.msk.msra.mxu1 %vm249_vm0, %v11770_v5  ;;  %13830 = vmatprep.mubr.msk.f32.mxu0 %vm232_vm1, %v14650_v6  ;;  %v14706_v4 = vld [vmem:[%s15109_s25 + $0xa1] ss:$8 sps:$4 sm:$0xff]   ;;  %v14708_v6 = vld [vmem:[%s15109_s25 + $0xb1] ss:$8 sps:$4 sm:$0xff]  }
  0x84   : > { %13844 = vmatprep.mubr.msk.f32.mxu1 %vm232_vm1, %v14651_v7  ;;  %13881 = vmatprep.subr.msk.mxu0 %vm249_vm0, %v11822_v20  ;;  %v14707_v5 = vld [vmem:[%s15109_s25 + $0xa0] ss:$8 sps:$4 sm:$0xff]   ;;  %v14709_v7 = vld [vmem:[%s15109_s25 + $0xb0] ss:$8 sps:$4 sm:$0xff]  }
  0x85   : > { %13831 = vmatmul.mubr.msk.f32.gmra.mxu0 %vm232_vm1, %v14652_v8  ;;  %13895 = vmatprep.subr.msk.mxu1 %vm249_vm0, %v11848_v23  ;;  %v14710_v8 = vld [vmem:[%s15109_s25 + $0x9] ss:$8 sps:$4 sm:$0xff]  }
  0x86   : > { %13845 = vmatmul.mubr.msk.f32.gmra.mxu1 %vm232_vm1, %v14653_v9  ;;  %13833 = vmatprep.mubr.msk.f32.mxu0 %vm232_vm1, %v14654_v10  ;;  %v14711_v9 = vld [vmem:[%s15109_s25 + $0x8] ss:$8 sps:$4 sm:$0xff]   ;;  %v12003_v10 = vld [vmem:[%s17277_s1 + $0x64] sm:$0xf] }
  0x87   : > { %13847 = vmatprep.mubr.msk.f32.mxu1 %vm232_vm1, %v14655_v11  ;;  %v14712_v11 = vld [vmem:[%s15109_s25 + $0x19] ss:$8 sps:$4 sm:$0xff]  }
  0x89   : > { %13834 = vmatmul.mubr.msk.f32.gmra.mxu0 %vm232_vm1, %v14656_v12  ;;  %v14713_v12 = vld [vmem:[%s15109_s25 + $0x18] ss:$8 sps:$4 sm:$0xff]  }
  0x8a   : > { %13848 = vmatmul.mubr.msk.f32.gmra.mxu1 %vm232_vm1, %v14657_v13  ;;  %13836 = vmatprep.mubr.msk.f32.mxu0 %vm232_vm1, %v14658_v14  ;;  %v11986_v13 = vld [vmem:[%s17277_s1 + $0x60] sm:$0xf] }
  0x8b   : > { %13850 = vmatprep.mubr.msk.f32.mxu1 %vm232_vm1, %v14659_v15  ;;  %v14714_v14 = vld [vmem:[%s15109_s25 + $0x39] ss:$8 sps:$4 sm:$0xff]  }
  0x8c   : > { %v14715_v15 = vld [vmem:[%s15109_s25 + $0x38] ss:$8 sps:$4 sm:$0xff]  }
  0x8d   : > { %13837 = vmatmul.mubr.msk.f32.gmra.mxu0 %vm232_vm1, %v14660_v16  ;;  %v14716_v16 = vld [vmem:[%s15109_s25 + $0x49] ss:$8 sps:$4 sm:$0xff]  }
  0x8e   : > { %13851 = vmatmul.mubr.msk.f32.gmra.mxu1 %vm232_vm1, %v14661_v17  ;;  %13855 = vmatprep.mubr.msk.f32.mxu0 %vm232_vm1, %v14662_v18  ;;  %v14717_v17 = vld [vmem:[%s15109_s25 + $0x48] ss:$8 sps:$4 sm:$0xff]  }
  0x8f   : > { %13869 = vmatprep.mubr.msk.f32.mxu1 %vm232_vm1, %v14663_v19  ;;  %v14718_v18 = vld [vmem:[%s15109_s25 + $0x69] ss:$8 sps:$4 sm:$0xff]  }
  0x90   : > { %v14719_v19 = vld [vmem:[%s15109_s25 + $0x68] ss:$8 sps:$4 sm:$0xff]  }
  0x91   : > { %13856 = vmatmul.mubr.msk.f32.vlgmr.msra.gmra.mxu0 %vm232_vm1, %v14664_v21  ;;  %v14721_v21 = vld [vmem:[%s15109_s25 + $0x78] ss:$8 sps:$4 sm:$0xff]  }
  0x92   : > { %13870 = vmatmul.mubr.msk.f32.vlgmr.msra.gmra.mxu1 %vm232_vm1, %v14665_v22  ;;  %13882 = vmatpush3.msk.msra.mxu0 %vm249_vm0, %v11822_v20  ;;  %v14720_v20 = vld [vmem:[%s15109_s25 + $0x79] ss:$8 sps:$4 sm:$0xff]  }
  0x93   : > { %13896 = vmatpush3.msk.msra.mxu1 %vm249_vm0, %v11848_v23  ;;  %13858 = vmatprep.mubr.msk.f32.mxu0 %vm232_vm1, %v14666_v24  ;;  %v14722_v22 = vld [vmem:[%s15109_s25 + $0x99] ss:$8 sps:$4 sm:$0xff]   ;;  %v14724_v24 = vld [vmem:[%s15109_s25 + $0xa9] ss:$8 sps:$4 sm:$0xff]  }
  0x94   : > { %13872 = vmatprep.mubr.msk.f32.mxu1 %vm232_vm1, %v14667_v25  ;;  %13909 = vmatprep.subr.msk.mxu0 %vm249_vm0, %v11874_v38  ;;  %v14723_v23 = vld [vmem:[%s15109_s25 + $0x98] ss:$8 sps:$4 sm:$0xff]   ;;  %v14725_v25 = vld [vmem:[%s15109_s25 + $0xa8] ss:$8 sps:$4 sm:$0xff]  }
  0x95   : > { %13859 = vmatmul.mubr.msk.f32.gmra.mxu0 %vm232_vm1, %v14668_v26  ;;  %13923 = vmatprep.subr.msk.mxu1 %vm249_vm0, %v11900_v41  ;;  %v14726_v26 = vld [vmem:[%s15109_s25 + $0x41] ss:$8 sps:$4 sm:$0xff]  }
  0x96   : > { %13873 = vmatmul.mubr.msk.f32.gmra.mxu1 %vm232_vm1, %v14669_v27  ;;  %13861 = vmatprep.mubr.msk.f32.mxu0 %vm232_vm1, %v14670_v28  ;;  %v14727_v27 = vld [vmem:[%s15109_s25 + $0x42] ss:$8 sps:$4 sm:$0xff]  }
  0x97   : > { %13875 = vmatprep.mubr.msk.f32.mxu1 %vm232_vm1, %v14671_v29  ;;  %v12038_v29 = vld [vmem:[%s17277_s1 + $0x68] sm:$0xf] }
  0x99   : > { %13862 = vmatmul.mubr.msk.f32.gmra.mxu0 %vm232_vm1, %v14672_v30 }
  0x9a   : > { %13876 = vmatmul.mubr.msk.f32.gmra.mxu1 %vm232_vm1, %v14673_v31  ;;  %13864 = vmatprep.mubr.msk.f32.mxu0 %vm232_vm1, %v14674_v32  ;;  %v14728_v31 = vld [vmem:[%s15109_s25 + $0x51] ss:$8 sps:$4 sm:$0xff]  }
  0x9b   : > { %13878 = vmatprep.mubr.msk.f32.mxu1 %vm232_vm1, %v14675_v33  ;;  %v14729_v33 = vld [vmem:[%s15109_s25 + $0x52] ss:$8 sps:$4 sm:$0xff]  }
  0x9d   : > { %13865 = vmatmul.mubr.msk.f32.gmra.mxu0 %vm232_vm1, %v14676_v34  ;;  %v12064_v34 = vld [vmem:[%s17277_s1 + $0x6c] sm:$0xf] }
  0x9e   : > { %13879 = vmatmul.mubr.msk.f32.gmra.mxu1 %vm232_vm1, %v14677_v35  ;;  %13883 = vmatprep.mubr.msk.f32.mxu0 %vm232_vm1, %v14678_v36  ;;  %v14730_v36 = vld [vmem:[%s15109_s25 + $0x71] ss:$8 sps:$4 sm:$0xff]  }
  0x9f   : > { %13897 = vmatprep.mubr.msk.f32.mxu1 %vm232_vm1, %v14679_v37 }
  0xa1   : > { %13884 = vmatmul.mubr.msk.f32.vlgmr.msra.gmra.mxu0 %vm232_vm1, %v14680_v39 }
  0xa2   : > { %13898 = vmatmul.mubr.msk.f32.vlgmr.msra.gmra.mxu1 %vm232_vm1, %v14681_v40  ;;  %13910 = vmatpush3.msk.msra.mxu0 %vm249_vm0, %v11874_v38  ;;  %v14731_v38 = vld [vmem:[%s15109_s25 + $0x72] ss:$8 sps:$4 sm:$0xff]   ;;  %v14732_v40 = vld [vmem:[%s15109_s25 + $0x81] ss:$8 sps:$4 sm:$0xff]  }
  0xa3   : > { %13924 = vmatpush3.msk.msra.mxu1 %vm249_vm0, %v11900_v41  ;;  %13886 = vmatprep.mubr.msk.f32.mxu0 %vm232_vm1, %v14682_v42  ;;  %v14733_v42 = vld [vmem:[%s15109_s25 + $0x82] ss:$8 sps:$4 sm:$0xff]  }
  0xa4   : > { %13900 = vmatprep.mubr.msk.f32.mxu1 %vm232_vm1, %v14683_v43  ;;  %13937 = vmatprep.subr.msk.mxu0 %vm249_vm0, %v11926_v56 }
  0xa5   : > { %13887 = vmatmul.mubr.msk.f32.gmra.mxu0 %vm232_vm1, %v14684_v44  ;;  %13951 = vmatprep.subr.msk.mxu1 %vm249_vm0, %v11952_v59  ;;  %v14734_v44 = vld [vmem:[%s15109_s25 + $0xa1] ss:$8 sps:$4 sm:$0xff]  }
  0xa6   : > { %13901 = vmatmul.mubr.msk.f32.gmra.mxu1 %vm232_vm1, %v14685_v45  ;;  %13889 = vmatprep.mubr.msk.f32.mxu0 %vm232_vm1, %v14686_v46  ;;  %v14735_v46 = vld [vmem:[%s15109_s25 + $0xa2] ss:$8 sps:$4 sm:$0xff]  }
  0xa7   : > { %13903 = vmatprep.mubr.msk.f32.mxu1 %vm232_vm1, %v14687_v47 }
  0xa9   : > { %13890 = vmatmul.mubr.msk.f32.gmra.mxu0 %vm232_vm1, %v14688_v48  ;;  %v14736_v48 = vld [vmem:[%s15109_s25 + $0xb1] ss:$8 sps:$4 sm:$0xff]  }
  0xaa   : > { %13904 = vmatmul.mubr.msk.f32.gmra.mxu1 %vm232_vm1, %v14689_v49  ;;  %13892 = vmatprep.mubr.msk.f32.mxu0 %vm232_vm1, %v14690_v50  ;;  %v14737_v50 = vld [vmem:[%s15109_s25 + $0xb2] ss:$8 sps:$4 sm:$0xff]  }
  0xab   : > { %13906 = vmatprep.mubr.msk.f32.mxu1 %vm232_vm1, %v14691_v51 }
  0xad   : > { %13893 = vmatmul.mubr.msk.f32.gmra.mxu0 %vm232_vm1, %v14692_v52  ;;  %v14738_v52 = vld [vmem:[%s15109_s25 + $0xd1] ss:$8 sps:$4 sm:$0xff]  }
  0xae   : > { %13907 = vmatmul.mubr.msk.f32.gmra.mxu1 %vm232_vm1, %v14693_v53  ;;  %13911 = vmatprep.mubr.msk.f32.mxu0 %vm232_vm1, %v14694_v54  ;;  %v14739_v54 = vld [vmem:[%s15109_s25 + $0xd2] ss:$8 sps:$4 sm:$0xff]  }
  0xaf   : > { %13925 = vmatprep.mubr.msk.f32.mxu1 %vm232_vm1, %v14695_v55 }
  0xb1   : > { %13912 = vmatmul.mubr.msk.f32.vlgmr.msra.gmra.mxu0 %vm232_vm1, %v14696_v57 }
  0xb2   : > { %13926 = vmatmul.mubr.msk.f32.vlgmr.msra.gmra.mxu1 %vm232_vm1, %v14697_v58  ;;  %13938 = vmatpush3.msk.msra.mxu0 %vm249_vm0, %v11926_v56  ;;  %v14740_v56 = vld [vmem:[%s15109_s25 + $0xe1] ss:$8 sps:$4 sm:$0xff]  }
  0xb3   : > { %13952 = vmatpush3.msk.msra.mxu1 %vm249_vm0, %v11952_v59  ;;  %13914 = vmatprep.mubr.msk.f32.mxu0 %vm232_vm1, %v14698_v60  ;;  %v14741_v58 = vld [vmem:[%s15109_s25 + $0xe2] ss:$8 sps:$4 sm:$0xff]  }
  0xb4   : > { %13928 = vmatprep.mubr.msk.f32.mxu1 %vm232_vm1, %v14699_v61  ;;  %13965 = vmatprep.subr.msk.mxu0 %vm249_vm0, %v12003_v10  ;;  %v14742_v60 = vld [vmem:[%s15109_s25 + $0x3a] ss:$8 sps:$4 sm:$0xff]  }
  0xb5   : > { %13915 = vmatmul.mubr.msk.f32.gmra.mxu0 %vm232_vm1, %v14700_v62  ;;  %13979 = vmatprep.subr.msk.mxu1 %vm249_vm0, %v11986_v13  ;;  %v14743_v62 = vld [vmem:[%s15109_s25 + $0x39] ss:$8 sps:$4 sm:$0xff]  }
  0xb6   : > { %13929 = vmatmul.mubr.msk.f32.gmra.mxu1 %vm232_vm1, %v14701_v63  ;;  %13917 = vmatprep.mubr.msk.f32.mxu0 %vm232_vm1, %v14702_v0  ;;  %v12090_v63 = vld [vmem:[%s17277_s1 + $0x70] sm:$0xf] }
  0xb7   : > { %13931 = vmatprep.mubr.msk.f32.mxu1 %vm232_vm1, %v14703_v1  ;;  %v14744_v1 = vld [vmem:[%s15109_s25 + $0x4a] ss:$8 sps:$4 sm:$0xff]  }
  0xb9   : > { %13918 = vmatmul.mubr.msk.f32.gmra.mxu0 %vm232_vm1, %v14704_v2 }
  0xba   : > { %13932 = vmatmul.mubr.msk.f32.gmra.mxu1 %vm232_vm1, %v14705_v3  ;;  %13920 = vmatprep.mubr.msk.f32.mxu0 %vm232_vm1, %v14706_v4  ;;  %v14745_v3 = vld [vmem:[%s15109_s25 + $0x49] ss:$8 sps:$4 sm:$0xff]  }
  0xbb   : > { %13934 = vmatprep.mubr.msk.f32.mxu1 %vm232_vm1, %v14707_v5  ;;  %v12116_v5 = vld [vmem:[%s17277_s1 + $0x74] sm:$0xf] }
  0xbd   : > { %13921 = vmatmul.mubr.msk.f32.gmra.mxu0 %vm232_vm1, %v14708_v6 }
  0xbe   : > { %13935 = vmatmul.mubr.msk.f32.gmra.mxu1 %vm232_vm1, %v14709_v7  ;;  %13939 = vmatprep.mubr.msk.f32.mxu0 %vm232_vm1, %v14710_v8  ;;  %v14746_v7 = vld [vmem:[%s15109_s25 + $0x6a] ss:$8 sps:$4 sm:$0xff]  }
  0xbf   : > { %13953 = vmatprep.mubr.msk.f32.mxu1 %vm232_vm1, %v14711_v9  ;;  %v14747_v9 = vld [vmem:[%s15109_s25 + $0x69] ss:$8 sps:$4 sm:$0xff]  }
  0xc1   : > { %13940 = vmatmul.mubr.msk.f32.vlgmr.msra.gmra.mxu0 %vm232_vm1, %v14712_v11  ;;  %v14748_v11 = vld [vmem:[%s15109_s25 + $0x7a] ss:$8 sps:$4 sm:$0xff]  }
  0xc2   : > { %13954 = vmatmul.mubr.msk.f32.vlgmr.msra.gmra.mxu1 %vm232_vm1, %v14713_v12  ;;  %13966 = vmatpush3.msk.msra.mxu0 %vm249_vm0, %v12003_v10 }
  0xc3   : > { %13980 = vmatpush3.msk.msra.mxu1 %vm249_vm0, %v11986_v13  ;;  %13942 = vmatprep.mubr.msk.f32.mxu0 %vm232_vm1, %v14714_v14  ;;  %v14749_v13 = vld [vmem:[%s15109_s25 + $0x79] ss:$8 sps:$4 sm:$0xff]  }
  0xc4   : > { %13956 = vmatprep.mubr.msk.f32.mxu1 %vm232_vm1, %v14715_v15  ;;  %13993 = vmatprep.subr.msk.mxu0 %vm249_vm0, %v12038_v29  ;;  %v14750_v15 = vld [vmem:[%s15109_s25 + $0x9a] ss:$8 sps:$4 sm:$0xff]  }
  0xc5   : > { %13943 = vmatmul.mubr.msk.f32.gmra.mxu0 %vm232_vm1, %v14716_v16  ;;  %14007 = vmatprep.subr.msk.mxu1 %vm249_vm0, %v12064_v34 }
  0xc6   : > { %13957 = vmatmul.mubr.msk.f32.gmra.mxu1 %vm232_vm1, %v14717_v17  ;;  %13945 = vmatprep.mubr.msk.f32.mxu0 %vm232_vm1, %v14718_v18  ;;  %v14751_v17 = vld [vmem:[%s15109_s25 + $0x99] ss:$8 sps:$4 sm:$0xff]  }
  0xc7   : > { %13959 = vmatprep.mubr.msk.f32.mxu1 %vm232_vm1, %v14719_v19  ;;  %v14752_v19 = vld [vmem:[%s15109_s25 + $0xaa] ss:$8 sps:$4 sm:$0xff]  }
  0xc9   : > { %13946 = vmatmul.mubr.msk.f32.gmra.mxu0 %vm232_vm1, %v14720_v20 }
  0xca   : > { %13960 = vmatmul.mubr.msk.f32.gmra.mxu1 %vm232_vm1, %v14721_v21  ;;  %13948 = vmatprep.mubr.msk.f32.mxu0 %vm232_vm1, %v14722_v22  ;;  %v14753_v21 = vld [vmem:[%s15109_s25 + $0xa9] ss:$8 sps:$4 sm:$0xff]  }
  0xcb   : > { %13962 = vmatprep.mubr.msk.f32.mxu1 %vm232_vm1, %v14723_v23  ;;  %v14754_v23 = vld [vmem:[%s15109_s25 + $0xca] ss:$8 sps:$4 sm:$0xff]  }
  0xcd   : > { %13949 = vmatmul.mubr.msk.f32.gmra.mxu0 %vm232_vm1, %v14724_v24 }
  0xce   : > { %13963 = vmatmul.mubr.msk.f32.gmra.mxu1 %vm232_vm1, %v14725_v25  ;;  %13967 = vmatprep.mubr.msk.f32.mxu0 %vm232_vm1, %v14726_v26  ;;  %v14755_v25 = vld [vmem:[%s15109_s25 + $0xc9] ss:$8 sps:$4 sm:$0xff]  }
  0xcf   : > { %13981 = vmatprep.mubr.msk.f32.mxu1 %vm232_vm1, %v14727_v27  ;;  %v14756_v27 = vld [vmem:[%s15109_s25 + $0xda] ss:$8 sps:$4 sm:$0xff]  }
  0xd1   : > { %v15609_v28 = vpop.f32.mrf.mxu0  ;;  %13968 = vmatmul.mubr.msk.f32.vlgmr.msra.gmra.mxu0 %vm232_vm1, %v14728_v31  ;;  %v14757_v31 = vld [vmem:[%s15109_s25 + $0xd9] ss:$8 sps:$4 sm:$0xff]  }
  0xd2   : > { %v15615_v30 = vpop.f32.mrf.mxu1  ;;  %13982 = vmatmul.mubr.msk.f32.vlgmr.msra.gmra.mxu1 %vm232_vm1, %v14729_v33  ;;  %13994 = vmatpush3.msk.msra.mxu0 %vm249_vm0, %v12038_v29 }
  0xd3   : > { %v15620_v32 = vpop.f32.mrf.mxu0  ;;  %14008 = vmatpush3.msk.msra.mxu1 %vm249_vm0, %v12064_v34  ;;  %13970 = vmatprep.mubr.msk.f32.mxu0 %vm232_vm1, %v14730_v36  ;;  %v14758_v34 = vld [vmem:[%s15109_s25 + $0x12] ss:$8 sps:$4 sm:$0xff]  }
  0xd4   : > { %v15626_v35 = vpop.f32.mrf.mxu1  ;;  %13984 = vmatprep.mubr.msk.f32.mxu1 %vm232_vm1, %v14731_v38  ;;  %14021 = vmatprep.subr.msk.mxu0 %vm249_vm0, %v12090_v63  ;;  %v14759_v38 = vld [vmem:[%s15109_s25 + $0x11] ss:$8 sps:$4 sm:$0xff]  }
  0xd5   : > { %v15631_v37 = vpop.f32.mrf.mxu0  ;;  %13971 = vmatmul.mubr.msk.f32.gmra.mxu0 %vm232_vm1, %v14732_v40  ;;  %14035 = vmatprep.subr.msk.mxu1 %vm249_vm0, %v12116_v5  ;;  %v12142_v40 = vld [vmem:[%s17277_s1 + $0x78] sm:$0xf] }
  0xd6   : > { %v15636_v39 = vpop.f32.mrf.mxu1  ;;  %13985 = vmatmul.mubr.msk.f32.gmra.mxu1 %vm232_vm1, %v14733_v42  ;;  %13973 = vmatprep.mubr.msk.f32.mxu0 %vm232_vm1, %v14734_v44  ;;  %v473_v44 = vadd.f32 %v15615_v30, %v15609_v28  ;;  %v468_v28 = vadd.f32 %v15626_v35, %v15620_v32 }
  0xd7   : > { %v15641_v41 = vpop.f32.mrf.mxu0  ;;  %13987 = vmatprep.mubr.msk.f32.mxu1 %vm232_vm1, %v14735_v46  ;;  %v14760_v46 = vld [vmem:[%s15109_s25 + $0x22] ss:$8 sps:$4 sm:$0xff]   ;;  %v483_v32 = vadd.f32 %v15636_v39, %v15631_v37 }
  0xd8   : > { %v15645_v43 = vpop.f32.mrf.mxu1 }
  0xd9   : > { %v15649_v45 = vpop.f32.mrf.mxu0  ;;  %13974 = vmatmul.mubr.msk.f32.gmra.mxu0 %vm232_vm1, %v14736_v48 }
  0xda   : > { %v15653_v47 = vpop.f32.mrf.mxu1  ;;  %13988 = vmatmul.mubr.msk.f32.gmra.mxu1 %vm232_vm1, %v14737_v50  ;;  %13976 = vmatprep.mubr.msk.f32.mxu0 %vm232_vm1, %v14738_v52  ;;  %v14761_v50 = vld [vmem:[%s15109_s25 + $0x21] ss:$8 sps:$4 sm:$0xff]   ;;  %v12168_v52 = vld [vmem:[%s17277_s1 + $0x7c] sm:$0xf] }
  0xdb   : > { %v15657_v49 = vpop.f32.mrf.mxu0  ;;  %13990 = vmatprep.mubr.msk.f32.mxu1 %vm232_vm1, %v14739_v54 }
  0xdc   : > { %v15661_v51 = vpop.f32.mrf.mxu1 }
  0xdd   : > { %v15665_v53 = vpop.f32.mrf.mxu0  ;;  %13977 = vmatmul.mubr.msk.f32.gmra.mxu0 %vm232_vm1, %v14740_v56  ;;  %v14762_v56 = vld [vmem:[%s15109_s25 + $0x42] ss:$8 sps:$4 sm:$0xff]  }
  0xde   : > { %v15669_v55 = vpop.f32.mrf.mxu1  ;;  %13991 = vmatmul.mubr.msk.f32.gmra.mxu1 %vm232_vm1, %v14741_v58  ;;  %13995 = vmatprep.mubr.msk.f32.mxu0 %vm232_vm1, %v14742_v60  ;;  %v14763_v60 = vld [vmem:[%s15109_s25 + $0x41] ss:$8 sps:$4 sm:$0xff]  }
  0xdf   : > { %v15673_v57 = vpop.f32.mrf.mxu0  ;;  %14009 = vmatprep.mubr.msk.f32.mxu1 %vm232_vm1, %v14743_v62 }
  0xe0   : > { %v15677_v59 = vpop.f32.mrf.mxu1 }
  0xe1   : > { %v15681_v61 = vpop.f32.mrf.mxu0  ;;  %13996 = vmatmul.mubr.msk.f32.vlgmr.msra.gmra.mxu0 %vm232_vm1, %v14744_v1  ;;  %v14765_v1 = vld [vmem:[%s15109_s25 + $0x51] ss:$8 sps:$4 sm:$0xff]  }
  0xe2   : > { %v15688_v0 = vpop.f32.mrf.mxu1  ;;  %14010 = vmatmul.mubr.msk.f32.vlgmr.msra.gmra.mxu1 %vm232_vm1, %v14745_v3  ;;  %14022 = vmatpush3.msk.msra.mxu0 %vm249_vm0, %v12090_v63  ;;  %v674_v30 = vadd.f32 %v15681_v61, %v473_v44  ;;  %v14764_v61 = vld [vmem:[%s15109_s25 + $0x52] ss:$8 sps:$4 sm:$0xff]  }
  0xe3   : > { %v15693_v2 = vpop.f32.mrf.mxu0  ;;  %14036 = vmatpush3.msk.msra.mxu1 %vm249_vm0, %v12116_v5  ;;  %13998 = vmatprep.mubr.msk.f32.mxu0 %vm232_vm1, %v14746_v7  ;;  %v478_v5 = vadd.f32 %v15645_v43, %v15641_v41 }
  0xe4   : > { %v15697_v4 = vpop.f32.mrf.mxu1  ;;  %14012 = vmatprep.mubr.msk.f32.mxu1 %vm232_vm1, %v14747_v9  ;;  %14049 = vmatprep.subr.msk.mxu0 %vm249_vm0, %v12142_v40  ;;  %v673_v35 = vadd.f32 %v15693_v2, %v468_v28  ;;  %v848_v37 = vadd.f32 %v15688_v0, %v674_v30  ;;  %v14766_v2 = vld [vmem:[%s15109_s25 + $0x72] ss:$8 sps:$4 sm:$0xff]   ;;  %v493_v9 = vadd.f32 %v15653_v47, %v15649_v45  ;;  %v14769_v47 = vld [vmem:[%s15109_s25 + $0x81] ss:$8 sps:$4 sm:$0xff]  }
  0xe5   : > { %v15703_v6 = vpop.f32.mrf.mxu0  ;;  %13999 = vmatmul.mubr.msk.f32.gmra.mxu0 %vm232_vm1, %v14748_v11  ;;  %14063 = vmatprep.subr.msk.mxu1 %vm249_vm0, %v12168_v52  ;;  %v14767_v11 = vld [vmem:[%s15109_s25 + $0x71] ss:$8 sps:$4 sm:$0xff]  }
  0xe6   : > { %v15708_v8 = vpop.f32.mrf.mxu1  ;;  %14013 = vmatmul.mubr.msk.f32.gmra.mxu1 %vm232_vm1, %v14749_v13  ;;  %14001 = vmatprep.mubr.msk.f32.mxu0 %vm232_vm1, %v14750_v15  ;;  %v676_v39 = vadd.f32 %v15703_v6, %v483_v32  ;;  %v847_v41 = vadd.f32 %v15697_v4, %v673_v35  ;;  %v14768_v6 = vld [vmem:[%s15109_s25 + $0x82] ss:$8 sps:$4 sm:$0xff]  }
  0xe7   : > { %v15712_v10 = vpop.f32.mrf.mxu0  ;;  %14015 = vmatprep.mubr.msk.f32.mxu1 %vm232_vm1, %v14751_v17  ;;  %v488_v17 = vadd.f32 %v15661_v51, %v15657_v49  ;;  %v14771_v51 = vld [vmem:[%s15109_s25 + $0xa1] ss:$8 sps:$4 sm:$0xff]  }
  0xe8   : > { %v15717_v12 = vpop.f32.mrf.mxu1  ;;  %v675_v43 = vadd.f32 %v15712_v10, %v478_v5  ;;  %v850_v4 = vadd.f32 %v15708_v8, %v676_v39  ;;  %v14777_v35 = vld [vmem:[%s15109_s25 + $0x19] ss:$8 sps:$4 sm:$0xff]  }
  0xe9   : > { %v15721_v14 = vpop.f32.mrf.mxu0  ;;  %14002 = vmatmul.mubr.msk.f32.gmra.mxu0 %vm232_vm1, %v14752_v19 }
  0xea   : > { %v15725_v16 = vpop.f32.mrf.mxu1  ;;  %14016 = vmatmul.mubr.msk.f32.gmra.mxu1 %vm232_vm1, %v14753_v21  ;;  %14004 = vmatprep.mubr.msk.f32.mxu0 %vm232_vm1, %v14754_v23  ;;  %v678_v45 = vadd.f32 %v15721_v14, %v493_v9  ;;  %v14770_v21 = vld [vmem:[%s15109_s25 + $0xa2] ss:$8 sps:$4 sm:$0xff]  }
  0xeb   : > { %v15729_v18 = vpop.f32.mrf.mxu0  ;;  %14018 = vmatprep.mubr.msk.f32.mxu1 %vm232_vm1, %v14755_v25  ;;  %v503_v25 = vadd.f32 %v15669_v55, %v15665_v53  ;;  %v498_v53 = vadd.f32 %v15677_v59, %v15673_v57 }
  0xec   : > { %v15733_v20 = vpop.f32.mrf.mxu1  ;;  %v677_v49 = vadd.f32 %v15729_v18, %v488_v17  ;;  %v852_v55 = vadd.f32 %v15725_v16, %v678_v45  ;;  %v14780_v17 = vld [vmem:[%s15109_s25 + $0x4a] ss:$8 sps:$4 sm:$0xff]  }
  0xed   : > { %v15737_v22 = vpop.f32.mrf.mxu0  ;;  %14005 = vmatmul.mubr.msk.f32.gmra.mxu0 %vm232_vm1, %v14756_v27  ;;  %v849_v27 = vadd.f32 %v15717_v12, %v675_v43  ;;  %v14779_v43 = vld [vmem:[%s15109_s25 + $0x39] ss:$8 sps:$4 sm:$0xff]  }
  0xee   : > { %v15741_v24 = vpop.f32.mrf.mxu1  ;;  %14019 = vmatmul.mubr.msk.f32.gmra.mxu1 %vm232_vm1, %v14757_v31  ;;  %14023 = vmatprep.mubr.msk.f32.mxu0 %vm232_vm1, %v14758_v34  ;;  %v680_v18 = vadd.f32 %v15737_v22, %v503_v25  ;;  %v851_v57 = vadd.f32 %v15733_v20, %v677_v49  ;;  %v14775_v22 = vld [vmem:[%s15109_s25 + $0x9] ss:$8 sps:$4 sm:$0xff]   ;;  %v15856_v20 = vld [vmem:[%s17278_s2] ss:$0 sm:$0xff] }
  0xef   : > { %v15745_v26 = vpop.f32.mrf.mxu0  ;;  %14037 = vmatprep.mubr.msk.f32.mxu1 %vm232_vm1, %v14759_v38  ;;  %v14773_v38 = vld [vmem:[%s15109_s25 + $0xb1] ss:$8 sps:$4 sm:$0xff]  }
  0xf0   : > { %v15749_v29 = vpop.f32.mrf.mxu1  ;;  %v679_v59 = vadd.f32 %v15745_v26, %v498_v53  ;;  %v854_v30 = vadd.f32 %v15741_v24, %v680_v18  ;;  %v14782_v25 = vld [vmem:[%s15109_s25 + $0x6a] ss:$8 sps:$4 sm:$0xff]  }
  0xf1   : > { %v13689_v33 = vpop.f32.mrf.mxu0  ;;  %14024 = vmatmul.mubr.msk.f32.vlgmr.msra.gmra.mxu0 %vm232_vm1, %v14760_v46 }
  0xf2   : > { %v15755_v36 = vpop.f32.mrf.mxu1  ;;  %14038 = vmatmul.mubr.msk.f32.vlgmr.msra.gmra.mxu1 %vm232_vm1, %v14761_v50  ;;  %14050 = vmatpush3.msk.msra.mxu0 %vm249_vm0, %v12142_v40  ;;  %v1023_v0 = vadd.f32 %v13689_v33, %v848_v37  ;;  %v14772_v33 = vld [vmem:[%s15109_s25 + $0xb2] ss:$8 sps:$4 sm:$0xff]  }
  0xf3   : > { %v983_v42 = vpop.f32.mrf.mxu0  ;;  %14064 = vmatpush3.msk.msra.mxu1 %vm249_vm0, %v12168_v52  ;;  %14026 = vmatprep.mubr.msk.f32.mxu0 %vm232_vm1, %v14762_v56 }
  0xf4   : > { %v15767_v48 = vpop.f32.mrf.mxu1  ;;  %14040 = vmatprep.mubr.msk.f32.mxu1 %vm232_vm1, %v14763_v60  ;;  %v1022_v10 = vadd.f32 %v983_v42, %v847_v41  ;;  %v1197_v8 = vadd.f32 %v15755_v36, %v1023_v0  ;;  %v14774_v42 = vld [vmem:[%s15109_s25 + $0xa] ss:$8 sps:$4 sm:$0xff]  }
  0xf5   : > { %v13692_v54 = vpop.f32.mrf.mxu0  ;;  %14027 = vmatmul.mubr.msk.f32.gmra.mxu0 %vm232_vm1, %v14764_v61 }
  0xf6   : > { %v15780_v58 = vpop.f32.mrf.mxu1  ;;  %14041 = vmatmul.mubr.msk.f32.gmra.mxu1 %vm232_vm1, %v14765_v1  ;;  %14029 = vmatprep.mubr.msk.f32.mxu0 %vm232_vm1, %v14766_v2  ;;  %v1025_v31 = vadd.f32 %v13692_v54, %v850_v4  ;;  %v1196_v36 = vadd.f32 %v15767_v48, %v1022_v10  ;;  %v12219_v48 = vld [vmem:[%s17277_s1 + $0x84] sm:$0xf] }
  0xf7   : > { %v993_v62 = vpop.f32.mrf.mxu0  ;;  %14043 = vmatprep.mubr.msk.f32.mxu1 %vm232_vm1, %v14767_v11  ;;  %14077 = vmatprep.subr.msk.mxu0 %vm249_vm0, %v12219_v48  ;;  %v14778_v2 = vld [vmem:[%s15109_s25 + $0x3a] ss:$8 sps:$4 sm:$0xff]  }
  0xf8   : > { %v15791_v63 = vpop.f32.mrf.mxu1  ;;  %v1024_v40 = vadd.f32 %v993_v62, %v849_v27  ;;  %v1199_v52 = vadd.f32 %v15780_v58, %v1025_v31  ;;  %v14776_v58 = vld [vmem:[%s15109_s25 + $0x1a] ss:$8 sps:$4 sm:$0xff]   ;;  %v14783_v27 = vld [vmem:[%s15109_s25 + $0x69] ss:$8 sps:$4 sm:$0xff]  }
  0xf9   : > { %v13695_v3 = vpop.f32.mrf.mxu0  ;;  %14030 = vmatmul.mubr.msk.f32.gmra.mxu0 %vm232_vm1, %v14768_v6 }
  0xfa   : > { %v15801_v7 = vpop.f32.mrf.mxu1  ;;  %14044 = vmatmul.mubr.msk.f32.gmra.mxu1 %vm232_vm1, %v14769_v47  ;;  %14032 = vmatprep.mubr.msk.f32.mxu0 %vm232_vm1, %v14770_v21  ;;  %v1027_v16 = vadd.f32 %v13695_v3, %v852_v55  ;;  %v1198_v62 = vadd.f32 %v15791_v63, %v1024_v40  ;;  %v853_v3 = vadd.f32 %v15749_v29, %v679_v59  ;;  %v12202_v63 = vld [vmem:[%s17277_s1 + $0x80] sm:$0xf] }
  0xfb   : > { %v1003_v13 = vpop.f32.mrf.mxu0  ;;  %14046 = vmatprep.mubr.msk.f32.mxu1 %vm232_vm1, %v14771_v51  ;;  %14091 = vmatprep.subr.msk.mxu1 %vm249_vm0, %v12202_v63 }
  0xfc   : > { %v15811_v15 = vpop.f32.mrf.mxu1  ;;  %v1026_v56 = vadd.f32 %v1003_v13, %v851_v57  ;;  %v1201_v5 = vadd.f32 %v15801_v7, %v1027_v16  ;;  %v14788_v16 = vld [vmem:[%s15109_s25 + $0xaa] ss:$8 sps:$4 sm:$0xff]  }
  0xfd   : > { %v13698_v19 = vpop.f32.mrf.mxu0  ;;  %14033 = vmatmul.mubr.msk.f32.gmra.mxu0 %vm232_vm1, %v14772_v33  ;;  %v14784_v33 = vld [vmem:[%s15109_s25 + $0x7a] ss:$8 sps:$4 sm:$0xff]  }
  0xfe   : > { %v15821_v23 = vpop.f32.mrf.mxu1  ;;  %14047 = vmatmul.mubr.msk.f32.gmra.mxu1 %vm232_vm1, %v14773_v38  ;;  %14051 = vmatprep.mubr.msk.f32.mxu0 %vm232_vm1, %v14774_v42  ;;  %v1029_v37 = vadd.f32 %v13698_v19, %v854_v30  ;;  %v1200_v13 = vadd.f32 %v15811_v15, %v1026_v56  ;;  %v14781_v19 = vld [vmem:[%s15109_s25 + $0x49] ss:$8 sps:$4 sm:$0xff]   ;;  %v14785_v38 = vld [vmem:[%s15109_s25 + $0x79] ss:$8 sps:$4 sm:$0xff]  }
  0xff   : > { %v1013_v14 = vpop.f32.mrf.mxu0  ;;  %14065 = vmatprep.mubr.msk.f32.mxu1 %vm232_vm1, %v14775_v22  ;;  %v14791_v30 = vld [vmem:[%s15109_s25 + $0x69] ss:$8 sps:$4 sm:$0xff]  }
 0x100   : > { %v15832_v34 = vpop.f32.mrf.mxu1  ;;  %v1028_v41 = vadd.f32 %v1013_v14, %v853_v3  ;;  %v1203_v10 = vadd.f32 %v15821_v23, %v1029_v37  ;;  %v12254_v56 = vld [vmem:[%s17277_s1 + $0x88] sm:$0xf]  ;;  %v14795_v3 = vld [vmem:[%s15109_s25 + $0x99] ss:$8 sps:$4 sm:$0xff]  }
 0x101   : > { %v13717_v12 = vpop.f32.mrf.mxu0  ;;  %14052 = vmatmul.mubr.msk.f32.vlgmr.msra.gmra.mxu0 %vm232_vm1, %v14776_v58  ;;  %v14796_v37 = vld [vmem:[%s15109_s25 + $0xa8] ss:$8 sps:$4 sm:$0xff]  }
 0x102   : > { %v1371_v44 = vadd.f32 %v13717_v12, %v1197_v8  ;;  %v13731_v46 = vpop.f32.mrf.mxu1  ;;  %14066 = vmatmul.mubr.msk.f32.vlgmr.msra.gmra.mxu1 %vm232_vm1, %v14777_v35  ;;  %14078 = vmatpush3.msk.msra.mxu0 %vm249_vm0, %v12219_v48  ;;  %v1202_v31 = vadd.f32 %v15832_v34, %v1028_v41  ;;  %v12280_v35 = vld [vmem:[%s17277_s1 + $0x8c] sm:$0xf] }
 0x103   : > { %v1331_v50 = vpop.f32.mrf.mxu0  ;;  %14092 = vmatpush3.msk.msra.mxu1 %vm249_vm0, %v12202_v63  ;;  %14054 = vmatprep.mubr.msk.f32.mxu0 %vm232_vm1, %v14778_v2  ;;  %v14798_v2 = vld [vmem:[%s15109_s25 + $0xc8] ss:$8 sps:$4 sm:$0xff]  }
 0x104   : > { %v1545_v26 = vadd.f32 %v13731_v46, %v1371_v44  ;;  %v1370_v54 = vadd.f32 %v1331_v50, %v1196_v36  ;;  %v1505_v28 = vpop.f32.mrf.mxu1  ;;  %14068 = vmatprep.mubr.msk.f32.mxu1 %vm232_vm1, %v14779_v43  ;;  %v14786_v36 = vld [vmem:[%s15109_s25 + $0x9a] ss:$8 sps:$4 sm:$0xff]   ;;  %14105 = vmatprep.subr.msk.mxu0 %vm249_vm0, %v12254_v56 }
 0x105   : > { %v13720_v60 = vpop.f32.mrf.mxu0  ;;  %14055 = vmatmul.mubr.msk.f32.gmra.mxu0 %vm232_vm1, %v14780_v17  ;;  %v14787_v46 = vld [vmem:[%s15109_s25 + $0x99] ss:$8 sps:$4 sm:$0xff]   ;;  %14119 = vmatprep.subr.msk.mxu1 %vm249_vm0, %v12280_v35 }
 0x106   : > { %v1559_v32 = vadd.f32 %v15856_v20, %v1545_v26  ;;  %v1544_v24 = vadd.f32 %v1505_v28, %v1370_v54  ;;  %v1373_v61 = vadd.f32 %v13720_v60, %v1199_v52  ;;  %v13734_v1 = vpop.f32.mrf.mxu1  ;;  %14069 = vmatmul.mubr.msk.f32.gmra.mxu1 %vm232_vm1, %v14781_v19  ;;  %14057 = vmatprep.mubr.msk.f32.mxu0 %vm232_vm1, %v14782_v25  ;;  %v14789_v52 = vld [vmem:[%s15109_s25 + $0xa9] ss:$8 sps:$4 sm:$0xff]   ;;  %v14792_v60 = vld [vmem:[%s15109_s25 + $0x78] ss:$8 sps:$4 sm:$0xff]  }
 0x107   : > { %v1341_v39 = vpop.f32.mrf.mxu0  ;;  %14071 = vmatprep.mubr.msk.f32.mxu1 %vm232_vm1, %v14783_v27  ;;  %v14790_v54 = vld [vmem:[%s15109_s25 + $0x68] ss:$8 sps:$4 sm:$0xff]   ;;  %v14801_v43 = vld [vmem:[%s15109_s25 + $0xd9] ss:$8 sps:$4 sm:$0xff]  }
 0x108   : > { %1568 = vst.msk [vmem:[%s15864_s13 + $0x8] sm:$0xff] %vm1566_vm2, %v1559_v32  ;;  %v1558_v29 = vadd.f32 %v15856_v20, %v1544_v24  ;;  %v1547_v7 = vadd.f32 %v13734_v1, %v1373_v61  ;;  %v1372_v9 = vadd.f32 %v1341_v39, %v1198_v62  ;;  %v1515_v11 = vpop.f32.mrf.mxu1  ;;  %v14793_v32 = vld [vmem:[%s15109_s25 + $0x79] ss:$8 sps:$4 sm:$0xff]   ;;  %v14797_v39 = vld [vmem:[%s15109_s25 + $0xa9] ss:$8 sps:$4 sm:$0xff]  }
 0x109   : > { %v13723_v0 = vpop.f32.mrf.mxu0  ;;  %14058 = vmatmul.mubr.msk.f32.gmra.mxu0 %vm232_vm1, %v14784_v33  ;;  %v14794_v61 = vld [vmem:[%s15109_s25 + $0x98] ss:$8 sps:$4 sm:$0xff]   ;;  %v12332_v33 = vld [vmem:[%s17277_s1 + $0x94] sm:$0xf] }
 0x10a   : > { %1567 = vst.msk [vmem:[%s15864_s13] sm:$0xff] %vm1566_vm2, %v1558_v29  ;;  %v1561_v6 = vadd.f32 %v15856_v20, %v1547_v7  ;;  %v1546_v45 = vadd.f32 %v1515_v11, %v1372_v9  ;;  %v1375_v47 = vadd.f32 %v13723_v0, %v1201_v5  ;;  %v13737_v15 = vpop.f32.mrf.mxu1  ;;  %14072 = vmatmul.mubr.msk.f32.gmra.mxu1 %vm232_vm1, %v14785_v38  ;;  %v14799_v9 = vld [vmem:[%s15109_s25 + $0xc9] ss:$8 sps:$4 sm:$0xff]  }
 0x10b   : > { %v1351_v4 = vpop.f32.mrf.mxu0  ;;  %14060 = vmatprep.mubr.msk.f32.mxu0 %vm232_vm1, %v14786_v36  ;;  %14074 = vmatprep.mubr.msk.f32.mxu1 %vm232_vm1, %v14787_v46  ;;  %v14811_v38 = vld [vmem:[%s15109_s25 + $0x90] ss:$8 sps:$4 sm:$0xff]  }
 0x10c   : > { %1570 = vst.msk [vmem:[%s15864_s13 + $0x18] sm:$0xff] %vm1566_vm2, %v1561_v6  ;;  %v1560_v21 = vadd.f32 %v15856_v20, %v1546_v45  ;;  %v1549_v49 = vadd.f32 %v13737_v15, %v1375_v47  ;;  %v1374_v51 = vadd.f32 %v1351_v4, %v1200_v13  ;;  %v1525_v14 = vpop.f32.mrf.mxu1  ;;  %v14800_v13 = vld [vmem:[%s15109_s25 + $0xd8] ss:$8 sps:$4 sm:$0xff]   ;;  %v14804_v15 = vld [vmem:[%s15109_s25 + $0x108] ss:$8 sps:$4 sm:$0xff]  }
 0x10d   : > { %v13726_v8 = vpop.f32.mrf.mxu0  ;;  %14061 = vmatmul.mubr.msk.f32.gmra.mxu0 %vm232_vm1, %v14788_v16  ;;  %v14802_v6 = vld [vmem:[%s15109_s25 + $0xf8] ss:$8 sps:$4 sm:$0xff]   ;;  %v14805_v4 = vld [vmem:[%s15109_s25 + $0x109] ss:$8 sps:$4 sm:$0xff]  }
 0x10e   : > { %1569 = vst.msk [vmem:[%s15864_s13 + $0x10] sm:$0xff] %vm1566_vm2, %v1560_v21  ;;  %v1563_v23 = vadd.f32 %v15856_v20, %v1549_v49  ;;  %v1548_v53 = vadd.f32 %v1525_v14, %v1374_v51  ;;  %v1377_v55 = vadd.f32 %v13726_v8, %v1203_v10  ;;  %v13740_v18 = vpop.f32.mrf.mxu1  ;;  %14075 = vmatmul.mubr.msk.f32.gmra.mxu1 %vm232_vm1, %v14789_v52  ;;  %v14803_v45 = vld [vmem:[%s15109_s25 + $0xf9] ss:$8 sps:$4 sm:$0xff]   ;;  %v12306_v14 = vld [vmem:[%s17277_s1 + $0x90] sm:$0xf] }
 0x10f   : > { %v1361_v12 = vpop.f32.mrf.mxu0  ;;  %14079 = vmatprep.mubr.msk.f32.mxu0 %vm232_vm1, %v14790_v54  ;;  %14093 = vmatprep.mubr.msk.f32.mxu1 %vm232_vm1, %v14791_v30  ;;  %v14806_v21 = vld [vmem:[%s15109_s25 + $0x61] ss:$8 sps:$4 sm:$0xff]   ;;  %v14808_v8 = vld [vmem:[%s15109_s25 + $0x71] ss:$8 sps:$4 sm:$0xff]  }
 0x110   : > { %1572 = vst.msk [vmem:[%s15864_s13 + $0x28] sm:$0xff] %vm1566_vm2, %v1563_v23  ;;  %v1562_v34 = vadd.f32 %v15856_v20, %v1548_v53  ;;  %v1551_v40 = vadd.f32 %v13740_v18, %v1377_v55  ;;  %v1376_v42 = vadd.f32 %v1361_v12, %v1202_v31  ;;  %v1535_v44 = vpop.f32.mrf.mxu1  ;;  %v14807_v49 = vld [vmem:[%s15109_s25 + $0x60] ss:$8 sps:$4 sm:$0xff]   ;;  %v14809_v23 = vld [vmem:[%s15109_s25 + $0x70] ss:$8 sps:$4 sm:$0xff]  }
 0x111   : > { %v15916_v57 = vpop.f32.mrf.mxu0  ;;  %14080 = vmatmul.mubr.msk.f32.vlgmr.msra.gmra.mxu0 %vm232_vm1, %v14792_v60  ;;  %v14810_v55 = vld [vmem:[%s15109_s25 + $0x91] ss:$8 sps:$4 sm:$0xff]  }
 0x112   : > { %1571 = vst.msk [vmem:[%s15864_s13 + $0x20] sm:$0xff] %vm1566_vm2, %v1562_v34  ;;  %v1565_v59 = vadd.f32 %v15856_v20, %v1551_v40  ;;  %v1550_v22 = vadd.f32 %v1535_v44, %v1376_v42  ;;  %v15923_v50 = vpop.f32.mrf.mxu1  ;;  %14094 = vmatmul.mubr.msk.f32.vlgmr.msra.gmra.mxu1 %vm232_vm1, %v14793_v32  ;;  %14106 = vmatpush3.msk.msra.mxu0 %vm249_vm0, %v12254_v56  ;;  %v14812_v34 = vld [vmem:[%s15109_s25 + $0xa1] ss:$8 sps:$4 sm:$0xff]   ;;  %v14818_v30 = vld [vmem:[%s15109_s25 + $0xf1] ss:$8 sps:$4 sm:$0xff]  }
 0x113   : > { %v15927_v48 = vpop.f32.mrf.mxu0  ;;  %14120 = vmatpush3.msk.msra.mxu1 %vm249_vm0, %v12280_v35  ;;  %14082 = vmatprep.mubr.msk.f32.mxu0 %vm232_vm1, %v14794_v61  ;;  %v14813_v40 = vld [vmem:[%s15109_s25 + $0xa0] ss:$8 sps:$4 sm:$0xff]   ;;  %v14819_v60 = vld [vmem:[%s15109_s25 + $0xf0] ss:$8 sps:$4 sm:$0xff]  }
 0x114   : > { %1574 = vst.msk [vmem:[%s15864_s13 + $0x38] sm:$0xff] %vm1566_vm2, %v1565_v59  ;;  %v1564_v26 = vadd.f32 %v15856_v20, %v1550_v22  ;;  %v15934_v28 = vpop.f32.mrf.mxu1  ;;  %14096 = vmatprep.mubr.msk.f32.mxu1 %vm232_vm1, %v14795_v3  ;;  %14133 = vmatprep.subr.msk.mxu0 %vm249_vm0, %v12306_v14  ;;  %v14814_v44 = vld [vmem:[%s15109_s25 + $0xc1] ss:$8 sps:$4 sm:$0xff]   ;;  %v14816_v22 = vld [vmem:[%s15109_s25 + $0xd1] ss:$8 sps:$4 sm:$0xff]   ;;  %v1874_v3 = vadd.f32 %v15923_v50, %v15916_v57 }
 0x115   : > { %v15941_v58 = vpop.f32.mrf.mxu0  ;;  %14083 = vmatmul.mubr.msk.f32.gmra.mxu0 %vm232_vm1, %v14796_v37  ;;  %14147 = vmatprep.subr.msk.mxu1 %vm249_vm0, %v12332_v33  ;;  %v14815_v59 = vld [vmem:[%s15109_s25 + $0xc0] ss:$8 sps:$4 sm:$0xff]   ;;  %v12358_v57 = vld [vmem:[%s17277_s1 + $0x98] sm:$0xf] }
 0x116   : > { %1573 = vst.msk [vmem:[%s15864_s13 + $0x30] sm:$0xff] %vm1566_vm2, %v1564_v26  ;;  %v15948_v62 = vpop.f32.mrf.mxu1  ;;  %14097 = vmatmul.mubr.msk.f32.gmra.mxu1 %vm232_vm1, %v14797_v39  ;;  %14085 = vmatprep.mubr.msk.f32.mxu0 %vm232_vm1, %v14798_v2  ;;  %v14817_v26 = vld [vmem:[%s15109_s25 + $0xd0] ss:$8 sps:$4 sm:$0xff]   ;;  %v14820_v35 = vld [vmem:[%s15109_s25 + $0x101] ss:$8 sps:$4 sm:$0xff]  }
 0x117   : > { %v15955_v24 = vpop.f32.mrf.mxu0  ;;  %14099 = vmatprep.mubr.msk.f32.mxu1 %vm232_vm1, %v14799_v9  ;;  %v14821_v37 = vld [vmem:[%s15109_s25 + $0x100] ss:$8 sps:$4 sm:$0xff]  }
 0x118   : > { %v15960_v1 = vpop.f32.mrf.mxu1  ;;  %v14822_v2 = vld [vmem:[%s15109_s25 + $0x39] ss:$8 sps:$4 sm:$0xff]  }
 0x119   : > { %v15965_v5 = vpop.f32.mrf.mxu0  ;;  %14086 = vmatmul.mubr.msk.f32.gmra.mxu0 %vm232_vm1, %v14800_v13  ;;  %v1869_v13 = vadd.f32 %v15934_v28, %v15927_v48  ;;  %v14825_v28 = vld [vmem:[%s15109_s25 + $0x48] ss:$8 sps:$4 sm:$0xff]  }
 0x11a   : > { %v15970_v63 = vpop.f32.mrf.mxu1  ;;  %14100 = vmatmul.mubr.msk.f32.gmra.mxu1 %vm232_vm1, %v14801_v43  ;;  %14088 = vmatprep.mubr.msk.f32.mxu0 %vm232_vm1, %v14802_v6  ;;  %v14823_v6 = vld [vmem:[%s15109_s25 + $0x38] ss:$8 sps:$4 sm:$0xff]  }
 0x11b   : > { %v15974_v29 = vpop.f32.mrf.mxu0  ;;  %14102 = vmatprep.mubr.msk.f32.mxu1 %vm232_vm1, %v14803_v45  ;;  %v14824_v45 = vld [vmem:[%s15109_s25 + $0x49] ss:$8 sps:$4 sm:$0xff]  }
 0x11c   : > { %v15978_v7 = vpop.f32.mrf.mxu1 }
 0x11d   : > { %v15982_v11 = vpop.f32.mrf.mxu0  ;;  %14089 = vmatmul.mubr.msk.f32.gmra.mxu0 %vm232_vm1, %v14804_v15 }
 0x11e   : > { %v15986_v41 = vpop.f32.mrf.mxu1  ;;  %14103 = vmatmul.mubr.msk.f32.gmra.mxu1 %vm232_vm1, %v14805_v4  ;;  %14107 = vmatprep.mubr.msk.f32.mxu0 %vm232_vm1, %v14806_v21  ;;  %v1884_v4 = vadd.f32 %v15948_v62, %v15941_v58  ;;  %v12384_v21 = vld [vmem:[%s17277_s1 + $0x9c] sm:$0xf]  ;;  %v1879_v58 = vadd.f32 %v15960_v1, %v15955_v24  ;;  %v1894_v24 = vadd.f32 %v15970_v63, %v15965_v5 }
 0x11f   : > { %v15990_v0 = vpop.f32.mrf.mxu0  ;;  %14121 = vmatprep.mubr.msk.f32.mxu1 %vm232_vm1, %v14807_v49 }
 0x120   : > { %v15994_v17 = vpop.f32.mrf.mxu1 }
 0x121   : > { %v15998_v47 = vpop.f32.mrf.mxu0  ;;  %14108 = vmatmul.mubr.msk.f32.vlgmr.msra.gmra.mxu0 %vm232_vm1, %v14808_v8 }
 0x122   : > { %v16002_v19 = vpop.f32.mrf.mxu1  ;;  %14122 = vmatmul.mubr.msk.f32.vlgmr.msra.gmra.mxu1 %vm232_vm1, %v14809_v23  ;;  %14134 = vmatpush3.msk.msra.mxu0 %vm249_vm0, %v12306_v14  ;;  %v2074_v43 = vadd.f32 %v15998_v47, %v1874_v3  ;;  %v14826_v14 = vld [vmem:[%s15109_s25 + $0x69] ss:$8 sps:$4 sm:$0xff]  }
 0x123   : > { %v16006_v10 = vpop.f32.mrf.mxu0  ;;  %14148 = vmatpush3.msk.msra.mxu1 %vm249_vm0, %v12332_v33  ;;  %14110 = vmatprep.mubr.msk.f32.mxu0 %vm232_vm1, %v14810_v55  ;;  %v14827_v23 = vld [vmem:[%s15109_s25 + $0x68] ss:$8 sps:$4 sm:$0xff]  }
 0x124   : > { %v16010_v25 = vpop.f32.mrf.mxu1  ;;  %14124 = vmatprep.mubr.msk.f32.mxu1 %vm232_vm1, %v14811_v38  ;;  %14161 = vmatprep.subr.msk.mxu0 %vm249_vm0, %v12358_v57  ;;  %v2073_v48 = vadd.f32 %v16006_v10, %v1869_v13  ;;  %v2248_v10 = vadd.f32 %v16002_v19, %v2074_v43  ;;  %v14828_v38 = vld [vmem:[%s15109_s25 + $0x79] ss:$8 sps:$4 sm:$0xff]   ;;  %v14834_v3 = vld [vmem:[%s15109_s25 + $0xc9] ss:$8 sps:$4 sm:$0xff]  }
 0x125   : > { %v16014_v51 = vpop.f32.mrf.mxu0  ;;  %14111 = vmatmul.mubr.msk.f32.gmra.mxu0 %vm232_vm1, %v14812_v34  ;;  %14175 = vmatprep.subr.msk.mxu1 %vm249_vm0, %v12384_v21 }
 0x126   : > { %v16020_v27 = vpop.f32.mrf.mxu1  ;;  %14125 = vmatmul.mubr.msk.f32.gmra.mxu1 %vm232_vm1, %v14813_v40  ;;  %14113 = vmatprep.mubr.msk.f32.mxu0 %vm232_vm1, %v14814_v44  ;;  %v2076_v62 = vadd.f32 %v16014_v51, %v1884_v4  ;;  %v2247_v19 = vadd.f32 %v16010_v25, %v2073_v48  ;;  %v14829_v51 = vld [vmem:[%s15109_s25 + $0x78] ss:$8 sps:$4 sm:$0xff]   ;;  %v1889_v25 = vadd.f32 %v15978_v7, %v15974_v29  ;;  %v14832_v7 = vld [vmem:[%s15109_s25 + $0xa9] ss:$8 sps:$4 sm:$0xff]  }
 0x127   : > { %v16025_v31 = vpop.f32.mrf.mxu0  ;;  %14127 = vmatprep.mubr.msk.f32.mxu1 %vm232_vm1, %v14815_v59  ;;  %v14830_v59 = vld [vmem:[%s15109_s25 + $0x99] ss:$8 sps:$4 sm:$0xff]  }
 0x128   : > { %v16031_v53 = vpop.f32.mrf.mxu1  ;;  %v2075_v1 = vadd.f32 %v16025_v31, %v1879_v58  ;;  %v2250_v5 = vadd.f32 %v16020_v27, %v2076_v62  ;;  %v14831_v31 = vld [vmem:[%s15109_s25 + $0x98] ss:$8 sps:$4 sm:$0xff]  }
 0x129   : > { %v16036_v18 = vpop.f32.mrf.mxu0  ;;  %14114 = vmatmul.mubr.msk.f32.gmra.mxu0 %vm232_vm1, %v14816_v22 }
 0x12a   : > { %v16041_v12 = vpop.f32.mrf.mxu1  ;;  %14128 = vmatmul.mubr.msk.f32.gmra.mxu1 %vm232_vm1, %v14817_v26  ;;  %14116 = vmatprep.mubr.msk.f32.mxu0 %vm232_vm1, %v14818_v30  ;;  %v2078_v63 = vadd.f32 %v16036_v18, %v1894_v24  ;;  %v2249_v27 = vadd.f32 %v16031_v53, %v2075_v1 }
 0x12b   : > { %v16046_v36 = vpop.f32.mrf.mxu0  ;;  %14130 = vmatprep.mubr.msk.f32.mxu1 %vm232_vm1, %v14819_v60  ;;  %v1904_v60 = vadd.f32 %v15986_v41, %v15982_v11 }
 0x12c   : > { %v16050_v42 = vpop.f32.mrf.mxu1  ;;  %v2077_v30 = vadd.f32 %v16046_v36, %v1889_v25  ;;  %v1899_v36 = vadd.f32 %v15994_v17, %v15990_v0  ;;  %v2252_v11 = vadd.f32 %v16041_v12, %v2078_v63  ;;  %v14843_v25 = vld [vmem:[%s15109_s25 + $0x60] ss:$8 sps:$4 sm:$0xff]   ;;  %v14844_v63 = vld [vmem:[%s15109_s25 + $0x71] ss:$8 sps:$4 sm:$0xff]  }
 0x12d   : > { %v16054_v46 = vpop.f32.mrf.mxu0  ;;  %14117 = vmatmul.mubr.msk.f32.gmra.mxu0 %vm232_vm1, %v14820_v35  ;;  %v14833_v35 = vld [vmem:[%s15109_s25 + $0xa8] ss:$8 sps:$4 sm:$0xff]  }
 0x12e   : > { %v16058_v16 = vpop.f32.mrf.mxu1  ;;  %14131 = vmatmul.mubr.msk.f32.gmra.mxu1 %vm232_vm1, %v14821_v37  ;;  %14135 = vmatprep.mubr.msk.f32.mxu0 %vm232_vm1, %v14822_v2  ;;  %v2080_v41 = vadd.f32 %v16054_v46, %v1904_v60  ;;  %v2251_v0 = vadd.f32 %v16050_v42, %v2077_v30  ;;  %v14838_v42 = vld [vmem:[%s15109_s25 + $0x31] ss:$8 sps:$4 sm:$0xff]  }
 0x12f   : > { %v16062_v52 = vpop.f32.mrf.mxu0  ;;  %14149 = vmatprep.mubr.msk.f32.mxu1 %vm232_vm1, %v14823_v6  ;;  %v14845_v30 = vld [vmem:[%s15109_s25 + $0x70] ss:$8 sps:$4 sm:$0xff]  }
 0x130   : > { %v16066_v54 = vpop.f32.mrf.mxu1  ;;  %v2079_v17 = vadd.f32 %v16062_v52, %v1899_v36  ;;  %v2254_v4 = vadd.f32 %v16058_v16, %v2080_v41  ;;  %v14840_v16 = vld [vmem:[%s15109_s25 + $0x41] ss:$8 sps:$4 sm:$0xff]  }
 0x131   : > { %v13801_v56 = vpop.f32.mrf.mxu0  ;;  %14136 = vmatmul.mubr.msk.f32.vlgmr.msra.gmra.mxu0 %vm232_vm1, %v14824_v45  ;;  %v14837_v45 = vld [vmem:[%s15109_s25 + $0xd8] ss:$8 sps:$4 sm:$0xff]  }
 0x132   : > { %v13815_v32 = vpop.f32.mrf.mxu1  ;;  %14150 = vmatmul.mubr.msk.f32.vlgmr.msra.gmra.mxu1 %vm232_vm1, %v14825_v28  ;;  %14162 = vmatpush3.msk.msra.mxu0 %vm249_vm0, %v12358_v57  ;;  %v2422_v55 = vadd.f32 %v13801_v56, %v2248_v10  ;;  %v2253_v58 = vadd.f32 %v16066_v54, %v2079_v17  ;;  %v14841_v54 = vld [vmem:[%s15109_s25 + $0x40] ss:$8 sps:$4 sm:$0xff]  }
 0x133   : > { %v2382_v61 = vpop.f32.mrf.mxu0  ;;  %14176 = vmatpush3.msk.msra.mxu1 %vm249_vm0, %v12384_v21  ;;  %14138 = vmatprep.mubr.msk.f32.mxu0 %vm232_vm1, %v14826_v14 }
 0x134   : > { %v16078_v39 = vpop.f32.mrf.mxu1  ;;  %14152 = vmatprep.mubr.msk.f32.mxu1 %vm232_vm1, %v14827_v23  ;;  %v2421_v44 = vadd.f32 %v2382_v61, %v2247_v19  ;;  %v2596_v29 = vadd.f32 %v13815_v32, %v2422_v55  ;;  %v12418_v19 = vld [vmem:[%s17277_s1 + $0xa0] sm:$0xf] }
 0x135   : > { %v13804_v9 = vpop.f32.mrf.mxu0  ;;  %14139 = vmatmul.mubr.msk.f32.gmra.mxu0 %vm232_vm1, %v14828_v38  ;;  %14203 = vmatprep.subr.msk.mxu1 %vm249_vm0, %v12418_v19 }
 0x136   : > { %v16090_v50 = vpop.f32.mrf.mxu1  ;;  %14153 = vmatmul.mubr.msk.f32.gmra.mxu1 %vm232_vm1, %v14829_v51  ;;  %14141 = vmatprep.mubr.msk.f32.mxu0 %vm232_vm1, %v14830_v59  ;;  %v2424_v18 = vadd.f32 %v13804_v9, %v2250_v5  ;;  %v2595_v32 = vadd.f32 %v16078_v39, %v2421_v44  ;;  %v14835_v9 = vld [vmem:[%s15109_s25 + $0xc8] ss:$8 sps:$4 sm:$0xff]   ;;  %v14836_v39 = vld [vmem:[%s15109_s25 + $0xd9] ss:$8 sps:$4 sm:$0xff]  }
 0x137   : > { %v2392_v15 = vpop.f32.mrf.mxu0  ;;  %14155 = vmatprep.mubr.msk.f32.mxu1 %vm232_vm1, %v14831_v31 }
 0x138   : > { %v16098_v47 = vpop.f32.mrf.mxu1  ;;  %v2423_v53 = vadd.f32 %v2392_v15, %v2249_v27  ;;  %v2598_v57 = vadd.f32 %v16090_v50, %v2424_v18  ;;  %v14839_v50 = vld [vmem:[%s15109_s25 + $0x30] ss:$8 sps:$4 sm:$0xff]  }
 0x139   : > { %v16106_v49 = vpop.f32.mrf.mxu0  ;;  %14142 = vmatmul.mubr.msk.f32.gmra.mxu0 %vm232_vm1, %v14832_v7  ;;  %v14846_v18 = vld [vmem:[%s15109_s25 + $0x91] ss:$8 sps:$4 sm:$0xff]  }
 0x13a   : > { %v16112_v8 = vpop.f32.mrf.mxu1  ;;  %14156 = vmatmul.mubr.msk.f32.gmra.mxu1 %vm232_vm1, %v14833_v35  ;;  %14144 = vmatprep.mubr.msk.f32.mxu0 %vm232_vm1, %v14834_v3  ;;  %v2426_v46 = vadd.f32 %v16106_v49, %v2252_v11  ;;  %v2597_v21 = vadd.f32 %v16098_v47, %v2423_v53  ;;  %v12435_v49 = vld [vmem:[%s17277_s1 + $0xa4] sm:$0xf] }
 0x13b   : > { %v2402_v33 = vpop.f32.mrf.mxu0  ;;  %14158 = vmatprep.mubr.msk.f32.mxu1 %vm232_vm1, %v14835_v9  ;;  %14189 = vmatprep.subr.msk.mxu0 %vm249_vm0, %v12435_v49 }
 0x13c   : > { %v16123_v34 = vpop.f32.mrf.mxu1  ;;  %v2425_v15 = vadd.f32 %v2402_v33, %v2251_v0  ;;  %v2600_v23 = vadd.f32 %v16112_v8, %v2426_v46  ;;  %v14842_v8 = vld [vmem:[%s15109_s25 + $0x61] ss:$8 sps:$4 sm:$0xff]  }
 0x13d   : > { %v16130_v40 = vpop.f32.mrf.mxu0  ;;  %14145 = vmatmul.mubr.msk.f32.gmra.mxu0 %vm232_vm1, %v14836_v39  ;;  %v14850_v0 = vld [vmem:[%s15109_s25 + $0xc1] ss:$8 sps:$4 sm:$0xff]  }
 0x13e   : > { %v16136_v22 = vpop.f32.mrf.mxu1  ;;  %14159 = vmatmul.mubr.msk.f32.gmra.mxu1 %vm232_vm1, %v14837_v45  ;;  %14163 = vmatprep.mubr.msk.f32.mxu0 %vm232_vm1, %v14838_v42  ;;  %v2428_v33 = vadd.f32 %v16130_v40, %v2254_v4  ;;  %v2599_v1 = vadd.f32 %v16123_v34, %v2425_v15  ;;  %v14851_v39 = vld [vmem:[%s15109_s25 + $0xc0] ss:$8 sps:$4 sm:$0xff]   ;;  %v14853_v45 = vld [vmem:[%s15109_s25 + $0xd0] ss:$8 sps:$4 sm:$0xff]  }
 0x13f   : > { %v16142_v26 = vpop.f32.mrf.mxu0  ;;  %14177 = vmatprep.mubr.msk.f32.mxu1 %vm232_vm1, %v14839_v50 }
 0x140   : > { %v16147_v56 = vpop.f32.mrf.mxu1  ;;  %v2427_v51 = vadd.f32 %v16142_v26, %v2253_v58  ;;  %v2602_v26 = vadd.f32 %v16136_v22, %v2428_v33  ;;  %v14847_v22 = vld [vmem:[%s15109_s25 + $0x90] ss:$8 sps:$4 sm:$0xff]   ;;  %v12496_v58 = vld [vmem:[%s17277_s1 + $0xac] sm:$0xf] }
 0x141   : > { %v13829_v61 = vpop.f32.mrf.mxu0  ;;  %14164 = vmatmul.mubr.msk.f32.vlgmr.msra.gmra.mxu0 %vm232_vm1, %v14840_v16 }
 0x142   : > { %v2770_v37 = vadd.f32 %v13829_v61, %v2596_v29  ;;  %v13843_v2 = vpop.f32.mrf.mxu1  ;;  %14178 = vmatmul.mubr.msk.f32.vlgmr.msra.gmra.mxu1 %vm232_vm1, %v14841_v54  ;;  %14190 = vmatpush3.msk.msra.mxu0 %vm249_vm0, %v12435_v49  ;;  %v2601_v61 = vadd.f32 %v16147_v56, %v2427_v51  ;;  %v14849_v56 = vld [vmem:[%s15109_s25 + $0xa0] ss:$8 sps:$4 sm:$0xff]  }
 0x143   : > { %v2730_v13 = vpop.f32.mrf.mxu0  ;;  %14204 = vmatpush3.msk.msra.mxu1 %vm249_vm0, %v12418_v19  ;;  %14166 = vmatprep.mubr.msk.f32.mxu0 %vm232_vm1, %v14842_v8  ;;  %v14856_v49 = vld [vmem:[%s15109_s25 + $0x79] ss:$8 sps:$4 sm:$0xff]   ;;  %v14860_v54 = vld [vmem:[%s15109_s25 + $0xa9] ss:$8 sps:$4 sm:$0xff]  }
 0x144   : > { %v2944_v43 = vadd.f32 %v13843_v2, %v2770_v37  ;;  %v2769_v6 = vadd.f32 %v2730_v13, %v2595_v32  ;;  %v2904_v12 = vpop.f32.mrf.mxu1  ;;  %14180 = vmatprep.mubr.msk.f32.mxu1 %vm232_vm1, %v14843_v25  ;;  %v14848_v2 = vld [vmem:[%s15109_s25 + $0xa1] ss:$8 sps:$4 sm:$0xff]   ;;  %14231 = vmatprep.subr.msk.mxu1 %vm249_vm0, %v12496_v58 }
 0x145   : > { %v13832_v28 = vpop.f32.mrf.mxu0  ;;  %14167 = vmatmul.mubr.msk.f32.gmra.mxu0 %vm232_vm1, %v14844_v63  ;;  %v14863_v51 = vld [vmem:[%s15109_s25 + $0xca] ss:$8 sps:$4 sm:$0xff]  }
 0x146   : > { %v2952_v52 = vadd.f32 %v15856_v20, %v2944_v43  ;;  %v2943_v48 = vadd.f32 %v2904_v12, %v2769_v6  ;;  %v2772_v10 = vadd.f32 %v13832_v28, %v2598_v57  ;;  %v13846_v14 = vpop.f32.mrf.mxu1  ;;  %14181 = vmatmul.mubr.msk.f32.gmra.mxu1 %vm232_vm1, %v14845_v30  ;;  %14169 = vmatprep.mubr.msk.f32.mxu0 %vm232_vm1, %v14846_v18  ;;  %v14852_v57 = vld [vmem:[%s15109_s25 + $0xd1] ss:$8 sps:$4 sm:$0xff]  }
 0x147   : > { %v2740_v62 = vpop.f32.mrf.mxu0  ;;  %14183 = vmatprep.mubr.msk.f32.mxu1 %vm232_vm1, %v14847_v22  ;;  %v14855_v28 = vld [vmem:[%s15109_s25 + $0x6a] ss:$8 sps:$4 sm:$0xff]  }
 0x148   : > { %11747 = vst.msk [vmem:[%s15864_s13 + $0x48] sm:$0xff] %vm1566_vm2, %v2952_v52  ;;  %v2951_v47 = vadd.f32 %v15856_v20, %v2943_v48  ;;  %v2946_v55 = vadd.f32 %v13846_v14, %v2772_v10  ;;  %v2771_v38 = vadd.f32 %v2740_v62, %v2597_v21  ;;  %v2914_v24 = vpop.f32.mrf.mxu1  ;;  %v14854_v52 = vld [vmem:[%s15109_s25 + $0x69] ss:$8 sps:$4 sm:$0xff]   ;;  %v14857_v14 = vld [vmem:[%s15109_s25 + $0x7a] ss:$8 sps:$4 sm:$0xff]  }
 0x149   : > { %v13835_v40 = vpop.f32.mrf.mxu0  ;;  %14170 = vmatmul.mubr.msk.f32.gmra.mxu0 %vm232_vm1, %v14848_v2  ;;  %v12470_v21 = vld [vmem:[%s17277_s1 + $0xa8] sm:$0xf]  ;;  %v12522_v18 = vld [vmem:[%s17277_s1 + $0xb0] sm:$0xf] }
 0x14a   : > { %11746 = vst.msk [vmem:[%s15864_s13 + $0x40] sm:$0xff] %vm1566_vm2, %v2951_v47  ;;  %v2954_v34 = vadd.f32 %v15856_v20, %v2946_v55  ;;  %v2945_v44 = vadd.f32 %v2914_v24, %v2771_v38  ;;  %v2774_v59 = vadd.f32 %v13835_v40, %v2600_v23  ;;  %v13849_v5 = vpop.f32.mrf.mxu1  ;;  %14184 = vmatmul.mubr.msk.f32.gmra.mxu1 %vm232_vm1, %v14849_v56  ;;  %v14858_v47 = vld [vmem:[%s15109_s25 + $0x99] ss:$8 sps:$4 sm:$0xff]   ;;  %v14861_v55 = vld [vmem:[%s15109_s25 + $0xaa] ss:$8 sps:$4 sm:$0xff]  }
 0x14b   : > { %v2750_v31 = vpop.f32.mrf.mxu0  ;;  %14172 = vmatprep.mubr.msk.f32.mxu0 %vm232_vm1, %v14850_v0  ;;  %14186 = vmatprep.mubr.msk.f32.mxu1 %vm232_vm1, %v14851_v39  ;;  %v14859_v23 = vld [vmem:[%s15109_s25 + $0x9a] ss:$8 sps:$4 sm:$0xff]   ;;  %v14862_v24 = vld [vmem:[%s15109_s25 + $0xc9] ss:$8 sps:$4 sm:$0xff]  }
 0x14c   : > { %11749 = vst.msk [vmem:[%s15864_s13 + $0x58] sm:$0xff] %vm1566_vm2, %v2954_v34  ;;  %v2953_v29 = vadd.f32 %v15856_v20, %v2945_v44  ;;  %v2948_v7 = vadd.f32 %v13849_v5, %v2774_v59  ;;  %v2773_v60 = vadd.f32 %v2750_v31, %v2599_v1  ;;  %v2924_v27 = vpop.f32.mrf.mxu1  ;;  %14217 = vmatprep.subr.msk.mxu0 %vm249_vm0, %v12470_v21  ;;  %v14864_v40 = vld [vmem:[%s15109_s25 + $0xd9] ss:$8 sps:$4 sm:$0xff]   ;;  %v14868_v31 = vld [vmem:[%s15109_s25 + $0x109] ss:$8 sps:$4 sm:$0xff]  }
 0x14d   : > { %v13838_v35 = vpop.f32.mrf.mxu0  ;;  %14173 = vmatmul.mubr.msk.f32.gmra.mxu0 %vm232_vm1, %v14852_v57  ;;  %v14865_v34 = vld [vmem:[%s15109_s25 + $0xda] ss:$8 sps:$4 sm:$0xff]   ;;  %v14869_v30 = vld [vmem:[%s15109_s25 + $0x10a] ss:$8 sps:$4 sm:$0xff]  }
 0x14e   : > { %11748 = vst.msk [vmem:[%s15864_s13 + $0x50] sm:$0xff] %vm1566_vm2, %v2953_v29  ;;  %v2956_v36 = vadd.f32 %v15856_v20, %v2948_v7  ;;  %v2947_v32 = vadd.f32 %v2924_v27, %v2773_v60  ;;  %v2776_v3 = vadd.f32 %v13838_v35, %v2602_v26  ;;  %v13852_v37 = vpop.f32.mrf.mxu1  ;;  %14187 = vmatmul.mubr.msk.f32.gmra.mxu1 %vm232_vm1, %v14853_v45  ;;  %v14866_v44 = vld [vmem:[%s15109_s25 + $0xf9] ss:$8 sps:$4 sm:$0xff]  }
 0x14f   : > { %v2760_v11 = vpop.f32.mrf.mxu0  ;;  %14191 = vmatprep.mubr.msk.f32.mxu0 %vm232_vm1, %v14854_v52  ;;  %14205 = vmatprep.mubr.msk.f32.mxu1 %vm232_vm1, %v14855_v28  ;;  %v14867_v5 = vld [vmem:[%s15109_s25 + $0xfa] ss:$8 sps:$4 sm:$0xff]  }
 0x150   : > { %11751 = vst.msk [vmem:[%s15864_s13 + $0x68] sm:$0xff] %vm1566_vm2, %v2956_v36  ;;  %v2955_v41 = vadd.f32 %v15856_v20, %v2947_v32  ;;  %v2950_v53 = vadd.f32 %v13852_v37, %v2776_v3  ;;  %v2775_v9 = vadd.f32 %v2760_v11, %v2601_v61  ;;  %v2934_v13 = vpop.f32.mrf.mxu1  ;;  %v16241_v20 = vld [vmem:[%s17278_s2] ss:$0 sm:$0xff]  ;;  %v14870_v7 = vld [vmem:[%s15109_s25 + $0x62] ss:$8 sps:$4 sm:$0xff]  }
 0x151   : > { %v16232_v17 = vpop.f32.mrf.mxu0  ;;  %14192 = vmatmul.mubr.msk.f32.vlgmr.msra.gmra.mxu0 %vm232_vm1, %v14856_v49  ;;  %v14871_v27 = vld [vmem:[%s15109_s25 + $0x61] ss:$8 sps:$4 sm:$0xff]   ;;  %v14872_v61 = vld [vmem:[%s15109_s25 + $0x72] ss:$8 sps:$4 sm:$0xff]  }
 0x152   : > { %11750 = vst.msk [vmem:[%s15864_s13 + $0x60] sm:$0xff] %vm1566_vm2, %v2955_v41  ;;  %v2958_v43 = vadd.f32 %v16241_v20, %v2950_v53  ;;  %v2949_v6 = vadd.f32 %v2934_v13, %v2775_v9  ;;  %v16244_v12 = vpop.f32.mrf.mxu1  ;;  %14206 = vmatmul.mubr.msk.f32.vlgmr.msra.gmra.mxu1 %vm232_vm1, %v14857_v14  ;;  %14218 = vmatpush3.msk.msra.mxu0 %vm249_vm0, %v12470_v21  ;;  %v14873_v36 = vld [vmem:[%s15109_s25 + $0x71] ss:$8 sps:$4 sm:$0xff]   ;;  %v14876_v53 = vld [vmem:[%s15109_s25 + $0xa2] ss:$8 sps:$4 sm:$0xff]  }
 0x153   : > { %v16248_v46 = vpop.f32.mrf.mxu0  ;;  %14232 = vmatpush3.msk.msra.mxu1 %vm249_vm0, %v12496_v58  ;;  %14194 = vmatprep.mubr.msk.f32.mxu0 %vm232_vm1, %v14858_v47  ;;  %v12548_v3 = vld [vmem:[%s17277_s1 + $0xb4] sm:$0xf]  ;;  %v14877_v13 = vld [vmem:[%s15109_s25 + $0xa1] ss:$8 sps:$4 sm:$0xff]  }
 0x154   : > { %11753 = vst.msk [vmem:[%s15864_s13 + $0x78] sm:$0xff] %vm1566_vm2, %v2958_v43  ;;  %v2957_v15 = vadd.f32 %v16241_v20, %v2949_v6  ;;  %v16255_v42 = vpop.f32.mrf.mxu1  ;;  %14208 = vmatprep.mubr.msk.f32.mxu1 %vm232_vm1, %v14859_v23  ;;  %14245 = vmatprep.subr.msk.mxu0 %vm249_vm0, %v12522_v18  ;;  %v14874_v2 = vld [vmem:[%s15109_s25 + $0x92] ss:$8 sps:$4 sm:$0xff]   ;;  %v14878_v39 = vld [vmem:[%s15109_s25 + $0xc2] ss:$8 sps:$4 sm:$0xff]  }
 0x155   : > { %v16259_v48 = vpop.f32.mrf.mxu0  ;;  %14195 = vmatmul.mubr.msk.f32.gmra.mxu0 %vm232_vm1, %v14860_v54  ;;  %14259 = vmatprep.subr.msk.mxu1 %vm249_vm0, %v12548_v3  ;;  %v14875_v56 = vld [vmem:[%s15109_s25 + $0x91] ss:$8 sps:$4 sm:$0xff]   ;;  %v14879_v6 = vld [vmem:[%s15109_s25 + $0xc1] ss:$8 sps:$4 sm:$0xff]   ;;  %v3268_v54 = vadd.f32 %v16244_v12, %v16232_v17 }
 0x156   : > { %11752 = vst.msk [vmem:[%s15864_s13 + $0x70] sm:$0xff] %vm1566_vm2, %v2957_v15  ;;  %v16265_v4 = vpop.f32.mrf.mxu1  ;;  %14209 = vmatmul.mubr.msk.f32.gmra.mxu1 %vm232_vm1, %v14861_v55  ;;  %14197 = vmatprep.mubr.msk.f32.mxu0 %vm232_vm1, %v14862_v24  ;;  %v14880_v45 = vld [vmem:[%s15109_s25 + $0xd2] ss:$8 sps:$4 sm:$0xff]   ;;  %v14884_v47 = vld [vmem:[%s15109_s25 + $0x102] ss:$8 sps:$4 sm:$0xff]  }
 0x157   : > { %v16271_v50 = vpop.f32.mrf.mxu0  ;;  %14211 = vmatprep.mubr.msk.f32.mxu1 %vm232_vm1, %v14863_v51  ;;  %v14881_v52 = vld [vmem:[%s15109_s25 + $0xd1] ss:$8 sps:$4 sm:$0xff]   ;;  %v14885_v55 = vld [vmem:[%s15109_s25 + $0x101] ss:$8 sps:$4 sm:$0xff]  }
 0x158   : > { %v16276_v10 = vpop.f32.mrf.mxu1  ;;  %v14882_v21 = vld [vmem:[%s15109_s25 + $0xf2] ss:$8 sps:$4 sm:$0xff]  }
 0x159   : > { %v16282_v16 = vpop.f32.mrf.mxu0  ;;  %14198 = vmatmul.mubr.msk.f32.gmra.mxu0 %vm232_vm1, %v14864_v40  ;;  %v14883_v14 = vld [vmem:[%s15109_s25 + $0xf1] ss:$8 sps:$4 sm:$0xff]   ;;  %v3263_v40 = vadd.f32 %v16255_v42, %v16248_v46  ;;  %v3278_v46 = vadd.f32 %v16265_v4, %v16259_v48  ;;  %v3273_v48 = vadd.f32 %v16276_v10, %v16271_v50 }
 0x15a   : > { %v16287_v62 = vpop.f32.mrf.mxu1  ;;  %14212 = vmatmul.mubr.msk.f32.gmra.mxu1 %vm232_vm1, %v14865_v34  ;;  %14200 = vmatprep.mubr.msk.f32.mxu0 %vm232_vm1, %v14866_v44  ;;  %v14886_v24 = vld [vmem:[%s15109_s25 + $0x3a] ss:$8 sps:$4 sm:$0xff]  }
 0x15b   : > { %v16292_v33 = vpop.f32.mrf.mxu0  ;;  %14214 = vmatprep.mubr.msk.f32.mxu1 %vm232_vm1, %v14867_v5  ;;  %v14887_v44 = vld [vmem:[%s15109_s25 + $0x39] ss:$8 sps:$4 sm:$0xff]   ;;  %v14888_v5 = vld [vmem:[%s15109_s25 + $0x4a] ss:$8 sps:$4 sm:$0xff]  }
 0x15c   : > { %v16297_v19 = vpop.f32.mrf.mxu1  ;;  %v12574_v17 = vld [vmem:[%s17277_s1 + $0xb8] sm:$0xf] }
 0x15d   : > { %v16301_v38 = vpop.f32.mrf.mxu0  ;;  %14201 = vmatmul.mubr.msk.f32.gmra.mxu0 %vm232_vm1, %v14868_v31  ;;  %v14892_v50 = vld [vmem:[%s15109_s25 + $0x7a] ss:$8 sps:$4 sm:$0xff]  }
 0x15e   : > { %v16305_v1 = vpop.f32.mrf.mxu1  ;;  %14215 = vmatmul.mubr.msk.f32.gmra.mxu1 %vm232_vm1, %v14869_v30  ;;  %14219 = vmatprep.mubr.msk.f32.mxu0 %vm232_vm1, %v14870_v7  ;;  %v12600_v30 = vld [vmem:[%s17277_s1 + $0xbc] sm:$0xf] }
 0x15f   : > { %v16309_v8 = vpop.f32.mrf.mxu0  ;;  %14233 = vmatprep.mubr.msk.f32.mxu1 %vm232_vm1, %v14871_v27  ;;  %v14890_v27 = vld [vmem:[%s15109_s25 + $0x6a] ss:$8 sps:$4 sm:$0xff]  }
 0x160   : > { %v16313_v25 = vpop.f32.mrf.mxu1 }
 0x161   : > { %v16319_v59 = vpop.f32.mrf.mxu0  ;;  %14220 = vmatmul.mubr.msk.f32.vlgmr.msra.gmra.mxu0 %vm232_vm1, %v14872_v61  ;;  %v14891_v61 = vld [vmem:[%s15109_s25 + $0x69] ss:$8 sps:$4 sm:$0xff]  }
 0x162   : > { %v16323_v63 = vpop.f32.mrf.mxu1  ;;  %14234 = vmatmul.mubr.msk.f32.vlgmr.msra.gmra.mxu1 %vm232_vm1, %v14873_v36  ;;  %14246 = vmatpush3.msk.msra.mxu0 %vm249_vm0, %v12522_v18  ;;  %v3468_v34 = vadd.f32 %v16319_v59, %v3268_v54  ;;  %v14889_v59 = vld [vmem:[%s15109_s25 + $0x49] ss:$8 sps:$4 sm:$0xff]  }
 0x163   : > { %v16327_v26 = vpop.f32.mrf.mxu0  ;;  %14260 = vmatpush3.msk.msra.mxu1 %vm249_vm0, %v12548_v3  ;;  %14222 = vmatprep.mubr.msk.f32.mxu0 %vm232_vm1, %v14874_v2  ;;  %v3288_v3 = vadd.f32 %v16287_v62, %v16282_v16  ;;  %v3283_v16 = vadd.f32 %v16297_v19, %v16292_v33  ;;  %v14896_v19 = vld [vmem:[%s15109_s25 + $0xaa] ss:$8 sps:$4 sm:$0xff]  }
 0x164   : > { %v16331_v29 = vpop.f32.mrf.mxu1  ;;  %14236 = vmatprep.mubr.msk.f32.mxu1 %vm232_vm1, %v14875_v56  ;;  %14273 = vmatprep.subr.msk.mxu0 %vm249_vm0, %v12574_v17  ;;  %v3467_v42 = vadd.f32 %v16327_v26, %v3263_v40  ;;  %v3642_v4 = vadd.f32 %v16323_v63, %v3468_v34  ;;  %v14893_v56 = vld [vmem:[%s15109_s25 + $0x79] ss:$8 sps:$4 sm:$0xff]  }
 0x165   : > { %v16335_v60 = vpop.f32.mrf.mxu0  ;;  %14223 = vmatmul.mubr.msk.f32.gmra.mxu0 %vm232_vm1, %v14876_v53  ;;  %14287 = vmatprep.subr.msk.mxu1 %vm249_vm0, %v12600_v30 }
 0x166   : > { %v16342_v35 = vpop.f32.mrf.mxu1  ;;  %14237 = vmatmul.mubr.msk.f32.gmra.mxu1 %vm232_vm1, %v14877_v13  ;;  %14225 = vmatprep.mubr.msk.f32.mxu0 %vm232_vm1, %v14878_v39  ;;  %v3470_v26 = vadd.f32 %v16335_v60, %v3278_v46  ;;  %v3641_v63 = vadd.f32 %v16331_v29, %v3467_v42  ;;  %v14894_v13 = vld [vmem:[%s15109_s25 + $0x9a] ss:$8 sps:$4 sm:$0xff]  }
 0x167   : > { %v16347_v22 = vpop.f32.mrf.mxu0  ;;  %14239 = vmatprep.mubr.msk.f32.mxu1 %vm232_vm1, %v14879_v6  ;;  %v14895_v6 = vld [vmem:[%s15109_s25 + $0x99] ss:$8 sps:$4 sm:$0xff]  }
 0x168   : > { %v16351_v32 = vpop.f32.mrf.mxu1  ;;  %v3469_v60 = vadd.f32 %v16347_v22, %v3273_v48  ;;  %v3644_v29 = vadd.f32 %v16342_v35, %v3470_v26 }
 0x169   : > { %v16357_v37 = vpop.f32.mrf.mxu0  ;;  %14226 = vmatmul.mubr.msk.f32.gmra.mxu0 %vm232_vm1, %v14880_v45 }
 0x16a   : > { %v16362_v11 = vpop.f32.mrf.mxu1  ;;  %14240 = vmatmul.mubr.msk.f32.gmra.mxu1 %vm232_vm1, %v14881_v52  ;;  %14228 = vmatprep.mubr.msk.f32.mxu0 %vm232_vm1, %v14882_v21  ;;  %v3472_v62 = vadd.f32 %v16357_v37, %v3288_v3  ;;  %v3298_v52 = vadd.f32 %v16305_v1, %v16301_v38  ;;  %v3293_v38 = vadd.f32 %v16313_v25, %v16309_v8 }
 0x16b   : > { %v16366_v41 = vpop.f32.mrf.mxu0  ;;  %14242 = vmatprep.mubr.msk.f32.mxu1 %vm232_vm1, %v14883_v14  ;;  %v14897_v14 = vld [vmem:[%s15109_s25 + $0xa9] ss:$8 sps:$4 sm:$0xff]  }
 0x16c   : > { %v16371_v9 = vpop.f32.mrf.mxu1  ;;  %v3471_v33 = vadd.f32 %v16366_v41, %v3283_v16  ;;  %v3646_v1 = vadd.f32 %v16362_v11, %v3472_v62  ;;  %v14906_v16 = vld [vmem:[%s15109_s25 + $0x62] ss:$8 sps:$4 sm:$0xff]  }
 0x16d   : > { %v16375_v0 = vpop.f32.mrf.mxu0  ;;  %14229 = vmatmul.mubr.msk.f32.gmra.mxu0 %vm232_vm1, %v14884_v47  ;;  %v14898_v47 = vld [vmem:[%s15109_s25 + $0xca] ss:$8 sps:$4 sm:$0xff]  }
 0x16e   : > { %v16379_v43 = vpop.f32.mrf.mxu1  ;;  %14243 = vmatmul.mubr.msk.f32.gmra.mxu1 %vm232_vm1, %v14885_v55  ;;  %14247 = vmatprep.mubr.msk.f32.mxu0 %vm232_vm1, %v14886_v24  ;;  %v3474_v41 = vadd.f32 %v16375_v0, %v3298_v52  ;;  %v14899_v55 = vld [vmem:[%s15109_s25 + $0xc9] ss:$8 sps:$4 sm:$0xff]   ;;  %v3645_v8 = vadd.f32 %v16371_v9, %v3471_v33  ;;  %v14900_v0 = vld [vmem:[%s15109_s25 + $0xda] ss:$8 sps:$4 sm:$0xff]  }
 0x16f   : > { %v16383_v57 = vpop.f32.mrf.mxu0  ;;  %14261 = vmatprep.mubr.msk.f32.mxu1 %vm232_vm1, %v14887_v44  ;;  %v14902_v9 = vld [vmem:[%s15109_s25 + $0x32] ss:$8 sps:$4 sm:$0xff]  }
 0x170   : > { %v16387_v15 = vpop.f32.mrf.mxu1  ;;  %v3473_v25 = vadd.f32 %v16383_v57, %v3293_v38  ;;  %v14908_v52 = vld [vmem:[%s15109_s25 + $0x72] ss:$8 sps:$4 sm:$0xff]  }
 0x171   : > { %v13913_v28 = vpop.f32.mrf.mxu0  ;;  %14248 = vmatmul.mubr.msk.f32.vlgmr.msra.gmra.mxu0 %vm232_vm1, %v14888_v5 }
 0x172   : > { %v16393_v49 = vpop.f32.mrf.mxu1  ;;  %14262 = vmatmul.mubr.msk.f32.vlgmr.msra.gmra.mxu1 %vm232_vm1, %v14889_v59  ;;  %14274 = vmatpush3.msk.msra.mxu0 %vm249_vm0, %v12574_v17  ;;  %v3817_v2 = vadd.f32 %v13913_v28, %v3642_v4  ;;  %v3643_v28 = vadd.f32 %v16351_v32, %v3469_v60  ;;  %v3647_v48 = vadd.f32 %v16387_v15, %v3473_v25  ;;  %v14904_v15 = vld [vmem:[%s15109_s25 + $0x42] ss:$8 sps:$4 sm:$0xff]  }
 0x173   : > { %v3777_v58 = vpop.f32.mrf.mxu0  ;;  %14288 = vmatpush3.msk.msra.mxu1 %vm249_vm0, %v12600_v30  ;;  %14250 = vmatprep.mubr.msk.f32.mxu0 %vm232_vm1, %v14890_v27  ;;  %v14905_v60 = vld [vmem:[%s15109_s25 + $0x41] ss:$8 sps:$4 sm:$0xff]  }
 0x174   : > { %v16399_v23 = vpop.f32.mrf.mxu1  ;;  %14264 = vmatprep.mubr.msk.f32.mxu1 %vm232_vm1, %v14891_v61  ;;  %v3816_v22 = vadd.f32 %v3777_v58, %v3641_v63  ;;  %v3991_v35 = vadd.f32 %v16393_v49, %v3817_v2  ;;  %v12634_v2 = vld [vmem:[%s17277_s1 + $0xc0] sm:$0xf] }
 0x175   : > { %v13916_v51 = vpop.f32.mrf.mxu0  ;;  %14251 = vmatmul.mubr.msk.f32.gmra.mxu0 %vm232_vm1, %v14892_v50  ;;  %14315 = vmatprep.subr.msk.mxu1 %vm249_vm0, %v12634_v2  ;;  %v14914_v25 = vld [vmem:[%s15109_s25 + $0xc2] ss:$8 sps:$4 sm:$0xff]  }
 0x176   : > { %v16415_v12 = vpop.f32.mrf.mxu1  ;;  %14265 = vmatmul.mubr.msk.f32.gmra.mxu1 %vm232_vm1, %v14893_v56  ;;  %14253 = vmatprep.mubr.msk.f32.mxu0 %vm232_vm1, %v14894_v13  ;;  %v3819_v21 = vadd.f32 %v13916_v51, %v3644_v29  ;;  %v3990_v49 = vadd.f32 %v16399_v23, %v3816_v22  ;;  %v14901_v23 = vld [vmem:[%s15109_s25 + $0xd9] ss:$8 sps:$4 sm:$0xff]  }
 0x177   : > { %v3787_v31 = vpop.f32.mrf.mxu0  ;;  %14267 = vmatprep.mubr.msk.f32.mxu1 %vm232_vm1, %v14895_v6  ;;  %v14907_v22 = vld [vmem:[%s15109_s25 + $0x61] ss:$8 sps:$4 sm:$0xff]  }
 0x178   : > { %v16428_v7 = vpop.f32.mrf.mxu1  ;;  %v3818_v54 = vadd.f32 %v3787_v31, %v3643_v28  ;;  %v3993_v34 = vadd.f32 %v16415_v12, %v3819_v21  ;;  %v3648_v31 = vadd.f32 %v16379_v43, %v3474_v41  ;;  %v14903_v12 = vld [vmem:[%s15109_s25 + $0x31] ss:$8 sps:$4 sm:$0xff]  }
 0x179   : > { %v13919_v18 = vpop.f32.mrf.mxu0  ;;  %14254 = vmatmul.mubr.msk.f32.gmra.mxu0 %vm232_vm1, %v14896_v19  ;;  %v14909_v28 = vld [vmem:[%s15109_s25 + $0x71] ss:$8 sps:$4 sm:$0xff]  }
 0x17a   : > { %v16440_v36 = vpop.f32.mrf.mxu1  ;;  %14268 = vmatmul.mubr.msk.f32.gmra.mxu1 %vm232_vm1, %v14897_v14  ;;  %v3821_v11 = vadd.f32 %v13919_v18, %v3646_v1  ;;  %14256 = vmatprep.mubr.msk.f32.mxu0 %vm232_vm1, %v14898_v47  ;;  %v3992_v42 = vadd.f32 %v16428_v7, %v3818_v54  ;;  %v12651_v7 = vld [vmem:[%s17277_s1 + $0xc4] sm:$0xf]  ;;  %v14910_v14 = vld [vmem:[%s15109_s25 + $0x92] ss:$8 sps:$4 sm:$0xff]  }
 0x17b   : > { %v3797_v10 = vpop.f32.mrf.mxu0  ;;  %14270 = vmatprep.mubr.msk.f32.mxu1 %vm232_vm1, %v14899_v55  ;;  %14301 = vmatprep.subr.msk.mxu0 %vm249_vm0, %v12651_v7 }
 0x17c   : > { %v16451_v53 = vpop.f32.mrf.mxu1  ;;  %v3820_v46 = vadd.f32 %v3797_v10, %v3645_v8  ;;  %v3995_v43 = vadd.f32 %v16440_v36, %v3821_v11  ;;  %v14913_v8 = vld [vmem:[%s15109_s25 + $0xa1] ss:$8 sps:$4 sm:$0xff]  }
 0x17d   : > { %v13922_v39 = vpop.f32.mrf.mxu0  ;;  %14257 = vmatmul.mubr.msk.f32.gmra.mxu0 %vm232_vm1, %v14900_v0 }
 0x17e   : > { %v16461_v45 = vpop.f32.mrf.mxu1  ;;  %14271 = vmatmul.mubr.msk.f32.gmra.mxu1 %vm232_vm1, %v14901_v23  ;;  %v3823_v4 = vadd.f32 %v13922_v39, %v3648_v31  ;;  %14275 = vmatprep.mubr.msk.f32.mxu0 %vm232_vm1, %v14902_v9  ;;  %v3994_v10 = vadd.f32 %v16451_v53, %v3820_v46  ;;  %v14917_v31 = vld [vmem:[%s15109_s25 + $0xd1] ss:$8 sps:$4 sm:$0xff]  }
 0x17f   : > { %v3807_v37 = vpop.f32.mrf.mxu0  ;;  %14289 = vmatprep.mubr.msk.f32.mxu1 %vm232_vm1, %v14903_v12  ;;  %v14918_v9 = vld [vmem:[%s15109_s25 + $0x70] ss:$8 sps:$4 sm:$0xff]  }
 0x180   : > { %v16472_v58 = vpop.f32.mrf.mxu1  ;;  %v3822_v63 = vadd.f32 %v3807_v37, %v3647_v48  ;;  %v3997_v29 = vadd.f32 %v16461_v45, %v3823_v4  ;;  %v12712_v48 = vld [vmem:[%s17277_s1 + $0xcc] sm:$0xf]  ;;  %v14922_v4 = vld [vmem:[%s15109_s25 + $0xa0] ss:$8 sps:$4 sm:$0xff]  }
 0x181   : > { %v13941_v32 = vpop.f32.mrf.mxu0  ;;  %14276 = vmatmul.mubr.msk.f32.vlgmr.msra.gmra.mxu0 %vm232_vm1, %v14904_v15 }
 0x182   : > { %v4165_v24 = vadd.f32 %v13941_v32, %v3991_v35  ;;  %v13955_v51 = vpop.f32.mrf.mxu1  ;;  %14290 = vmatmul.mubr.msk.f32.vlgmr.msra.gmra.mxu1 %vm232_vm1, %v14905_v60  ;;  %14302 = vmatpush3.msk.msra.mxu0 %vm249_vm0, %v12651_v7  ;;  %v3996_v21 = vadd.f32 %v16472_v58, %v3822_v63  ;;  %v14911_v32 = vld [vmem:[%s15109_s25 + $0x91] ss:$8 sps:$4 sm:$0xff]   ;;  %v14912_v58 = vld [vmem:[%s15109_s25 + $0xa2] ss:$8 sps:$4 sm:$0xff]  }
 0x183   : > { %v4125_v40 = vpop.f32.mrf.mxu0  ;;  %14316 = vmatpush3.msk.msra.mxu1 %vm249_vm0, %v12634_v2  ;;  %14278 = vmatprep.mubr.msk.f32.mxu0 %vm232_vm1, %v14906_v16  ;;  %v14927_v60 = vld [vmem:[%s15109_s25 + $0xd1] ss:$8 sps:$4 sm:$0xff]  }
 0x184   : > { %v4339_v44 = vadd.f32 %v13955_v51, %v4165_v24  ;;  %v4164_v17 = vadd.f32 %v4125_v40, %v3990_v49  ;;  %v4299_v5 = vpop.f32.mrf.mxu1  ;;  %14292 = vmatprep.mubr.msk.f32.mxu1 %vm232_vm1, %v14907_v22  ;;  %14343 = vmatprep.subr.msk.mxu1 %vm249_vm0, %v12712_v48 }
 0x185   : > { %v13944_v57 = vpop.f32.mrf.mxu0  ;;  %14279 = vmatmul.mubr.msk.f32.gmra.mxu0 %vm232_vm1, %v14908_v52 }
 0x186   : > { %v4347_v59 = vadd.f32 %v16241_v20, %v4339_v44  ;;  %v4338_v30 = vadd.f32 %v4299_v5, %v4164_v17  ;;  %v4167_v27 = vadd.f32 %v13944_v57, %v3993_v34  ;;  %v13958_v18 = vpop.f32.mrf.mxu1  ;;  %14293 = vmatmul.mubr.msk.f32.gmra.mxu1 %vm232_vm1, %v14909_v28  ;;  %14281 = vmatprep.mubr.msk.f32.mxu0 %vm232_vm1, %v14910_v14  ;;  %v14915_v34 = vld [vmem:[%s15109_s25 + $0xc1] ss:$8 sps:$4 sm:$0xff]   ;;  %v14916_v44 = vld [vmem:[%s15109_s25 + $0xd2] ss:$8 sps:$4 sm:$0xff]  }
 0x187   : > { %v4135_v26 = vpop.f32.mrf.mxu0  ;;  %14295 = vmatprep.mubr.msk.f32.mxu1 %vm232_vm1, %v14911_v32  ;;  %v12738_v28 = vld [vmem:[%s17277_s1 + $0xd0] sm:$0xf] }
 0x188   : > { %11963 = vst.msk [vmem:[%s15864_s13 + $0x88] sm:$0xff] %vm1566_vm2, %v4347_v59  ;;  %v4346_v61 = vadd.f32 %v16241_v20, %v4338_v30  ;;  %v4341_v36 = vadd.f32 %v13958_v18, %v4167_v27  ;;  %v4166_v3 = vadd.f32 %v4135_v26, %v3992_v42  ;;  %v4309_v50 = vpop.f32.mrf.mxu1  ;;  %v14919_v42 = vld [vmem:[%s15109_s25 + $0x71] ss:$8 sps:$4 sm:$0xff]   ;;  %v14920_v59 = vld [vmem:[%s15109_s25 + $0x80] ss:$8 sps:$4 sm:$0xff]  }
 0x189   : > { %v13947_v56 = vpop.f32.mrf.mxu0  ;;  %14282 = vmatmul.mubr.msk.f32.gmra.mxu0 %vm232_vm1, %v14912_v58  ;;  %v14921_v27 = vld [vmem:[%s15109_s25 + $0x81] ss:$8 sps:$4 sm:$0xff]  }
 0x18a   : > { %11962 = vst.msk [vmem:[%s15864_s13 + $0x80] sm:$0xff] %vm1566_vm2, %v4346_v61  ;;  %v4349_v62 = vadd.f32 %v16241_v20, %v4341_v36  ;;  %v4340_v53 = vadd.f32 %v4309_v50, %v4166_v3  ;;  %v4169_v13 = vadd.f32 %v13947_v56, %v3995_v43  ;;  %v13961_v39 = vpop.f32.mrf.mxu1  ;;  %14296 = vmatmul.mubr.msk.f32.gmra.mxu1 %vm232_vm1, %v14913_v8  ;;  %v14923_v26 = vld [vmem:[%s15109_s25 + $0xa1] ss:$8 sps:$4 sm:$0xff]   ;;  %v14924_v61 = vld [vmem:[%s15109_s25 + $0xb0] ss:$8 sps:$4 sm:$0xff]  }
 0x18b   : > { %v4145_v6 = vpop.f32.mrf.mxu0  ;;  %14284 = vmatprep.mubr.msk.f32.mxu0 %vm232_vm1, %v14914_v25  ;;  %14298 = vmatprep.mubr.msk.f32.mxu1 %vm232_vm1, %v14915_v34  ;;  %v14925_v3 = vld [vmem:[%s15109_s25 + $0xb1] ss:$8 sps:$4 sm:$0xff]   ;;  %v14928_v56 = vld [vmem:[%s15109_s25 + $0xe0] ss:$8 sps:$4 sm:$0xff]  }
 0x18c   : > { %11965 = vst.msk [vmem:[%s15864_s13 + $0x98] sm:$0xff] %vm1566_vm2, %v4349_v62  ;;  %v4348_v33 = vadd.f32 %v16241_v20, %v4340_v53  ;;  %v4343_v19 = vadd.f32 %v13961_v39, %v4169_v13  ;;  %v4168_v45 = vadd.f32 %v4145_v6, %v3994_v10  ;;  %v4319_v37 = vpop.f32.mrf.mxu1  ;;  %v14926_v10 = vld [vmem:[%s15109_s25 + $0xd0] ss:$8 sps:$4 sm:$0xff]   ;;  %v14929_v62 = vld [vmem:[%s15109_s25 + $0xe1] ss:$8 sps:$4 sm:$0xff]  }
 0x18d   : > { %v13950_v35 = vpop.f32.mrf.mxu0  ;;  %14285 = vmatmul.mubr.msk.f32.gmra.mxu0 %vm232_vm1, %v14916_v44  ;;  %v14930_v13 = vld [vmem:[%s15109_s25 + $0x100] ss:$8 sps:$4 sm:$0xff]   ;;  %v14932_v6 = vld [vmem:[%s15109_s25 + $0x110] ss:$8 sps:$4 sm:$0xff]  }
 0x18e   : > { %11964 = vst.msk [vmem:[%s15864_s13 + $0x90] sm:$0xff] %vm1566_vm2, %v4348_v33  ;;  %v4351_v38 = vadd.f32 %v16241_v20, %v4343_v19  ;;  %v4342_v1 = vadd.f32 %v4319_v37, %v4168_v45  ;;  %v4171_v41 = vadd.f32 %v13950_v35, %v3997_v29  ;;  %v13964_v47 = vpop.f32.mrf.mxu1  ;;  %14299 = vmatmul.mubr.msk.f32.gmra.mxu1 %vm232_vm1, %v14917_v31  ;;  %v14931_v29 = vld [vmem:[%s15109_s25 + $0x101] ss:$8 sps:$4 sm:$0xff]   ;;  %v14933_v33 = vld [vmem:[%s15109_s25 + $0x111] ss:$8 sps:$4 sm:$0xff]  }
 0x18f   : > { %v4155_v49 = vpop.f32.mrf.mxu0  ;;  %14303 = vmatprep.mubr.msk.f32.mxu0 %vm232_vm1, %v14918_v9  ;;  %14317 = vmatprep.mubr.msk.f32.mxu1 %vm232_vm1, %v14919_v42  ;;  %v14934_v19 = vld [vmem:[%s15109_s25 + $0x69] ss:$8 sps:$4 sm:$0xff]   ;;  %v14944_v34 = vld [vmem:[%s15109_s25 + $0xd9] ss:$8 sps:$4 sm:$0xff]  }
 0x190   : > { %11967 = vst.msk [vmem:[%s15864_s13 + $0xa8] sm:$0xff] %vm1566_vm2, %v4351_v38  ;;  %v4350_v54 = vadd.f32 %v16241_v20, %v4342_v1  ;;  %v4345_v55 = vadd.f32 %v13964_v47, %v4171_v41  ;;  %v4170_v24 = vadd.f32 %v4155_v49, %v3996_v21  ;;  %v4329_v51 = vpop.f32.mrf.mxu1  ;;  %v14935_v37 = vld [vmem:[%s15109_s25 + $0x68] ss:$8 sps:$4 sm:$0xff]   ;;  %v14936_v21 = vld [vmem:[%s15109_s25 + $0x79] ss:$8 sps:$4 sm:$0xff]  }
 0x191   : > { %v16552_v40 = vpop.f32.mrf.mxu0  ;;  %14304 = vmatmul.mubr.msk.f32.vlgmr.msra.gmra.mxu0 %vm232_vm1, %v14920_v59  ;;  %v14937_v38 = vld [vmem:[%s15109_s25 + $0x78] ss:$8 sps:$4 sm:$0xff]   ;;  %v12764_v1 = vld [vmem:[%s17277_s1 + $0xd4] sm:$0xf] }
 0x192   : > { %11966 = vst.msk [vmem:[%s15864_s13 + $0xa0] sm:$0xff] %vm1566_vm2, %v4350_v54  ;;  %v4353_v11 = vadd.f32 %v16241_v20, %v4345_v55  ;;  %v4344_v0 = vadd.f32 %v4329_v51, %v4170_v24  ;;  %v16556_v23 = vpop.f32.mrf.mxu1  ;;  %14318 = vmatmul.mubr.msk.f32.vlgmr.msra.gmra.mxu1 %vm232_vm1, %v14921_v27  ;;  %14306 = vmatprep.mubr.msk.f32.mxu0 %vm232_vm1, %v14922_v4  ;;  %v14938_v47 = vld [vmem:[%s15109_s25 + $0x99] ss:$8 sps:$4 sm:$0xff]   ;;  %v14940_v54 = vld [vmem:[%s15109_s25 + $0xa9] ss:$8 sps:$4 sm:$0xff]  }
 0x193   : > { %v16563_v5 = vpop.f32.mrf.mxu0  ;;  %14344 = vmatpush3.msk.msra.mxu1 %vm249_vm0, %v12712_v48  ;;  %14320 = vmatprep.mubr.msk.f32.mxu1 %vm232_vm1, %v14923_v26  ;;  %v14939_v49 = vld [vmem:[%s15109_s25 + $0x98] ss:$8 sps:$4 sm:$0xff]   ;;  %v14941_v24 = vld [vmem:[%s15109_s25 + $0xa8] ss:$8 sps:$4 sm:$0xff]  }
 0x194   : > { %11969 = vst.msk [vmem:[%s15864_s13 + $0xb8] sm:$0xff] %vm1566_vm2, %v4353_v11  ;;  %v4352_v17 = vadd.f32 %v16241_v20, %v4344_v0  ;;  %v16567_v46 = vpop.f32.mrf.mxu1  ;;  %v12686_v20 = vld [vmem:[%s17277_s1 + $0xc8] sm:$0xf]  ;;  %14371 = vmatprep.subr.msk.mxu1 %vm249_vm0, %v12764_v1  ;;  %v14946_v9 = vld [vmem:[%s15109_s25 + $0xf9] ss:$8 sps:$4 sm:$0xff]  }
 0x195   : > { %v16573_v57 = vpop.f32.mrf.mxu0  ;;  %14329 = vmatprep.subr.msk.mxu0 %vm249_vm0, %v12686_v20  ;;  %14307 = vmatmul.mubr.msk.f32.gmra.mxu0 %vm232_vm1, %v14924_v61  ;;  %v14942_v8 = vld [vmem:[%s15109_s25 + $0xc9] ss:$8 sps:$4 sm:$0xff]   ;;  %v4662_v61 = vadd.f32 %v16556_v23, %v16552_v40  ;;  %v12790_v40 = vld [vmem:[%s17277_s1 + $0xd8] sm:$0xf] }
 0x196   : > { %11968 = vst.msk [vmem:[%s15864_s13 + $0xb0] sm:$0xff] %vm1566_vm2, %v4352_v17  ;;  %v16580_v12 = vpop.f32.mrf.mxu1  ;;  %14330 = vmatpush3.msk.msra.mxu0 %vm249_vm0, %v12686_v20  ;;  %14321 = vmatmul.mubr.msk.f32.gmra.mxu1 %vm232_vm1, %v14925_v3  ;;  %v14943_v11 = vld [vmem:[%s15109_s25 + $0xc8] ss:$8 sps:$4 sm:$0xff]   ;;  %v14945_v17 = vld [vmem:[%s15109_s25 + $0xd8] ss:$8 sps:$4 sm:$0xff]  }
 0x197   : > { %v16585_v30 = vpop.f32.mrf.mxu0  ;;  %14309 = vmatprep.mubr.msk.f32.mxu0 %vm232_vm1, %v14926_v10  ;;  %14323 = vmatprep.mubr.msk.f32.mxu1 %vm232_vm1, %v14927_v60  ;;  %v14947_v20 = vld [vmem:[%s15109_s25 + $0xf8] ss:$8 sps:$4 sm:$0xff]   ;;  %v14948_v27 = vld [vmem:[%s15109_s25 + $0x109] ss:$8 sps:$4 sm:$0xff]  }
 0x198   : > { %v16589_v18 = vpop.f32.mrf.mxu1  ;;  %14357 = vmatprep.subr.msk.mxu0 %vm249_vm0, %v12738_v28  ;;  %v14949_v4 = vld [vmem:[%s15109_s25 + $0x108] ss:$8 sps:$4 sm:$0xff]  }
 0x199   : > { %v16595_v43 = vpop.f32.mrf.mxu0  ;;  %14310 = vmatmul.mubr.msk.f32.gmra.mxu0 %vm232_vm1, %v14928_v56  ;;  %v14950_v3 = vld [vmem:[%s15109_s25 + $0x41] ss:$8 sps:$4 sm:$0xff]  }
 0x19a   : > { %v16600_v7 = vpop.f32.mrf.mxu1  ;;  %14324 = vmatmul.mubr.msk.f32.gmra.mxu1 %vm232_vm1, %v14929_v62  ;;  %14312 = vmatprep.mubr.msk.f32.mxu0 %vm232_vm1, %v14930_v13  ;;  %v14951_v60 = vld [vmem:[%s15109_s25 + $0x40] ss:$8 sps:$4 sm:$0xff]   ;;  %v4657_v62 = vadd.f32 %v16567_v46, %v16563_v5  ;;  %v14953_v46 = vld [vmem:[%s15109_s25 + $0x50] ss:$8 sps:$4 sm:$0xff]  }
 0x19b   : > { %v16604_v15 = vpop.f32.mrf.mxu0  ;;  %14326 = vmatprep.mubr.msk.f32.mxu1 %vm232_vm1, %v14931_v29  ;;  %v14952_v29 = vld [vmem:[%s15109_s25 + $0x51] ss:$8 sps:$4 sm:$0xff]  }
 0x19c   : > { %v16609_v36 = vpop.f32.mrf.mxu1 }
 0x19d   : > { %v16613_v50 = vpop.f32.mrf.mxu0  ;;  %14313 = vmatmul.mubr.msk.f32.gmra.mxu0 %vm232_vm1, %v14932_v6 }
 0x19e   : > { %v16617_v63 = vpop.f32.mrf.mxu1  ;;  %14327 = vmatmul.mubr.msk.f32.gmra.mxu1 %vm232_vm1, %v14933_v33  ;;  %14331 = vmatprep.mubr.msk.f32.mxu0 %vm232_vm1, %v14934_v19  ;;  %v4672_v19 = vadd.f32 %v16580_v12, %v16573_v57  ;;  %v4667_v57 = vadd.f32 %v16589_v18, %v16585_v30  ;;  %v4682_v30 = vadd.f32 %v16600_v7, %v16595_v43 }
 0x19f   : > { %v16621_v2 = vpop.f32.mrf.mxu0  ;;  %14345 = vmatprep.mubr.msk.f32.mxu1 %vm232_vm1, %v14935_v37  ;;  %v14954_v37 = vld [vmem:[%s15109_s25 + $0x71] ss:$8 sps:$4 sm:$0xff]  }
 0x1a0   : > { %v16625_v16 = vpop.f32.mrf.mxu1 }
 0x1a1   : > { %v16629_v53 = vpop.f32.mrf.mxu0  ;;  %14332 = vmatmul.mubr.msk.f32.vlgmr.msra.gmra.mxu0 %vm232_vm1, %v14936_v21  ;;  %v14955_v21 = vld [vmem:[%s15109_s25 + $0x70] ss:$8 sps:$4 sm:$0xff]  }
 0x1a2   : > { %v16633_v39 = vpop.f32.mrf.mxu1  ;;  %14346 = vmatmul.mubr.msk.f32.vlgmr.msra.gmra.mxu1 %vm232_vm1, %v14937_v38  ;;  %14358 = vmatpush3.msk.msra.mxu0 %vm249_vm0, %v12738_v28  ;;  %v4862_v13 = vadd.f32 %v16629_v53, %v4662_v61  ;;  %v12816_v53 = vld [vmem:[%s17277_s1 + $0xdc] sm:$0xf] }
 0x1a3   : > { %v16637_v22 = vpop.f32.mrf.mxu0  ;;  %14372 = vmatpush3.msk.msra.mxu1 %vm249_vm0, %v12764_v1  ;;  %14334 = vmatprep.mubr.msk.f32.mxu0 %vm232_vm1, %v14938_v47  ;;  %v14956_v1 = vld [vmem:[%s15109_s25 + $0x81] ss:$8 sps:$4 sm:$0xff]  }
 0x1a4   : > { %v16641_v52 = vpop.f32.mrf.mxu1  ;;  %14348 = vmatprep.mubr.msk.f32.mxu1 %vm232_vm1, %v14939_v49  ;;  %14385 = vmatprep.subr.msk.mxu0 %vm249_vm0, %v12790_v40  ;;  %v4861_v5 = vadd.f32 %v16637_v22, %v4657_v62  ;;  %v5036_v22 = vadd.f32 %v16633_v39, %v4862_v13 }
 0x1a5   : > { %v16647_v45 = vpop.f32.mrf.mxu0  ;;  %14335 = vmatmul.mubr.msk.f32.gmra.mxu0 %vm232_vm1, %v14940_v54  ;;  %14399 = vmatprep.subr.msk.mxu1 %vm249_vm0, %v12816_v53  ;;  %v14957_v54 = vld [vmem:[%s15109_s25 + $0x80] ss:$8 sps:$4 sm:$0xff]  }
 0x1a6   : > { %v16654_v35 = vpop.f32.mrf.mxu1  ;;  %14349 = vmatmul.mubr.msk.f32.gmra.mxu1 %vm232_vm1, %v14941_v24  ;;  %14337 = vmatprep.mubr.msk.f32.mxu0 %vm232_vm1, %v14942_v8  ;;  %v4864_v12 = vadd.f32 %v16647_v45, %v4672_v19  ;;  %v5035_v39 = vadd.f32 %v16641_v52, %v4861_v5  ;;  %v14958_v45 = vld [vmem:[%s15109_s25 + $0xa1] ss:$8 sps:$4 sm:$0xff]   ;;  %v4677_v52 = vadd.f32 %v16609_v36, %v16604_v15  ;;  %v14961_v36 = vld [vmem:[%s15109_s25 + $0xb0] ss:$8 sps:$4 sm:$0xff]  }
 0x1a7   : > { %v16659_v14 = vpop.f32.mrf.mxu0  ;;  %14351 = vmatprep.mubr.msk.f32.mxu1 %vm232_vm1, %v14943_v11 }
 0x1a8   : > { %v16666_v41 = vpop.f32.mrf.mxu1  ;;  %v4863_v18 = vadd.f32 %v16659_v14, %v4667_v57  ;;  %v5038_v43 = vadd.f32 %v16654_v35, %v4864_v12  ;;  %v14960_v14 = vld [vmem:[%s15109_s25 + $0xb1] ss:$8 sps:$4 sm:$0xff]  }
 0x1a9   : > { %v16671_v32 = vpop.f32.mrf.mxu0  ;;  %14338 = vmatmul.mubr.msk.f32.gmra.mxu0 %vm232_vm1, %v14944_v34  ;;  %v14959_v34 = vld [vmem:[%s15109_s25 + $0xa0] ss:$8 sps:$4 sm:$0xff]  }
 0x1aa   : > { %v16676_v58 = vpop.f32.mrf.mxu1  ;;  %14352 = vmatmul.mubr.msk.f32.gmra.mxu1 %vm232_vm1, %v14945_v17  ;;  %14340 = vmatprep.mubr.msk.f32.mxu0 %vm232_vm1, %v14946_v9  ;;  %v4866_v7 = vadd.f32 %v16671_v32, %v4682_v30  ;;  %v5037_v35 = vadd.f32 %v16666_v41, %v4863_v18  ;;  %v14969_v57 = vld [vmem:[%s15109_s25 + $0x48] ss:$8 sps:$4 sm:$0xff]  }
 0x1ab   : > { %v16681_v55 = vpop.f32.mrf.mxu0  ;;  %14354 = vmatprep.mubr.msk.f32.mxu1 %vm232_vm1, %v14947_v20  ;;  %v4692_v20 = vadd.f32 %v16617_v63, %v16613_v50 }
 0x1ac   : > { %v16685_v51 = vpop.f32.mrf.mxu1  ;;  %v5040_v50 = vadd.f32 %v16676_v58, %v4866_v7 }
 0x1ad   : > { %v16689_v25 = vpop.f32.mrf.mxu0  ;;  %14341 = vmatmul.mubr.msk.f32.gmra.mxu0 %vm232_vm1, %v14948_v27  ;;  %v14962_v27 = vld [vmem:[%s15109_s25 + $0xd1] ss:$8 sps:$4 sm:$0xff]  }
 0x1ae   : > { %v16693_v0 = vpop.f32.mrf.mxu1  ;;  %14355 = vmatmul.mubr.msk.f32.gmra.mxu1 %vm232_vm1, %v14949_v4  ;;  %14359 = vmatprep.mubr.msk.f32.mxu0 %vm232_vm1, %v14950_v3  ;;  %v14963_v4 = vld [vmem:[%s15109_s25 + $0xd0] ss:$8 sps:$4 sm:$0xff]   ;;  %v4868_v63 = vadd.f32 %v16689_v25, %v4692_v20 }
 0x1af   : > { %v16697_v44 = vpop.f32.mrf.mxu0  ;;  %14373 = vmatprep.mubr.msk.f32.mxu1 %vm232_vm1, %v14951_v60 }
 0x1b0   : > { %v16701_v31 = vpop.f32.mrf.mxu1 }
 0x1b1   : > { %v14025_v42 = vpop.f32.mrf.mxu0  ;;  %14360 = vmatmul.mubr.msk.f32.vlgmr.msra.gmra.mxu0 %vm232_vm1, %v14952_v29 }
 0x1b2   : > { %v16707_v59 = vpop.f32.mrf.mxu1  ;;  %14374 = vmatmul.mubr.msk.f32.vlgmr.msra.gmra.mxu1 %vm232_vm1, %v14953_v46  ;;  %14386 = vmatpush3.msk.msra.mxu0 %vm249_vm0, %v12790_v40  ;;  %v5210_v49 = vadd.f32 %v14025_v42, %v5036_v22  ;;  %v4865_v42 = vadd.f32 %v16681_v55, %v4677_v52  ;;  %v4687_v55 = vadd.f32 %v16625_v16, %v16621_v2 }
 0x1b3   : > { %v5170_v48 = vpop.f32.mrf.mxu0  ;;  %14400 = vmatpush3.msk.msra.mxu1 %vm249_vm0, %v12816_v53  ;;  %14362 = vmatprep.mubr.msk.f32.mxu0 %vm232_vm1, %v14954_v37  ;;  %v14968_v37 = vld [vmem:[%s15109_s25 + $0x49] ss:$8 sps:$4 sm:$0xff]  }
 0x1b4   : > { %v16713_v26 = vpop.f32.mrf.mxu1  ;;  %14376 = vmatprep.mubr.msk.f32.mxu1 %vm232_vm1, %v14955_v21  ;;  %v5209_v11 = vadd.f32 %v5170_v48, %v5035_v39  ;;  %v5384_v15 = vadd.f32 %v16707_v59, %v5210_v49  ;;  %v5039_v2 = vadd.f32 %v16685_v51, %v4865_v42  ;;  %v4867_v16 = vadd.f32 %v16697_v44, %v4687_v55  ;;  %v14967_v51 = vld [vmem:[%s15109_s25 + $0x38] ss:$8 sps:$4 sm:$0xff]   ;;  %v12867_v44 = vld [vmem:[%s17277_s1 + $0xe4] sm:$0xf] }
 0x1b5   : > { %v14028_v10 = vpop.f32.mrf.mxu0  ;;  %14363 = vmatmul.mubr.msk.f32.gmra.mxu0 %vm232_vm1, %v14956_v1  ;;  %14413 = vmatprep.subr.msk.mxu0 %vm249_vm0, %v12867_v44 }
 0x1b6   : > { %v16721_v56 = vpop.f32.mrf.mxu1  ;;  %14377 = vmatmul.mubr.msk.f32.gmra.mxu1 %vm232_vm1, %v14957_v54  ;;  %14365 = vmatprep.mubr.msk.f32.mxu0 %vm232_vm1, %v14958_v45  ;;  %v5212_v32 = vadd.f32 %v14028_v10, %v5038_v43  ;;  %v5383_v59 = vadd.f32 %v16713_v26, %v5209_v11  ;;  %v14964_v10 = vld [vmem:[%s15109_s25 + $0xe1] ss:$8 sps:$4 sm:$0xff]  }
 0x1b7   : > { %v16730_v23 = vpop.f32.mrf.mxu0  ;;  %14379 = vmatprep.mubr.msk.f32.mxu1 %vm232_vm1, %v14959_v34  ;;  %v14965_v26 = vld [vmem:[%s15109_s25 + $0xe0] ss:$8 sps:$4 sm:$0xff]  }
 0x1b8   : > { %v16735_v6 = vpop.f32.mrf.mxu1  ;;  %v5211_v41 = vadd.f32 %v16730_v23, %v5037_v35  ;;  %v5386_v40 = vadd.f32 %v16721_v56, %v5212_v32  ;;  %v14966_v23 = vld [vmem:[%s15109_s25 + $0x39] ss:$8 sps:$4 sm:$0xff]   ;;  %v16822_v56 = vld [vmem:[%s17278_s2] ss:$0 sm:$0xff]  ;;  %v14971_v45 = vld [vmem:[%s15109_s25 + $0x68] ss:$8 sps:$4 sm:$0xff]  }
 0x1b9   : > { %v16742_v33 = vpop.f32.mrf.mxu0  ;;  %14366 = vmatmul.mubr.msk.f32.gmra.mxu0 %vm232_vm1, %v14960_v14  ;;  %v14972_v43 = vld [vmem:[%s15109_s25 + $0x79] ss:$8 sps:$4 sm:$0xff]  }
 0x1ba   : > { %v16749_v28 = vpop.f32.mrf.mxu1  ;;  %14380 = vmatmul.mubr.msk.f32.gmra.mxu1 %vm232_vm1, %v14961_v36  ;;  %14368 = vmatprep.mubr.msk.f32.mxu0 %vm232_vm1, %v14962_v27  ;;  %v5214_v25 = vadd.f32 %v16742_v33, %v5040_v50  ;;  %v5042_v33 = vadd.f32 %v16693_v0, %v4868_v63  ;;  %v5385_v19 = vadd.f32 %v16735_v6, %v5211_v41  ;;  %v14974_v35 = vld [vmem:[%s15109_s25 + $0x99] ss:$8 sps:$4 sm:$0xff]  }
 0x1bb   : > { %v5190_v38 = vpop.f32.mrf.mxu0  ;;  %14382 = vmatprep.mubr.msk.f32.mxu1 %vm232_vm1, %v14963_v4 }
 0x1bc   : > { %v16761_v47 = vpop.f32.mrf.mxu1  ;;  %v5213_v29 = vadd.f32 %v5190_v38, %v5039_v2  ;;  %v5041_v38 = vadd.f32 %v16701_v31, %v4867_v16  ;;  %v5388_v6 = vadd.f32 %v16749_v28, %v5214_v25  ;;  %v12850_v31 = vld [vmem:[%s17277_s1 + $0xe0] sm:$0xf]  ;;  %v14970_v28 = vld [vmem:[%s15109_s25 + $0x69] ss:$8 sps:$4 sm:$0xff]  }
 0x1bd   : > { %v16766_v24 = vpop.f32.mrf.mxu0  ;;  %14369 = vmatmul.mubr.msk.f32.gmra.mxu0 %vm232_vm1, %v14964_v10  ;;  %14427 = vmatprep.subr.msk.mxu1 %vm249_vm0, %v12850_v31  ;;  %v14979_v16 = vld [vmem:[%s15109_s25 + $0xc8] ss:$8 sps:$4 sm:$0xff]   ;;  %v14981_v25 = vld [vmem:[%s15109_s25 + $0xd8] ss:$8 sps:$4 sm:$0xff]  }
 0x1be   : > { %v16773_v8 = vpop.f32.mrf.mxu1  ;;  %14383 = vmatmul.mubr.msk.f32.gmra.mxu1 %vm232_vm1, %v14965_v26  ;;  %14387 = vmatprep.mubr.msk.f32.mxu0 %vm232_vm1, %v14966_v23  ;;  %v5216_v1 = vadd.f32 %v16766_v24, %v5042_v33  ;;  %v5387_v30 = vadd.f32 %v16761_v47, %v5213_v29  ;;  %v14984_v33 = vld [vmem:[%s15109_s25 + $0x81] ss:$8 sps:$4 sm:$0xff]  }
 0x1bf   : > { %v16779_v17 = vpop.f32.mrf.mxu0  ;;  %14401 = vmatprep.mubr.msk.f32.mxu1 %vm232_vm1, %v14967_v51  ;;  %v14982_v51 = vld [vmem:[%s15109_s25 + $0x71] ss:$8 sps:$4 sm:$0xff]  }
 0x1c0   : > { %v16785_v9 = vpop.f32.mrf.mxu1  ;;  %v5215_v18 = vadd.f32 %v16779_v17, %v5041_v38  ;;  %v5390_v14 = vadd.f32 %v16773_v8, %v5216_v1  ;;  %v14973_v17 = vld [vmem:[%s15109_s25 + $0x78] ss:$8 sps:$4 sm:$0xff]  }
 0x1c1   : > { %v14053_v48 = vpop.f32.mrf.mxu0  ;;  %14388 = vmatmul.mubr.msk.f32.vlgmr.msra.gmra.mxu0 %vm232_vm1, %v14968_v37  ;;  %v14975_v8 = vld [vmem:[%s15109_s25 + $0x98] ss:$8 sps:$4 sm:$0xff]  }
 0x1c2   : > { %v5558_v61 = vadd.f32 %v14053_v48, %v5384_v15  ;;  %v14067_v3 = vpop.f32.mrf.mxu1  ;;  %14402 = vmatmul.mubr.msk.f32.vlgmr.msra.gmra.mxu1 %vm232_vm1, %v14969_v57  ;;  %14414 = vmatpush3.msk.msra.mxu0 %vm249_vm0, %v12867_v44  ;;  %v5389_v27 = vadd.f32 %v16785_v9, %v5215_v18  ;;  %v14977_v9 = vld [vmem:[%s15109_s25 + $0xa8] ss:$8 sps:$4 sm:$0xff]  }
 0x1c3   : > { %v5518_v60 = vpop.f32.mrf.mxu0  ;;  %14428 = vmatpush3.msk.msra.mxu1 %vm249_vm0, %v12850_v31  ;;  %14390 = vmatprep.mubr.msk.f32.mxu0 %vm232_vm1, %v14970_v28  ;;  %v14985_v37 = vld [vmem:[%s15109_s25 + $0x82] ss:$8 sps:$4 sm:$0xff]   ;;  %v14989_v31 = vld [vmem:[%s15109_s25 + $0xb2] ss:$8 sps:$4 sm:$0xff]  }
 0x1c4   : > { %v5732_v62 = vadd.f32 %v14067_v3, %v5558_v61  ;;  %v5557_v13 = vadd.f32 %v5518_v60, %v5383_v59  ;;  %v5692_v58 = vpop.f32.mrf.mxu1  ;;  %14404 = vmatprep.mubr.msk.f32.mxu1 %vm232_vm1, %v14971_v45  ;;  %v14976_v61 = vld [vmem:[%s15109_s25 + $0xa9] ss:$8 sps:$4 sm:$0xff]  }
 0x1c5   : > { %v14056_v53 = vpop.f32.mrf.mxu0  ;;  %14391 = vmatmul.mubr.msk.f32.gmra.mxu0 %vm232_vm1, %v14972_v43  ;;  %v14978_v60 = vld [vmem:[%s15109_s25 + $0xc9] ss:$8 sps:$4 sm:$0xff]  }
 0x1c6   : > { %v5740_v5 = vadd.f32 %v16822_v56, %v5732_v62  ;;  %v5731_v46 = vadd.f32 %v5692_v58, %v5557_v13  ;;  %v5560_v22 = vadd.f32 %v14056_v53, %v5386_v40  ;;  %v14070_v21 = vpop.f32.mrf.mxu1  ;;  %14405 = vmatmul.mubr.msk.f32.gmra.mxu1 %vm232_vm1, %v14973_v17  ;;  %14393 = vmatprep.mubr.msk.f32.mxu0 %vm232_vm1, %v14974_v35  ;;  %v14980_v58 = vld [vmem:[%s15109_s25 + $0xd9] ss:$8 sps:$4 sm:$0xff]   ;;  %v12954_v35 = vld [vmem:[%s17277_s1 + $0xf0] sm:$0xf] }
 0x1c7   : > { %v5528_v12 = vpop.f32.mrf.mxu0  ;;  %14407 = vmatprep.mubr.msk.f32.mxu1 %vm232_vm1, %v14975_v8  ;;  %v14986_v38 = vld [vmem:[%s15109_s25 + $0xa1] ss:$8 sps:$4 sm:$0xff]   ;;  %v14996_v43 = vld [vmem:[%s15109_s25 + $0x111] ss:$8 sps:$4 sm:$0xff]  }
 0x1c8   : > { %12179 = vst.msk [vmem:[%s15864_s13 + $0xc8] sm:$0xff] %vm1566_vm2, %v5740_v5  ;;  %v5739_v0 = vadd.f32 %v16822_v56, %v5731_v46  ;;  %v5734_v39 = vadd.f32 %v14070_v21, %v5560_v22  ;;  %v5559_v49 = vadd.f32 %v5528_v12, %v5385_v19  ;;  %v5702_v54 = vpop.f32.mrf.mxu1  ;;  %v14983_v5 = vld [vmem:[%s15109_s25 + $0x72] ss:$8 sps:$4 sm:$0xff]   ;;  %v12902_v46 = vld [vmem:[%s17277_s1 + $0xe8] sm:$0xf] }
 0x1c9   : > { %v14059_v24 = vpop.f32.mrf.mxu0  ;;  %14394 = vmatmul.mubr.msk.f32.gmra.mxu0 %vm232_vm1, %v14976_v61  ;;  %14441 = vmatprep.subr.msk.mxu0 %vm249_vm0, %v12902_v46  ;;  %v12928_v22 = vld [vmem:[%s17277_s1 + $0xec] sm:$0xf] }
 0x1ca   : > { %12178 = vst.msk [vmem:[%s15864_s13 + $0xc0] sm:$0xff] %vm1566_vm2, %v5739_v0  ;;  %v5742_v52 = vadd.f32 %v16822_v56, %v5734_v39  ;;  %v5733_v11 = vadd.f32 %v5702_v54, %v5559_v49  ;;  %v5562_v47 = vadd.f32 %v14059_v24, %v5388_v6  ;;  %v14073_v34 = vpop.f32.mrf.mxu1  ;;  %14408 = vmatmul.mubr.msk.f32.gmra.mxu1 %vm232_vm1, %v14977_v9  ;;  %v14987_v0 = vld [vmem:[%s15109_s25 + $0xa2] ss:$8 sps:$4 sm:$0xff]   ;;  %v14988_v6 = vld [vmem:[%s15109_s25 + $0xb1] ss:$8 sps:$4 sm:$0xff]  }
 0x1cb   : > { %v5538_v7 = vpop.f32.mrf.mxu0  ;;  %14396 = vmatprep.mubr.msk.f32.mxu0 %vm232_vm1, %v14978_v60  ;;  %14410 = vmatprep.mubr.msk.f32.mxu1 %vm232_vm1, %v14979_v16  ;;  %v14990_v49 = vld [vmem:[%s15109_s25 + $0xd1] ss:$8 sps:$4 sm:$0xff]   ;;  %v14992_v24 = vld [vmem:[%s15109_s25 + $0xe1] ss:$8 sps:$4 sm:$0xff]  }
 0x1cc   : > { %12181 = vst.msk [vmem:[%s15864_s13 + $0xd8] sm:$0xff] %vm1566_vm2, %v5742_v52  ;;  %v5741_v42 = vadd.f32 %v16822_v56, %v5733_v11  ;;  %v5736_v15 = vadd.f32 %v14073_v34, %v5562_v47  ;;  %v5561_v36 = vadd.f32 %v5538_v7, %v5387_v30  ;;  %v5712_v20 = vpop.f32.mrf.mxu1  ;;  %14455 = vmatprep.subr.msk.mxu1 %vm249_vm0, %v12928_v22  ;;  %v14991_v30 = vld [vmem:[%s15109_s25 + $0xd2] ss:$8 sps:$4 sm:$0xff]   ;;  %v14993_v45 = vld [vmem:[%s15109_s25 + $0xe2] ss:$8 sps:$4 sm:$0xff]  }
 0x1cd   : > { %v14062_v32 = vpop.f32.mrf.mxu0  ;;  %14397 = vmatmul.mubr.msk.f32.gmra.mxu0 %vm232_vm1, %v14980_v58  ;;  %v14994_v11 = vld [vmem:[%s15109_s25 + $0x101] ss:$8 sps:$4 sm:$0xff]  }
 0x1ce   : > { %12180 = vst.msk [vmem:[%s15864_s13 + $0xd0] sm:$0xff] %vm1566_vm2, %v5741_v42  ;;  %v5744_v48 = vadd.f32 %v16822_v56, %v5736_v15  ;;  %v5735_v55 = vadd.f32 %v5712_v20, %v5561_v36  ;;  %v5564_v59 = vadd.f32 %v14062_v32, %v5390_v14  ;;  %v14076_v4 = vpop.f32.mrf.mxu1  ;;  %14411 = vmatmul.mubr.msk.f32.gmra.mxu1 %vm232_vm1, %v14981_v25  ;;  %v14995_v47 = vld [vmem:[%s15109_s25 + $0x102] ss:$8 sps:$4 sm:$0xff]   ;;  %v14997_v14 = vld [vmem:[%s15109_s25 + $0x112] ss:$8 sps:$4 sm:$0xff]  }
 0x1cf   : > { %v5548_v3 = vpop.f32.mrf.mxu0  ;;  %14415 = vmatprep.mubr.msk.f32.mxu0 %vm232_vm1, %v14982_v51  ;;  %14429 = vmatprep.mubr.msk.f32.mxu1 %vm232_vm1, %v14983_v5  ;;  %v14998_v42 = vld [vmem:[%s15109_s25 + $0x6a] ss:$8 sps:$4 sm:$0xff]   ;;  %v15008_v58 = vld [vmem:[%s15109_s25 + $0xda] ss:$8 sps:$4 sm:$0xff]  }
 0x1d0   : > { %12183 = vst.msk [vmem:[%s15864_s13 + $0xe8] sm:$0xff] %vm1566_vm2, %v5744_v48  ;;  %v5743_v50 = vadd.f32 %v16822_v56, %v5735_v55  ;;  %v5738_v63 = vadd.f32 %v14076_v4, %v5564_v59  ;;  %v5563_v41 = vadd.f32 %v5548_v3, %v5389_v27  ;;  %v5722_v10 = vpop.f32.mrf.mxu1  ;;  %v14999_v36 = vld [vmem:[%s15109_s25 + $0x69] ss:$8 sps:$4 sm:$0xff]   ;;  %v15000_v27 = vld [vmem:[%s15109_s25 + $0x7a] ss:$8 sps:$4 sm:$0xff]  }
 0x1d1   : > { %v16878_v2 = vpop.f32.mrf.mxu0  ;;  %14416 = vmatmul.mubr.msk.f32.vlgmr.msra.gmra.mxu0 %vm232_vm1, %v14984_v33  ;;  %v15001_v48 = vld [vmem:[%s15109_s25 + $0x79] ss:$8 sps:$4 sm:$0xff]   ;;  %v12980_v55 = vld [vmem:[%s17277_s1 + $0xf4] sm:$0xf] }
 0x1d2   : > { %12182 = vst.msk [vmem:[%s15864_s13 + $0xe0] sm:$0xff] %vm1566_vm2, %v5743_v50  ;;  %v5746_v26 = vadd.f32 %v16822_v56, %v5738_v63  ;;  %v5737_v62 = vadd.f32 %v5722_v10, %v5563_v41  ;;  %v16885_v13 = vpop.f32.mrf.mxu1  ;;  %14430 = vmatmul.mubr.msk.f32.vlgmr.msra.gmra.mxu1 %vm232_vm1, %v14985_v37  ;;  %14442 = vmatpush3.msk.msra.mxu0 %vm249_vm0, %v12902_v46  ;;  %v15002_v4 = vld [vmem:[%s15109_s25 + $0x9a] ss:$8 sps:$4 sm:$0xff]   ;;  %v15004_v50 = vld [vmem:[%s15109_s25 + $0xaa] ss:$8 sps:$4 sm:$0xff]  }
 0x1d3   : > { %v16889_v40 = vpop.f32.mrf.mxu0  ;;  %14456 = vmatpush3.msk.msra.mxu1 %vm249_vm0, %v12928_v22  ;;  %14418 = vmatprep.mubr.msk.f32.mxu0 %vm232_vm1, %v14986_v38  ;;  %v15003_v3 = vld [vmem:[%s15109_s25 + $0x99] ss:$8 sps:$4 sm:$0xff]   ;;  %v15005_v41 = vld [vmem:[%s15109_s25 + $0xa9] ss:$8 sps:$4 sm:$0xff]  }
 0x1d4   : > { %12185 = vst.msk [vmem:[%s15864_s13 + $0xf8] sm:$0xff] %vm1566_vm2, %v5746_v26  ;;  %v5745_v23 = vadd.f32 %v16822_v56, %v5737_v62  ;;  %v16896_v29 = vpop.f32.mrf.mxu1  ;;  %14432 = vmatprep.mubr.msk.f32.mxu1 %vm232_vm1, %v14987_v0  ;;  %14469 = vmatprep.subr.msk.mxu0 %vm249_vm0, %v12954_v35  ;;  %v15006_v60 = vld [vmem:[%s15109_s25 + $0xca] ss:$8 sps:$4 sm:$0xff]   ;;  %v15010_v5 = vld [vmem:[%s15109_s25 + $0xfa] ss:$8 sps:$4 sm:$0xff]  }
 0x1d5   : > { %v16900_v44 = vpop.f32.mrf.mxu0  ;;  %14419 = vmatmul.mubr.msk.f32.gmra.mxu0 %vm232_vm1, %v14988_v6  ;;  %14483 = vmatprep.subr.msk.mxu1 %vm249_vm0, %v12980_v55  ;;  %v15007_v26 = vld [vmem:[%s15109_s25 + $0xc9] ss:$8 sps:$4 sm:$0xff]   ;;  %v15011_v33 = vld [vmem:[%s15109_s25 + $0xf9] ss:$8 sps:$4 sm:$0xff]  }
 0x1d6   : > { %12184 = vst.msk [vmem:[%s15864_s13 + $0xf0] sm:$0xff] %vm1566_vm2, %v5745_v23  ;;  %v16909_v53 = vpop.f32.mrf.mxu1  ;;  %14433 = vmatmul.mubr.msk.f32.gmra.mxu1 %vm232_vm1, %v14989_v31  ;;  %14421 = vmatprep.mubr.msk.f32.mxu0 %vm232_vm1, %v14990_v49  ;;  %v15009_v23 = vld [vmem:[%s15109_s25 + $0xd9] ss:$8 sps:$4 sm:$0xff]   ;;  %v15012_v22 = vld [vmem:[%s15109_s25 + $0x10a] ss:$8 sps:$4 sm:$0xff]   ;;  %v6056_v31 = vadd.f32 %v16885_v13, %v16878_v2 }
 0x1d7   : > { %v16914_v19 = vpop.f32.mrf.mxu0  ;;  %14435 = vmatprep.mubr.msk.f32.mxu1 %vm232_vm1, %v14991_v30  ;;  %v15013_v0 = vld [vmem:[%s15109_s25 + $0x109] ss:$8 sps:$4 sm:$0xff]  }
 0x1d8   : > { %v16921_v21 = vpop.f32.mrf.mxu1  ;;  %v15014_v49 = vld [vmem:[%s15109_s25 + $0x42] ss:$8 sps:$4 sm:$0xff]   ;;  %v15016_v2 = vld [vmem:[%s15109_s25 + $0x52] ss:$8 sps:$4 sm:$0xff]  }
 0x1d9   : > { %v16926_v57 = vpop.f32.mrf.mxu0  ;;  %14422 = vmatmul.mubr.msk.f32.gmra.mxu0 %vm232_vm1, %v14992_v24  ;;  %v15015_v30 = vld [vmem:[%s15109_s25 + $0x41] ss:$8 sps:$4 sm:$0xff]   ;;  %v13006_v24 = vld [vmem:[%s17277_s1 + $0xf8] sm:$0xf] }
 0x1da   : > { %v16931_v12 = vpop.f32.mrf.mxu1  ;;  %14436 = vmatmul.mubr.msk.f32.gmra.mxu1 %vm232_vm1, %v14993_v45  ;;  %14424 = vmatprep.mubr.msk.f32.mxu0 %vm232_vm1, %v14994_v11  ;;  %v6051_v11 = vadd.f32 %v16896_v29, %v16889_v40  ;;  %v13032_v29 = vld [vmem:[%s17277_s1 + $0xfc] sm:$0xf] }
 0x1db   : > { %v16936_v1 = vpop.f32.mrf.mxu0  ;;  %14438 = vmatprep.mubr.msk.f32.mxu1 %vm232_vm1, %v14995_v47 }
 0x1dc   : > { %v16940_v39 = vpop.f32.mrf.mxu1 }
 0x1dd   : > { %v16944_v54 = vpop.f32.mrf.mxu0  ;;  %14425 = vmatmul.mubr.msk.f32.gmra.mxu0 %vm232_vm1, %v14996_v43  ;;  %v15017_v43 = vld [vmem:[%s15109_s25 + $0x51] ss:$8 sps:$4 sm:$0xff]  }
 0x1de   : > { %v16948_v28 = vpop.f32.mrf.mxu1  ;;  %14439 = vmatmul.mubr.msk.f32.gmra.mxu1 %vm232_vm1, %v14997_v14  ;;  %14443 = vmatprep.mubr.msk.f32.mxu0 %vm232_vm1, %v14998_v42  ;;  %v6066_v42 = vadd.f32 %v16909_v53, %v16900_v44  ;;  %v6061_v44 = vadd.f32 %v16921_v21, %v16914_v19 }
 0x1df   : > { %v16952_v18 = vpop.f32.mrf.mxu0  ;;  %14457 = vmatprep.mubr.msk.f32.mxu1 %vm232_vm1, %v14999_v36  ;;  %v15018_v36 = vld [vmem:[%s15109_s25 + $0x72] ss:$8 sps:$4 sm:$0xff]  }
 0x1e0   : > { %v16956_v52 = vpop.f32.mrf.mxu1 }
 0x1e1   : > { %v16962_v34 = vpop.f32.mrf.mxu0  ;;  %14444 = vmatmul.mubr.msk.f32.vlgmr.msra.gmra.mxu0 %vm232_vm1, %v15000_v27  ;;  %v15019_v27 = vld [vmem:[%s15109_s25 + $0x71] ss:$8 sps:$4 sm:$0xff]  }
 0x1e2   : > { %v16966_v7 = vpop.f32.mrf.mxu1  ;;  %14458 = vmatmul.mubr.msk.f32.vlgmr.msra.gmra.mxu1 %vm232_vm1, %v15001_v48  ;;  %14470 = vmatpush3.msk.msra.mxu0 %vm249_vm0, %v12954_v35  ;;  %v6257_v47 = vadd.f32 %v16962_v34, %v6056_v31  ;;  %v15027_v31 = vld [vmem:[%s15109_s25 + $0xd1] ss:$8 sps:$4 sm:$0xff]  }
 0x1e3   : > { %v16970_v17 = vpop.f32.mrf.mxu0  ;;  %14484 = vmatpush3.msk.msra.mxu1 %vm249_vm0, %v12980_v55  ;;  %14446 = vmatprep.mubr.msk.f32.mxu0 %vm232_vm1, %v15002_v4  ;;  %v6076_v55 = vadd.f32 %v16931_v12, %v16926_v57  ;;  %v15020_v4 = vld [vmem:[%s15109_s25 + $0x82] ss:$8 sps:$4 sm:$0xff]   ;;  %v6071_v57 = vadd.f32 %v16940_v39, %v16936_v1  ;;  %v15024_v39 = vld [vmem:[%s15109_s25 + $0xb2] ss:$8 sps:$4 sm:$0xff]  }
 0x1e4   : > { %v16974_v15 = vpop.f32.mrf.mxu1  ;;  %14460 = vmatprep.mubr.msk.f32.mxu1 %vm232_vm1, %v15003_v3  ;;  %14497 = vmatprep.subr.msk.mxu0 %vm249_vm0, %v13006_v24  ;;  %v6256_v40 = vadd.f32 %v16970_v17, %v6051_v11  ;;  %v6431_v53 = vadd.f32 %v16966_v7, %v6257_v47  ;;  %v15021_v3 = vld [vmem:[%s15109_s25 + $0x81] ss:$8 sps:$4 sm:$0xff]  }
 0x1e5   : > { %v16978_v20 = vpop.f32.mrf.mxu0  ;;  %14447 = vmatmul.mubr.msk.f32.gmra.mxu0 %vm232_vm1, %v15004_v50  ;;  %14511 = vmatprep.subr.msk.mxu1 %vm249_vm0, %v13032_v29 }
 0x1e6   : > { %v16984_v32 = vpop.f32.mrf.mxu1  ;;  %14461 = vmatmul.mubr.msk.f32.gmra.mxu1 %vm232_vm1, %v15005_v41  ;;  %14449 = vmatprep.mubr.msk.f32.mxu0 %vm232_vm1, %v15006_v60  ;;  %v6259_v17 = vadd.f32 %v16978_v20, %v6066_v42  ;;  %v6430_v21 = vadd.f32 %v16974_v15, %v6256_v40  ;;  %v15022_v41 = vld [vmem:[%s15109_s25 + $0xa2] ss:$8 sps:$4 sm:$0xff]  }
 0x1e7   : > { %v16989_v8 = vpop.f32.mrf.mxu0  ;;  %14463 = vmatprep.mubr.msk.f32.mxu1 %vm232_vm1, %v15007_v26  ;;  %v15023_v26 = vld [vmem:[%s15109_s25 + $0xa1] ss:$8 sps:$4 sm:$0xff]  }
 0x1e8   : > { %v16995_v59 = vpop.f32.mrf.mxu1  ;;  %v6258_v7 = vadd.f32 %v16989_v8, %v6061_v44  ;;  %v6433_v15 = vadd.f32 %v16984_v32, %v6259_v17 }
 0x1e9   : > { %v17000_v61 = vpop.f32.mrf.mxu0  ;;  %14450 = vmatmul.mubr.msk.f32.gmra.mxu0 %vm232_vm1, %v15008_v58 }
 0x1ea   : > { %v17005_v9 = vpop.f32.mrf.mxu1  ;;  %14464 = vmatmul.mubr.msk.f32.gmra.mxu1 %vm232_vm1, %v15009_v23  ;;  %14452 = vmatprep.mubr.msk.f32.mxu0 %vm232_vm1, %v15010_v5  ;;  %v6261_v12 = vadd.f32 %v17000_v61, %v6076_v55  ;;  %v6086_v23 = vadd.f32 %v16948_v28, %v16944_v54  ;;  %v6432_v5 = vadd.f32 %v16995_v59, %v6258_v7 }
 0x1eb   : > { %v17010_v63 = vpop.f32.mrf.mxu0  ;;  %14466 = vmatprep.mubr.msk.f32.mxu1 %vm232_vm1, %v15011_v33  ;;  %v15025_v33 = vld [vmem:[%s15109_s25 + $0xb1] ss:$8 sps:$4 sm:$0xff]   ;;  %v6081_v54 = vadd.f32 %v16956_v52, %v16952_v18 }
 0x1ec   : > { %v17014_v10 = vpop.f32.mrf.mxu1  ;;  %v6260_v1 = vadd.f32 %v17010_v63, %v6071_v57  ;;  %v6435_v28 = vadd.f32 %v17005_v9, %v6261_v12 }
 0x1ed   : > { %v17018_v16 = vpop.f32.mrf.mxu0  ;;  %14453 = vmatmul.mubr.msk.f32.gmra.mxu0 %vm232_vm1, %v15012_v22 }
 0x1ee   : > { %v17022_v62 = vpop.f32.mrf.mxu1  ;;  %14467 = vmatmul.mubr.msk.f32.gmra.mxu1 %vm232_vm1, %v15013_v0  ;;  %14471 = vmatprep.mubr.msk.f32.mxu0 %vm232_vm1, %v15014_v49  ;;  %v6263_v63 = vadd.f32 %v17018_v16, %v6086_v23  ;;  %v6434_v18 = vadd.f32 %v17014_v10, %v6260_v1  ;;  %v15028_v16 = vld [vmem:[%s15109_s25 + $0xe2] ss:$8 sps:$4 sm:$0xff]  }
 0x1ef   : > { %v17026_v25 = vpop.f32.mrf.mxu0  ;;  %14485 = vmatprep.mubr.msk.f32.mxu1 %vm232_vm1, %v15015_v30 }
 0x1f0   : > { %v17030_v51 = vpop.f32.mrf.mxu1  ;;  %v6262_v52 = vadd.f32 %v17026_v25, %v6081_v54  ;;  %v15030_v25 = vld [vmem:[%s15109_s25 + $0x3a] ss:$8 sps:$4 sm:$0xff]  }
 0x1f1   : > { %v14137_v46 = vpop.f32.mrf.mxu0  ;;  %14472 = vmatmul.mubr.msk.f32.vlgmr.msra.gmra.mxu0 %vm232_vm1, %v15016_v2 }
 0x1f2   : > { %v17036_v37 = vpop.f32.mrf.mxu1  ;;  %14486 = vmatmul.mubr.msk.f32.vlgmr.msra.gmra.mxu1 %vm232_vm1, %v15017_v43  ;;  %14498 = vmatpush3.msk.msra.mxu0 %vm249_vm0, %v13006_v24  ;;  %v6605_v20 = vadd.f32 %v14137_v46, %v6431_v53  ;;  %v6437_v43 = vadd.f32 %v17022_v62, %v6263_v63  ;;  %v6436_v62 = vadd.f32 %v17030_v51, %v6262_v52  ;;  %v15032_v53 = vld [vmem:[%s15109_s25 + $0x4a] ss:$8 sps:$4 sm:$0xff]  }
 0x1f3   : > { %v6565_v38 = vpop.f32.mrf.mxu0  ;;  %14512 = vmatpush3.msk.msra.mxu1 %vm249_vm0, %v13032_v29  ;;  %14474 = vmatprep.mubr.msk.f32.mxu0 %vm232_vm1, %v15018_v36 }
 0x1f4   : > { %v17042_v6 = vpop.f32.mrf.mxu1  ;;  %14488 = vmatprep.mubr.msk.f32.mxu1 %vm232_vm1, %v15019_v27  ;;  %v6604_v8 = vadd.f32 %v6565_v38, %v6430_v21  ;;  %v6779_v32 = vadd.f32 %v17036_v37, %v6605_v20  ;;  %v15026_v38 = vld [vmem:[%s15109_s25 + $0xd2] ss:$8 sps:$4 sm:$0xff]  }
 0x1f5   : > { %v14140_v45 = vpop.f32.mrf.mxu0  ;;  %14475 = vmatmul.mubr.msk.f32.gmra.mxu0 %vm232_vm1, %v15020_v4  ;;  %v15033_v27 = vld [vmem:[%s15109_s25 + $0x49] ss:$8 sps:$4 sm:$0xff]  }
 0x1f6   : > { %v17059_v13 = vpop.f32.mrf.mxu1  ;;  %14489 = vmatmul.mubr.msk.f32.gmra.mxu1 %vm232_vm1, %v15021_v3  ;;  %14477 = vmatprep.mubr.msk.f32.mxu0 %vm232_vm1, %v15022_v41  ;;  %v6607_v46 = vadd.f32 %v14140_v45, %v6433_v15  ;;  %v6778_v37 = vadd.f32 %v17042_v6, %v6604_v8  ;;  %v15029_v6 = vld [vmem:[%s15109_s25 + $0xe1] ss:$8 sps:$4 sm:$0xff]  }
 0x1f7   : > { %v6575_v14 = vpop.f32.mrf.mxu0  ;;  %14491 = vmatprep.mubr.msk.f32.mxu1 %vm232_vm1, %v15023_v26  ;;  %v15034_v21 = vld [vmem:[%s15109_s25 + $0x6a] ss:$8 sps:$4 sm:$0xff]   ;;  %v15037_v26 = vld [vmem:[%s15109_s25 + $0x79] ss:$8 sps:$4 sm:$0xff]  }
 0x1f8   : > { %v17070_v34 = vpop.f32.mrf.mxu1  ;;  %v6606_v0 = vadd.f32 %v6575_v14, %v6432_v5  ;;  %v6781_v45 = vadd.f32 %v17059_v13, %v6607_v46  ;;  %v15031_v13 = vld [vmem:[%s15109_s25 + $0x39] ss:$8 sps:$4 sm:$0xff]   ;;  %v15035_v3 = vld [vmem:[%s15109_s25 + $0x69] ss:$8 sps:$4 sm:$0xff]  }
 0x1f9   : > { %v14143_v35 = vpop.f32.mrf.mxu0  ;;  %14478 = vmatmul.mubr.msk.f32.gmra.mxu0 %vm232_vm1, %v15024_v39  ;;  %v15038_v5 = vld [vmem:[%s15109_s25 + $0x9a] ss:$8 sps:$4 sm:$0xff]  }
 0x1fa   : > { %v17081_v48 = vpop.f32.mrf.mxu1  ;;  %14492 = vmatmul.mubr.msk.f32.gmra.mxu1 %vm232_vm1, %v15025_v33  ;;  %v6609_v9 = vadd.f32 %v14143_v35, %v6435_v28  ;;  %14480 = vmatprep.mubr.msk.f32.mxu0 %vm232_vm1, %v15026_v38  ;;  %v6780_v42 = vadd.f32 %v17070_v34, %v6606_v0  ;;  %v15040_v38 = vld [vmem:[%s15109_s25 + $0xaa] ss:$8 sps:$4 sm:$0xff]  }
 0x1fb   : > { %v6585_v19 = vpop.f32.mrf.mxu0  ;;  %14494 = vmatprep.mubr.msk.f32.mxu1 %vm232_vm1, %v15027_v31 }
 0x1fc   : > { %v17092_v50 = vpop.f32.mrf.mxu1  ;;  %v6608_v10 = vadd.f32 %v6585_v19, %v6434_v18  ;;  %v6783_v44 = vadd.f32 %v17081_v48, %v6609_v9  ;;  %v15043_v18 = vld [vmem:[%s15109_s25 + $0xc9] ss:$8 sps:$4 sm:$0xff]  }
 0x1fd   : > { %v14146_v60 = vpop.f32.mrf.mxu0  ;;  %14481 = vmatmul.mubr.msk.f32.gmra.mxu0 %vm232_vm1, %v15028_v16 }
 0x1fe   : > { %v17102_v58 = vpop.f32.mrf.mxu1  ;;  %14495 = vmatmul.mubr.msk.f32.gmra.mxu1 %vm232_vm1, %v15029_v6  ;;  %14499 = vmatprep.mubr.msk.f32.mxu0 %vm232_vm1, %v15030_v25  ;;  %v6611_v34 = vadd.f32 %v14146_v60, %v6437_v43  ;;  %v6782_v48 = vadd.f32 %v17092_v50, %v6608_v10  ;;  %v15036_v50 = vld [vmem:[%s15109_s25 + $0x7a] ss:$8 sps:$4 sm:$0xff]  }
 0x1ff   : > { %v6595_v61 = vpop.f32.mrf.mxu0  ;;  %14513 = vmatprep.mubr.msk.f32.mxu1 %vm232_vm1, %v15031_v13  ;;  %v15045_v6 = vld [vmem:[%s15109_s25 + $0xd9] ss:$8 sps:$4 sm:$0xff]  }
 0x200   : > { %v17113_v22 = vpop.f32.mrf.mxu1  ;;  %v6610_v20 = vadd.f32 %v6595_v61, %v6436_v62  ;;  %v6785_v8 = vadd.f32 %v17102_v58, %v6611_v34  ;;  %v15039_v58 = vld [vmem:[%s15109_s25 + $0x99] ss:$8 sps:$4 sm:$0xff]  }
 0x201   : > { %v14165_v59 = vpop.f32.mrf.mxu0  ;;  %14500 = vmatmul.mubr.msk.f32.vlgmr.msra.gmra.mxu0 %vm232_vm1, %v15032_v53 }
 0x202   : > { %v6953_v49 = vadd.f32 %v14165_v59, %v6779_v32  ;;  %v14179_v30 = vpop.f32.mrf.mxu1  ;;  %14514 = vmatmul.mubr.msk.f32.vlgmr.msra.gmra.mxu1 %vm232_vm1, %v15033_v27  ;;  %14502 = vmatprep.mubr.msk.f32.mxu0 %vm232_vm1, %v15034_v21  ;;  %v6784_v46 = vadd.f32 %v17113_v22, %v6610_v20  ;;  %v15041_v22 = vld [vmem:[%s15109_s25 + $0xa9] ss:$8 sps:$4 sm:$0xff]  }
 0x203   : > { %v6913_v24 = vpop.f32.mrf.mxu0  ;;  %14516 = vmatprep.mubr.msk.f32.mxu1 %vm232_vm1, %v15035_v3 }
 0x204   : > { %v7127_v11 = vadd.f32 %v14179_v30, %v6953_v49  ;;  %v6952_v47 = vadd.f32 %v6913_v24, %v6778_v37  ;;  %v7087_v2 = vpop.f32.mrf.mxu1  ;;  %v15042_v30 = vld [vmem:[%s15109_s25 + $0xca] ss:$8 sps:$4 sm:$0xff]   ;;  %v15044_v24 = vld [vmem:[%s15109_s25 + $0xda] ss:$8 sps:$4 sm:$0xff]  }
 0x205   : > { %v14168_v14 = vpop.f32.mrf.mxu0  ;;  %14503 = vmatmul.mubr.msk.f32.gmra.mxu0 %vm232_vm1, %v15036_v50 }
 0x206   : > { %v7135_v40 = vadd.f32 %v16822_v56, %v7127_v11  ;;  %v7126_v29 = vadd.f32 %v7087_v2, %v6952_v47  ;;  %v6955_v36 = vadd.f32 %v14168_v14, %v6781_v45  ;;  %v14182_v35 = vpop.f32.mrf.mxu1  ;;  %14517 = vmatmul.mubr.msk.f32.gmra.mxu1 %vm232_vm1, %v15037_v26  ;;  %14505 = vmatprep.mubr.msk.f32.mxu0 %vm232_vm1, %v15038_v5  ;;  %v17194_v11 = vld [vmem:[%s17278_s2] ss:$0 sm:$0xff] }
 0x207   : > { %v6923_v17 = vpop.f32.mrf.mxu0  ;;  %14519 = vmatprep.mubr.msk.f32.mxu1 %vm232_vm1, %v15039_v58 }
 0x208   : > { %12395 = vst.msk [vmem:[%s15864_s13 + $0x108] sm:$0xff] %vm1566_vm2, %v7135_v40  ;;  %v7134_v55 = vadd.f32 %v16822_v56, %v7126_v29  ;;  %v7129_v4 = vadd.f32 %v14182_v35, %v6955_v36  ;;  %v6954_v19 = vadd.f32 %v6923_v17, %v6780_v42  ;;  %v7097_v51 = vpop.f32.mrf.mxu1 }
 0x209   : > { %v14171_v7 = vpop.f32.mrf.mxu0  ;;  %14506 = vmatmul.mubr.msk.f32.gmra.mxu0 %vm232_vm1, %v15040_v38 }
 0x20a   : > { %12394 = vst.msk [vmem:[%s15864_s13 + $0x100] sm:$0xff] %vm1566_vm2, %v7134_v55  ;;  %v7137_v57 = vadd.f32 %v16822_v56, %v7129_v4  ;;  %v7128_v12 = vadd.f32 %v7097_v51, %v6954_v19  ;;  %v6957_v41 = vadd.f32 %v14171_v7, %v6783_v44  ;;  %v14185_v60 = vpop.f32.mrf.mxu1  ;;  %14520 = vmatmul.mubr.msk.f32.gmra.mxu1 %vm232_vm1, %v15041_v22 }
 0x20b   : > { %v6933_v15 = vpop.f32.mrf.mxu0  ;;  %14508 = vmatprep.mubr.msk.f32.mxu0 %vm232_vm1, %v15042_v30  ;;  %14522 = vmatprep.mubr.msk.f32.mxu1 %vm232_vm1, %v15043_v18 }
 0x20c   : > { %12397 = vst.msk [vmem:[%s15864_s13 + $0x118] sm:$0xff] %vm1566_vm2, %v7137_v57  ;;  %v7136_v23 = vadd.f32 %v16822_v56, %v7128_v12  ;;  %v7131_v1 = vadd.f32 %v14185_v60, %v6957_v41  ;;  %v6956_v39 = vadd.f32 %v6933_v15, %v6782_v48  ;;  %v7107_v61 = vpop.f32.mrf.mxu1 }
 0x20d   : > { %v14174_v32 = vpop.f32.mrf.mxu0  ;;  %14509 = vmatmul.mubr.msk.f32.gmra.mxu0 %vm232_vm1, %v15044_v24 }
 0x20e   : > { %12396 = vst.msk [vmem:[%s15864_s13 + $0x110] sm:$0xff] %vm1566_vm2, %v7136_v23  ;;  %v7139_v33 = vadd.f32 %v16822_v56, %v7131_v1  ;;  %v7130_v54 = vadd.f32 %v7107_v61, %v6956_v39  ;;  %v6959_v28 = vadd.f32 %v14174_v32, %v6785_v8  ;;  %v14188_v63 = vpop.f32.mrf.mxu1  ;;  %14523 = vmatmul.mubr.msk.f32.gmra.mxu1 %vm232_vm1, %v15045_v6 }
 0x20f   : > { %v6943_v59 = vpop.f32.mrf.mxu0 }
 0x210   : > { %12399 = vst.msk [vmem:[%s15864_s13 + $0x128] sm:$0xff] %vm1566_vm2, %v7139_v33  ;;  %v7138_v37 = vadd.f32 %v16822_v56, %v7130_v54  ;;  %v7133_v0 = vadd.f32 %v14188_v63, %v6959_v28  ;;  %v6958_v31 = vadd.f32 %v6943_v59, %v6784_v46  ;;  %v7117_v49 = vpop.f32.mrf.mxu1 }
 0x211   : > { %v14193_v16 = vpop.f32.mrf.mxu0 }
 0x212   : > { %12398 = vst.msk [vmem:[%s15864_s13 + $0x120] sm:$0xff] %vm1566_vm2, %v7138_v37  ;;  %v7141_v52 = vadd.f32 %v16822_v56, %v7133_v0  ;;  %v7132_v9 = vadd.f32 %v7117_v49, %v6958_v31  ;;  %v14207_v45 = vpop.f32.mrf.mxu1 }
 0x213   : > { %v7296_v2 = vpop.f32.mrf.mxu0  ;;  %v7450_v26 = vadd.f32 %v14207_v45, %v14193_v16 }
 0x214   : > { %12401 = vst.msk [vmem:[%s15864_s13 + $0x138] sm:$0xff] %vm1566_vm2, %v7141_v52  ;;  %v7140_v47 = vadd.f32 %v17194_v11, %v7132_v9  ;;  %v7444_v56 = vpop.f32.mrf.mxu1 }
 0x215   : > { %v14196_v43 = vpop.f32.mrf.mxu0  ;;  %v7445_v39 = vadd.f32 %v7444_v56, %v7296_v2 }
 0x216   : > { %12400 = vst.msk [vmem:[%s15864_s13 + $0x130] sm:$0xff] %vm1566_vm2, %v7140_v47  ;;  %v14210_v10 = vpop.f32.mrf.mxu1 }
 0x217   : > { %v7306_v25 = vpop.f32.mrf.mxu0  ;;  %v7460_v46 = vadd.f32 %v14210_v10, %v14196_v43 }
 0x218   : > { %v7454_v14 = vpop.f32.mrf.mxu1 }
 0x219   : > { %v14199_v42 = vpop.f32.mrf.mxu0  ;;  %v7455_v28 = vadd.f32 %v7454_v14, %v7306_v25 }
 0x21a   : > { %v14213_v13 = vpop.f32.mrf.mxu1 }
 0x21b   : > { %v7316_v40 = vpop.f32.mrf.mxu0  ;;  %v7470_v22 = vadd.f32 %v14213_v13, %v14199_v42 }
 0x21c   : > { %v7464_v29 = vpop.f32.mrf.mxu1 }
 0x21d   : > { %v14202_v36 = vpop.f32.mrf.mxu0  ;;  %v7465_v18 = vadd.f32 %v7464_v29, %v7316_v40 }
 0x21e   : > { %v14216_v35 = vpop.f32.mrf.mxu1 }
 0x21f   : > { %v7326_v62 = vpop.f32.mrf.mxu0  ;;  %v7480_v6 = vadd.f32 %v14216_v35, %v14202_v36 }
 0x220   : > { %v7474_v44 = vpop.f32.mrf.mxu1 }
 0x221   : > { %v14221_v53 = vpop.f32.mrf.mxu0  ;;  %v7475_v25 = vadd.f32 %v7474_v44, %v7326_v62 }
 0x222   : > { %v14235_v17 = vpop.f32.mrf.mxu1  ;;  %v7650_v61 = vadd.f32 %v14221_v53, %v7450_v26 }
 0x223   : > { %v7610_v34 = vpop.f32.mrf.mxu0 }
 0x224   : > { %v7784_v27 = vpop.f32.mrf.mxu1  ;;  %v7649_v58 = vadd.f32 %v7610_v34, %v7445_v39  ;;  %v7824_v63 = vadd.f32 %v14235_v17, %v7650_v61 }
 0x225   : > { %v14224_v55 = vpop.f32.mrf.mxu0 }
 0x226   : > { %v14238_v4 = vpop.f32.mrf.mxu1  ;;  %v7652_v38 = vadd.f32 %v14224_v55, %v7460_v46  ;;  %v7823_v0 = vadd.f32 %v7784_v27, %v7649_v58 }
 0x227   : > { %v7620_v19 = vpop.f32.mrf.mxu0 }
 0x228   : > { %v7794_v51 = vpop.f32.mrf.mxu1  ;;  %v7651_v31 = vadd.f32 %v7620_v19, %v7455_v28  ;;  %v7826_v16 = vadd.f32 %v14238_v4, %v7652_v38 }
 0x229   : > { %v14227_v48 = vpop.f32.mrf.mxu0 }
 0x22a   : > { %v14241_v21 = vpop.f32.mrf.mxu1  ;;  %v7654_v52 = vadd.f32 %v14227_v48, %v7470_v22  ;;  %v7825_v56 = vadd.f32 %v7794_v51, %v7651_v31 }
 0x22b   : > { %v7630_v7 = vpop.f32.mrf.mxu0 }
 0x22c   : > { %v7804_v20 = vpop.f32.mrf.mxu1  ;;  %v7653_v47 = vadd.f32 %v7630_v7, %v7465_v18  ;;  %v7828_v14 = vadd.f32 %v14241_v21, %v7654_v52 }
 0x22d   : > { %v14230_v3 = vpop.f32.mrf.mxu0 }
 0x22e   : > { %v14244_v57 = vpop.f32.mrf.mxu1  ;;  %v7656_v42 = vadd.f32 %v14230_v3, %v7480_v6  ;;  %v7827_v40 = vadd.f32 %v7804_v20, %v7653_v47 }
 0x22f   : > { %v7640_v12 = vpop.f32.mrf.mxu0 }
 0x230   : > { %v7814_v41 = vpop.f32.mrf.mxu1  ;;  %v7655_v29 = vadd.f32 %v7640_v12, %v7475_v25  ;;  %v7830_v51 = vadd.f32 %v14244_v57, %v7656_v42 }
 0x231   : > { %v14249_v60 = vpop.f32.mrf.mxu0 }
 0x232   : > { %v14263_v50 = vpop.f32.mrf.mxu1  ;;  %v7998_v49 = vadd.f32 %v14249_v60, %v7824_v63 }
 0x233   : > { %v7958_v15 = vpop.f32.mrf.mxu0 }
 0x234   : > { %v8132_v8 = vpop.f32.mrf.mxu1  ;;  %v7997_v24 = vadd.f32 %v7958_v15, %v7823_v0  ;;  %v8172_v43 = vadd.f32 %v14263_v50, %v7998_v49  ;;  %v7829_v15 = vadd.f32 %v7814_v41, %v7655_v29 }
 0x235   : > { %v14252_v23 = vpop.f32.mrf.mxu0 }
 0x236   : > { %v14266_v1 = vpop.f32.mrf.mxu1  ;;  %v8000_v10 = vadd.f32 %v14252_v23, %v7826_v16  ;;  %v8171_v53 = vadd.f32 %v8132_v8, %v7997_v24 }
 0x237   : > { %v7968_v5 = vpop.f32.mrf.mxu0 }
 0x238   : > { %v8142_v32 = vpop.f32.mrf.mxu1  ;;  %v7999_v17 = vadd.f32 %v7968_v5, %v7825_v56  ;;  %v8174_v19 = vadd.f32 %v14266_v1, %v8000_v10 }
 0x239   : > { %v14255_v33 = vpop.f32.mrf.mxu0 }
 0x23a   : > { %v14269_v54 = vpop.f32.mrf.mxu1  ;;  %v8002_v55 = vadd.f32 %v14255_v33, %v7828_v14  ;;  %v8173_v62 = vadd.f32 %v8142_v32, %v7999_v17 }
 0x23b   : > { %v7978_v59 = vpop.f32.mrf.mxu0 }
 0x23c   : > { %v8152_v37 = vpop.f32.mrf.mxu1  ;;  %v8001_v7 = vadd.f32 %v7978_v59, %v7827_v40  ;;  %v8176_v20 = vadd.f32 %v14269_v54, %v8002_v55 }
 0x23d   : > { %v14258_v30 = vpop.f32.mrf.mxu0 }
 0x23e   : > { %v14272_v9 = vpop.f32.mrf.mxu1  ;;  %v8004_v8 = vadd.f32 %v14258_v30, %v7830_v51  ;;  %v8175_v39 = vadd.f32 %v8152_v37, %v8001_v7 }
 0x23f   : > { %v7988_v45 = vpop.f32.mrf.mxu0 }
 0x240   : > { %v8162_v2 = vpop.f32.mrf.mxu1  ;;  %v8003_v5 = vadd.f32 %v7988_v45, %v7829_v15  ;;  %v8178_v54 = vadd.f32 %v14272_v9, %v8004_v8 }
 0x241   : > { %v14277_v13 = vpop.f32.mrf.mxu0 }
 0x242   : > { %v8346_v34 = vadd.f32 %v14277_v13, %v8172_v43  ;;  %v14291_v27 = vpop.f32.mrf.mxu1  ;;  %v8177_v37 = vadd.f32 %v8162_v2, %v8003_v5 }
 0x243   : > { %v8306_v4 = vpop.f32.mrf.mxu0 }
 0x244   : > { %v8520_v36 = vadd.f32 %v14291_v27, %v8346_v34  ;;  %v8345_v35 = vadd.f32 %v8306_v4, %v8171_v53  ;;  %v8480_v48 = vpop.f32.mrf.mxu1 }
 0x245   : > { %v14280_v60 = vpop.f32.mrf.mxu0 }
 0x246   : > { %v8528_v44 = vadd.f32 %v17194_v11, %v8520_v36  ;;  %v8519_v21 = vadd.f32 %v8480_v48, %v8345_v35  ;;  %v8348_v3 = vadd.f32 %v14280_v60, %v8174_v19  ;;  %v14294_v50 = vpop.f32.mrf.mxu1 }
 0x247   : > { %v8316_v12 = vpop.f32.mrf.mxu0 }
 0x248   : > { %12611 = vst.msk [vmem:[%s15864_s13 + $0x148] sm:$0xff] %vm1566_vm2, %v8528_v44  ;;  %v8527_v26 = vadd.f32 %v17194_v11, %v8519_v21  ;;  %v8522_v23 = vadd.f32 %v14294_v50, %v8348_v3  ;;  %v8347_v57 = vadd.f32 %v8316_v12, %v8173_v62  ;;  %v8490_v1 = vpop.f32.mrf.mxu1 }
 0x249   : > { %v14283_v61 = vpop.f32.mrf.mxu0 }
 0x24a   : > { %12610 = vst.msk [vmem:[%s15864_s13 + $0x140] sm:$0xff] %vm1566_vm2, %v8527_v26  ;;  %v8530_v32 = vadd.f32 %v17194_v11, %v8522_v23  ;;  %v8521_v41 = vadd.f32 %v8490_v1, %v8347_v57  ;;  %v8350_v46 = vadd.f32 %v14283_v61, %v8176_v20  ;;  %v14297_v58 = vpop.f32.mrf.mxu1 }
 0x24b   : > { %v8326_v33 = vpop.f32.mrf.mxu0 }
 0x24c   : > { %12613 = vst.msk [vmem:[%s15864_s13 + $0x158] sm:$0xff] %vm1566_vm2, %v8530_v32  ;;  %v8529_v28 = vadd.f32 %v17194_v11, %v8521_v41  ;;  %v8524_v63 = vadd.f32 %v14297_v58, %v8350_v46  ;;  %v8349_v38 = vadd.f32 %v8326_v33, %v8175_v39  ;;  %v8500_v59 = vpop.f32.mrf.mxu1 }
 0x24d   : > { %v14286_v22 = vpop.f32.mrf.mxu0 }
 0x24e   : > { %12612 = vst.msk [vmem:[%s15864_s13 + $0x150] sm:$0xff] %vm1566_vm2, %v8529_v28  ;;  %v8532_v0 = vadd.f32 %v17194_v11, %v8524_v63  ;;  %v8523_v31 = vadd.f32 %v8500_v59, %v8349_v38  ;;  %v8352_v49 = vadd.f32 %v14286_v22, %v8178_v54  ;;  %v14300_v30 = vpop.f32.mrf.mxu1 }
 0x24f   : > { %v8336_v18 = vpop.f32.mrf.mxu0 }
 0x250   : > { %12615 = vst.msk [vmem:[%s15864_s13 + $0x168] sm:$0xff] %vm1566_vm2, %v8532_v0  ;;  %v8531_v52 = vadd.f32 %v17194_v11, %v8523_v31  ;;  %v8526_v9 = vadd.f32 %v14300_v30, %v8352_v49  ;;  %v8351_v16 = vadd.f32 %v8336_v18, %v8177_v37  ;;  %v8510_v24 = vpop.f32.mrf.mxu1 }
 0x251   : > { %v14305_v45 = vpop.f32.mrf.mxu0 }
 0x252   : > { %12614 = vst.msk [vmem:[%s15864_s13 + $0x160] sm:$0xff] %vm1566_vm2, %v8531_v52  ;;  %v8534_v6 = vadd.f32 %v17194_v11, %v8526_v9  ;;  %v8525_v47 = vadd.f32 %v8510_v24, %v8351_v16  ;;  %v14319_v2 = vpop.f32.mrf.mxu1 }
 0x253   : > { %v8690_v56 = vpop.f32.mrf.mxu0  ;;  %v8844_v1 = vadd.f32 %v14319_v2, %v14305_v45 }
 0x254   : > { %12617 = vst.msk [vmem:[%s15864_s13 + $0x178] sm:$0xff] %vm1566_vm2, %v8534_v6  ;;  %v8533_v43 = vadd.f32 %v17194_v11, %v8525_v47  ;;  %v8838_v10 = vpop.f32.mrf.mxu1 }
 0x255   : > { %v14308_v25 = vpop.f32.mrf.mxu0  ;;  %v8839_v5 = vadd.f32 %v8838_v10, %v8690_v56 }
 0x256   : > { %12616 = vst.msk [vmem:[%s15864_s13 + $0x170] sm:$0xff] %vm1566_vm2, %v8533_v43  ;;  %v14322_v14 = vpop.f32.mrf.mxu1 }
 0x257   : > { %v8700_v42 = vpop.f32.mrf.mxu0  ;;  %v8854_v54 = vadd.f32 %v14322_v14, %v14308_v25 }
 0x258   : > { %v8848_v13 = vpop.f32.mrf.mxu1 }
 0x259   : > { %v14311_v53 = vpop.f32.mrf.mxu0  ;;  %v8849_v59 = vadd.f32 %v8848_v13, %v8700_v42 }
 0x25a   : > { %v14325_v17 = vpop.f32.mrf.mxu1 }
 0x25b   : > { %v8710_v34 = vpop.f32.mrf.mxu0  ;;  %v8864_v30 = vadd.f32 %v14325_v17, %v14311_v53 }
 0x25c   : > { %v8858_v27 = vpop.f32.mrf.mxu1 }
 0x25d   : > { %v14314_v40 = vpop.f32.mrf.mxu0  ;;  %v8859_v9 = vadd.f32 %v8858_v27, %v8710_v34 }
 0x25e   : > { %v14328_v29 = vpop.f32.mrf.mxu1 }
 0x25f   : > { %v8720_v55 = vpop.f32.mrf.mxu0  ;;  %v8874_v10 = vadd.f32 %v14328_v29, %v14314_v40 }
 0x260   : > { %v8868_v4 = vpop.f32.mrf.mxu1 }
 0x261   : > { %v14333_v19 = vpop.f32.mrf.mxu0  ;;  %v8869_v13 = vadd.f32 %v8868_v4, %v8720_v55 }
 0x262   : > { %v14347_v36 = vpop.f32.mrf.mxu1  ;;  %v9044_v32 = vadd.f32 %v14333_v19, %v8844_v1 }
 0x263   : > { %v9004_v35 = vpop.f32.mrf.mxu0 }
 0x264   : > { %v9178_v48 = vpop.f32.mrf.mxu1  ;;  %v9043_v58 = vadd.f32 %v9004_v35, %v8839_v5  ;;  %v9218_v63 = vadd.f32 %v14347_v36, %v9044_v32 }
 0x265   : > { %v14336_v51 = vpop.f32.mrf.mxu0 }
 0x266   : > { %v14350_v7 = vpop.f32.mrf.mxu1  ;;  %v9046_v22 = vadd.f32 %v14336_v51, %v8854_v54  ;;  %v9217_v0 = vadd.f32 %v9178_v48, %v9043_v58 }
 0x267   : > { %v9014_v60 = vpop.f32.mrf.mxu0 }
 0x268   : > { %v9188_v62 = vpop.f32.mrf.mxu1  ;;  %v9045_v18 = vadd.f32 %v9014_v60, %v8849_v59  ;;  %v9220_v45 = vadd.f32 %v14350_v7, %v9046_v22 }
 0x269   : > { %v14339_v44 = vpop.f32.mrf.mxu0 }
 0x26a   : > { %v14353_v21 = vpop.f32.mrf.mxu1  ;;  %v9048_v6 = vadd.f32 %v14339_v44, %v8864_v30  ;;  %v9219_v25 = vadd.f32 %v9188_v62, %v9045_v18 }
 0x26b   : > { %v9024_v3 = vpop.f32.mrf.mxu0 }
 0x26c   : > { %v9198_v50 = vpop.f32.mrf.mxu1  ;;  %v9047_v2 = vadd.f32 %v9024_v3, %v8859_v9  ;;  %v9222_v53 = vadd.f32 %v14353_v21, %v9048_v6 }
 0x26d   : > { %v14342_v15 = vpop.f32.mrf.mxu0 }
 0x26e   : > { %v14356_v20 = vpop.f32.mrf.mxu1  ;;  %v9050_v17 = vadd.f32 %v14342_v15, %v8874_v10  ;;  %v9221_v27 = vadd.f32 %v9198_v50, %v9047_v2 }
 0x26f   : > { %v9034_v12 = vpop.f32.mrf.mxu0 }
 0x270   : > { %v9208_v8 = vpop.f32.mrf.mxu1  ;;  %v9049_v51 = vadd.f32 %v9034_v12, %v8869_v13  ;;  %v9224_v4 = vadd.f32 %v14356_v20, %v9050_v17 }
 0x271   : > { %v14361_v26 = vpop.f32.mrf.mxu0 }
 0x272   : > { %v14375_v23 = vpop.f32.mrf.mxu1  ;;  %v9392_v31 = vadd.f32 %v14361_v26, %v9218_v63 }
 0x273   : > { %v9352_v57 = vpop.f32.mrf.mxu0 }
 0x274   : > { %v9526_v39 = vpop.f32.mrf.mxu1  ;;  %v9391_v16 = vadd.f32 %v9352_v57, %v9217_v0  ;;  %v9566_v56 = vadd.f32 %v14375_v23, %v9392_v31  ;;  %v9223_v57 = vadd.f32 %v9208_v8, %v9049_v51 }
 0x275   : > { %v14364_v61 = vpop.f32.mrf.mxu0 }
 0x276   : > { %v14378_v41 = vpop.f32.mrf.mxu1  ;;  %v9394_v14 = vadd.f32 %v14364_v61, %v9220_v45  ;;  %v9565_v19 = vadd.f32 %v9526_v39, %v9391_v16 }
 0x277   : > { %v9362_v46 = vpop.f32.mrf.mxu0 }
 0x278   : > { %v9536_v33 = vpop.f32.mrf.mxu1  ;;  %v9393_v48 = vadd.f32 %v9362_v46, %v9219_v25  ;;  %v9568_v3 = vadd.f32 %v14378_v41, %v9394_v14 }
 0x279   : > { %v14367_v28 = vpop.f32.mrf.mxu0 }
 0x27a   : > { %v14381_v38 = vpop.f32.mrf.mxu1  ;;  %v9396_v26 = vadd.f32 %v14367_v28, %v9222_v53  ;;  %v9567_v23 = vadd.f32 %v9536_v33, %v9393_v48 }
 0x27b   : > { %v9372_v37 = vpop.f32.mrf.mxu0 }
 0x27c   : > { %v9546_v49 = vpop.f32.mrf.mxu1  ;;  %v9395_v40 = vadd.f32 %v9372_v37, %v9221_v27  ;;  %v9570_v1 = vadd.f32 %v14381_v38, %v9396_v26 }
 0x27d   : > { %v14370_v52 = vpop.f32.mrf.mxu0 }
 0x27e   : > { %v14384_v24 = vpop.f32.mrf.mxu1  ;;  %v9398_v39 = vadd.f32 %v14370_v52, %v9224_v4  ;;  %v9569_v41 = vadd.f32 %v9546_v49, %v9395_v40 }
 0x27f   : > { %v9382_v47 = vpop.f32.mrf.mxu0 }
 0x280   : > { %v9556_v43 = vpop.f32.mrf.mxu1  ;;  %v9397_v46 = vadd.f32 %v9382_v47, %v9223_v57  ;;  %v9572_v63 = vadd.f32 %v14384_v24, %v9398_v39 }
 0x281   : > { %v14389_v42 = vpop.f32.mrf.mxu0 }
 0x282   : > { %v9740_v36 = vadd.f32 %v14389_v42, %v9566_v56  ;;  %v14403_v35 = vpop.f32.mrf.mxu1  ;;  %v9571_v31 = vadd.f32 %v9556_v43, %v9397_v46 }
 0x283   : > { %v9700_v34 = vpop.f32.mrf.mxu0 }
 0x284   : > { %v9914_v7 = vadd.f32 %v14403_v35, %v9740_v36  ;;  %v9739_v60 = vadd.f32 %v9700_v34, %v9565_v19  ;;  %v9874_v44 = vpop.f32.mrf.mxu1 }
 0x285   : > { %v14392_v55 = vpop.f32.mrf.mxu0 }
 0x286   : > { %v9922_v29 = vadd.f32 %v17194_v11, %v9914_v7  ;;  %v9913_v62 = vadd.f32 %v9874_v44, %v9739_v60  ;;  %v9742_v21 = vadd.f32 %v14392_v55, %v9568_v3  ;;  %v14406_v15 = vpop.f32.mrf.mxu1 }
 0x287   : > { %v9710_v12 = vpop.f32.mrf.mxu0 }
 0x288   : > { %12827 = vst.msk [vmem:[%s15864_s13 + $0x188] sm:$0xff] %vm1566_vm2, %v9922_v29  ;;  %v9921_v50 = vadd.f32 %v17194_v11, %v9913_v62  ;;  %v9916_v61 = vadd.f32 %v14406_v15, %v9742_v21  ;;  %v9741_v5 = vadd.f32 %v9710_v12, %v9567_v23  ;;  %v9884_v32 = vpop.f32.mrf.mxu1 }
 0x289   : > { %v14395_v20 = vpop.f32.mrf.mxu0 }
 0x28a   : > { %12826 = vst.msk [vmem:[%s15864_s13 + $0x180] sm:$0xff] %vm1566_vm2, %v9921_v50  ;;  %v9924_v58 = vadd.f32 %v17194_v11, %v9916_v61  ;;  %v9915_v8 = vadd.f32 %v9884_v32, %v9741_v5  ;;  %v9744_v33 = vadd.f32 %v14395_v20, %v9570_v1  ;;  %v14409_v54 = vpop.f32.mrf.mxu1 }
 0x28b   : > { %v9720_v28 = vpop.f32.mrf.mxu0 }
 0x28c   : > { %12829 = vst.msk [vmem:[%s15864_s13 + $0x198] sm:$0xff] %vm1566_vm2, %v9924_v58  ;;  %v9923_v38 = vadd.f32 %v17194_v11, %v9915_v8  ;;  %v9918_v59 = vadd.f32 %v14409_v54, %v9744_v33  ;;  %v9743_v22 = vadd.f32 %v9720_v28, %v9569_v41  ;;  %v9894_v37 = vpop.f32.mrf.mxu1 }
 0x28d   : > { %v14398_v0 = vpop.f32.mrf.mxu0 }
 0x28e   : > { %12828 = vst.msk [vmem:[%s15864_s13 + $0x190] sm:$0xff] %vm1566_vm2, %v9923_v38  ;;  %v9926_v49 = vadd.f32 %v17194_v11, %v9918_v59  ;;  %v9917_v30 = vadd.f32 %v9894_v37, %v9743_v22  ;;  %v9746_v18 = vadd.f32 %v14398_v0, %v9572_v63  ;;  %v14412_v52 = vpop.f32.mrf.mxu1 }
 0x28f   : > { %v9730_v9 = vpop.f32.mrf.mxu0 }
 0x290   : > { %12831 = vst.msk [vmem:[%s15864_s13 + $0x1a8] sm:$0xff] %vm1566_vm2, %v9926_v49  ;;  %v9925_v16 = vadd.f32 %v17194_v11, %v9917_v30  ;;  %v9920_v24 = vadd.f32 %v14412_v52, %v9746_v18  ;;  %v9745_v45 = vadd.f32 %v9730_v9, %v9571_v31  ;;  %v9904_v6 = vpop.f32.mrf.mxu1 }
 0x291   : > { %v14417_v47 = vpop.f32.mrf.mxu0 }
 0x292   : > { %12830 = vst.msk [vmem:[%s15864_s13 + $0x1a0] sm:$0xff] %vm1566_vm2, %v9925_v16  ;;  %v9928_v2 = vadd.f32 %v17194_v11, %v9920_v24  ;;  %v9919_v56 = vadd.f32 %v9904_v6, %v9745_v45  ;;  %v14431_v43 = vpop.f32.mrf.mxu1 }
 0x293   : > { %v10083_v10 = vpop.f32.mrf.mxu0  ;;  %v10237_v41 = vadd.f32 %v14431_v43, %v14417_v47 }
 0x294   : > { %12833 = vst.msk [vmem:[%s15864_s13 + $0x1b8] sm:$0xff] %vm1566_vm2, %v9928_v2  ;;  %v9927_v25 = vadd.f32 %v17194_v11, %v9919_v56  ;;  %v10231_v14 = vpop.f32.mrf.mxu1 }
 0x295   : > { %v14420_v42 = vpop.f32.mrf.mxu0  ;;  %v10232_v46 = vadd.f32 %v10231_v14, %v10083_v10 }
 0x296   : > { %12832 = vst.msk [vmem:[%s15864_s13 + $0x1b0] sm:$0xff] %vm1566_vm2, %v9927_v25  ;;  %v14434_v13 = vpop.f32.mrf.mxu1 }
 0x297   : > { %v10093_v19 = vpop.f32.mrf.mxu0  ;;  %v10247_v54 = vadd.f32 %v14434_v13, %v14420_v42 }
 0x298   : > { %v10241_v36 = vpop.f32.mrf.mxu1 }
 0x299   : > { %v14423_v35 = vpop.f32.mrf.mxu0  ;;  %v10242_v59 = vadd.f32 %v10241_v36, %v10093_v19 }
 0x29a   : > { %v14437_v53 = vpop.f32.mrf.mxu1 }
 0x29b   : > { %v10103_v17 = vpop.f32.mrf.mxu0  ;;  %v10257_v31 = vadd.f32 %v14437_v53, %v14423_v35 }
 0x29c   : > { %v10251_v48 = vpop.f32.mrf.mxu1 }
 0x29d   : > { %v14426_v34 = vpop.f32.mrf.mxu0  ;;  %v10252_v16 = vadd.f32 %v10251_v48, %v10103_v17 }
 0x29e   : > { %v14440_v27 = vpop.f32.mrf.mxu1 }
 0x29f   : > { %v10113_v51 = vpop.f32.mrf.mxu0  ;;  %v10267_v56 = vadd.f32 %v14440_v27, %v14426_v34 }
 0x2a0   : > { %v10261_v7 = vpop.f32.mrf.mxu1 }
 0x2a1   : > { %v14445_v60 = vpop.f32.mrf.mxu0  ;;  %v10262_v19 = vadd.f32 %v10261_v7, %v10113_v51 }
 0x2a2   : > { %v14459_v44 = vpop.f32.mrf.mxu1  ;;  %v10437_v58 = vadd.f32 %v14445_v60, %v10237_v41 }
 0x2a3   : > { %v10397_v3 = vpop.f32.mrf.mxu0 }
 0x2a4   : > { %v10571_v26 = vpop.f32.mrf.mxu1  ;;  %v10436_v28 = vadd.f32 %v10397_v3, %v10232_v46  ;;  %v10611_v22 = vadd.f32 %v14459_v44, %v10437_v58 }
 0x2a5   : > { %v14448_v40 = vpop.f32.mrf.mxu0 }
 0x2a6   : > { %v14462_v29 = vpop.f32.mrf.mxu1  ;;  %v10439_v37 = vadd.f32 %v14448_v40, %v10247_v54  ;;  %v10610_v30 = vadd.f32 %v10571_v26, %v10436_v28 }
 0x2a7   : > { %v10407_v62 = vpop.f32.mrf.mxu0 }
 0x2a8   : > { %v10581_v55 = vpop.f32.mrf.mxu1  ;;  %v10438_v18 = vadd.f32 %v10407_v62, %v10242_v59  ;;  %v10613_v6 = vadd.f32 %v14462_v29, %v10439_v37 }
 0x2a9   : > { %v14451_v4 = vpop.f32.mrf.mxu0 }
 0x2aa   : > { %v14465_v23 = vpop.f32.mrf.mxu1  ;;  %v10441_v24 = vadd.f32 %v14451_v4, %v10257_v31  ;;  %v10612_v25 = vadd.f32 %v10581_v55, %v10438_v18 }
 0x2ab   : > { %v10417_v21 = vpop.f32.mrf.mxu0 }
 0x2ac   : > { %v10591_v15 = vpop.f32.mrf.mxu1  ;;  %v10440_v43 = vadd.f32 %v10417_v21, %v10252_v16  ;;  %v10615_v36 = vadd.f32 %v14465_v23, %v10441_v24 }
 0x2ad   : > { %v14454_v57 = vpop.f32.mrf.mxu0 }
 0x2ae   : > { %v14468_v50 = vpop.f32.mrf.mxu1  ;;  %v10443_v35 = vadd.f32 %v14454_v57, %v10267_v56  ;;  %v10614_v48 = vadd.f32 %v10591_v15, %v10440_v43 }
 0x2af   : > { %v10427_v12 = vpop.f32.mrf.mxu0 }
 0x2b0   : > { %v10601_v1 = vpop.f32.mrf.mxu1  ;;  %v10442_v26 = vadd.f32 %v10427_v12, %v10262_v19  ;;  %v10617_v4 = vadd.f32 %v14468_v50, %v10443_v35 }
 0x2b1   : > { %v14473_v39 = vpop.f32.mrf.mxu0 }
 0x2b2   : > { %v14487_v61 = vpop.f32.mrf.mxu1  ;;  %v10785_v52 = vadd.f32 %v14473_v39, %v10611_v22 }
 0x2b3   : > { %v10745_v5 = vpop.f32.mrf.mxu0 }
 0x2b4   : > { %v10919_v32 = vpop.f32.mrf.mxu1  ;;  %v10784_v47 = vadd.f32 %v10745_v5, %v10610_v30  ;;  %v10959_v14 = vadd.f32 %v14487_v61, %v10785_v52  ;;  %v10616_v5 = vadd.f32 %v10601_v1, %v10442_v26 }
 0x2b5   : > { %v14476_v20 = vpop.f32.mrf.mxu0 }
 0x2b6   : > { %v14490_v8 = vpop.f32.mrf.mxu1  ;;  %v10787_v42 = vadd.f32 %v14476_v20, %v10613_v6  ;;  %v10958_v60 = vadd.f32 %v10919_v32, %v10784_v47 }
 0x2b7   : > { %v10755_v33 = vpop.f32.mrf.mxu0 }
 0x2b8   : > { %v10929_v63 = vpop.f32.mrf.mxu1  ;;  %v10786_v44 = vadd.f32 %v10755_v33, %v10612_v25  ;;  %v10961_v62 = vadd.f32 %v14490_v8, %v10787_v42 }
 0x2b9   : > { %v14479_v38 = vpop.f32.mrf.mxu0 }
 0x2ba   : > { %v14493_v0 = vpop.f32.mrf.mxu1  ;;  %v10789_v40 = vadd.f32 %v14479_v38, %v10615_v36  ;;  %v10960_v51 = vadd.f32 %v10929_v63, %v10786_v44 }
 0x2bb   : > { %v10765_v49 = vpop.f32.mrf.mxu0 }
 0x2bc   : > { %v10939_v9 = vpop.f32.mrf.mxu1  ;;  %v10788_v21 = vadd.f32 %v10765_v49, %v10614_v48  ;;  %v10963_v15 = vadd.f32 %v14493_v0, %v10789_v40 }
 0x2bd   : > { %v14482_v45 = vpop.f32.mrf.mxu0 }
 0x2be   : > { %v14496_v2 = vpop.f32.mrf.mxu1  ;;  %v10791_v32 = vadd.f32 %v14482_v45, %v10617_v4  ;;  %v10962_v58 = vadd.f32 %v10939_v9, %v10788_v21 }
 0x2bf   : > { %v10775_v10 = vpop.f32.mrf.mxu0 }
 0x2c0   : > { %v10949_v13 = vpop.f32.mrf.mxu1  ;;  %v10790_v33 = vadd.f32 %v10775_v10, %v10616_v5  ;;  %v10965_v59 = vadd.f32 %v14496_v2, %v10791_v32 }
 0x2c1   : > { %v14501_v53 = vpop.f32.mrf.mxu0 }
 0x2c2   : > { %v11133_v3 = vadd.f32 %v14501_v53, %v10959_v14  ;;  %v14515_v17 = vpop.f32.mrf.mxu1  ;;  %v10964_v30 = vadd.f32 %v10949_v13, %v10790_v33 }
 0x2c3   : > { %v11093_v29 = vpop.f32.mrf.mxu0 }
 0x2c4   : > { %v11307_v34 = vadd.f32 %v14515_v17, %v11133_v3  ;;  %v11132_v27 = vadd.f32 %v11093_v29, %v10958_v60  ;;  %v11267_v55 = vpop.f32.mrf.mxu1 }
 0x2c5   : > { %v14504_v39 = vpop.f32.mrf.mxu0 }
 0x2c6   : > { %v11315_v7 = vadd.f32 %v17194_v11, %v11307_v34  ;;  %v11306_v23 = vadd.f32 %v11267_v55, %v11132_v27  ;;  %v11135_v57 = vadd.f32 %v14504_v39, %v10961_v62  ;;  %v14518_v61 = vpop.f32.mrf.mxu1 }
 0x2c7   : > { %v11103_v12 = vpop.f32.mrf.mxu0 }
 0x2c8   : > { %13043 = vst.msk [vmem:[%s15864_s13 + $0x1c8] sm:$0xff] %vm1566_vm2, %v11315_v7  ;;  %v11314_v41 = vadd.f32 %v17194_v11, %v11306_v23  ;;  %v11309_v20 = vadd.f32 %v14518_v61, %v11135_v57  ;;  %v11134_v50 = vadd.f32 %v11103_v12, %v10960_v51  ;;  %v11277_v46 = vpop.f32.mrf.mxu1 }
 0x2c9   : > { %v14507_v8 = vpop.f32.mrf.mxu0 }
 0x2ca   : > { %13042 = vst.msk [vmem:[%s15864_s13 + $0x1c0] sm:$0xff] %vm1566_vm2, %v11314_v41  ;;  %v11317_v54 = vadd.f32 %v17194_v11, %v11309_v20  ;;  %v11308_v1 = vadd.f32 %v11277_v46, %v11134_v50  ;;  %v11137_v28 = vadd.f32 %v14507_v8, %v10963_v15  ;;  %v14521_v63 = vpop.f32.mrf.mxu1 }
 0x2cb   : > { %v11113_v38 = vpop.f32.mrf.mxu0 }
 0x2cc   : > { %13045 = vst.msk [vmem:[%s15864_s13 + $0x1d8] sm:$0xff] %vm1566_vm2, %v11317_v54  ;;  %v11316_v22 = vadd.f32 %v17194_v11, %v11308_v1  ;;  %v11311_v37 = vadd.f32 %v14521_v63, %v11137_v28  ;;  %v11136_v0 = vadd.f32 %v11113_v38, %v10962_v58  ;;  %v11287_v31 = vpop.f32.mrf.mxu1 }
 0x2cd   : > { %v14510_v49 = vpop.f32.mrf.mxu0 }
 0x2ce   : > { %13044 = vst.msk [vmem:[%s15864_s13 + $0x1d0] sm:$0xff] %vm1566_vm2, %v11316_v22  ;;  %v11319_v18 = vadd.f32 %v17194_v11, %v11311_v37  ;;  %v11310_v52 = vadd.f32 %v11287_v31, %v11136_v0  ;;  %v11139_v9 = vadd.f32 %v14510_v49, %v10965_v59  ;;  %v14524_v16 = vpop.f32.mrf.mxu1 }
 0x2cf   : > { %v11123_v24 = vpop.f32.mrf.mxu0 }
 0x2d0   : > { %13047 = vst.msk [vmem:[%s15864_s13 + $0x1e8] sm:$0xff] %vm1566_vm2, %v11319_v18  ;;  %v11318_v45 = vadd.f32 %v17194_v11, %v11310_v52  ;;  %v11313_v6 = vadd.f32 %v14524_v16, %v11139_v9  ;;  %v11138_v47 = vadd.f32 %v11123_v24, %v10964_v30  ;;  %v11297_v2 = vpop.f32.mrf.mxu1 }
 0x2d2   : > { %13046 = vst.msk [vmem:[%s15864_s13 + $0x1e0] sm:$0xff] %vm1566_vm2, %v11318_v45  ;;  %v11321_v56 = vadd.f32 %v17194_v11, %v11313_v6  ;;  %v11312_v43 = vadd.f32 %v11297_v2, %v11138_v47 }
 0x2d4   : > { %13049 = vst.msk [vmem:[%s15864_s13 + $0x1f8] sm:$0xff] %vm1566_vm2, %v11321_v56  ;;  %v11320_v10 = vadd.f32 %v17194_v11, %v11312_v43 }
 0x2d6   : > { %13048 = vst.msk [vmem:[%s15864_s13 + $0x1f0] sm:$0xff] %vm1566_vm2, %v11320_v10 }
 0x2d7 PF: > { %s13_s12 = sadd.s32 1, %s15055_s12  }
 0x2d8   : > { %p10_p4 = scmp.ge.s32.totalorder %s13_s12, 4  }
 0x2da   :  { %12 = sbr.rel (!%p10_p4) target bundleno = 1 (0x1), region = 140 }

</bundles_post_ra>
